<compile_context>
chip_gen: v7x
topology: tpu7x:2x2x1
jax: 0.10.0
libtpu: 0.0.40
codegen_flags: <defaults>
</compile_context>

<pallas_src>
import jax
import jax.numpy as jnp
import numpy as np
from jax import lax
from jax.experimental import pallas as pl
from jax.experimental.pallas import tpu as pltpu

# Constants from LSTM_net_old.__init__
INPUT_SIZE = 1
HIDDEN = 5
NUM_LAYERS = 2
NUM_DIRS = 2
PROJ = 1
GATES = 4 * HIDDEN  # 20


def _flip_time(a):
    """Reverse a (T, ...) array along its leading (untiled) axis.

    One-shot, vectorized over whole (2B, .) slabs, off the recurrence critical path.
    """
    T = a.shape[0]
    return jnp.concatenate([a[i:i + 1] for i in range(T - 1, -1, -1)], axis=0)


def lstm_fused_kernel(x_ref, wih0_ref, wih1_ref, b_ref, whh_ref, whr_ref,
                      out_ref, pre_ref, hist_ref):
    # x_ref   : (T, 2B)  fused time-major input: cols [0:B] = x(t), [B:2B] = x(T-1-t)
    # wih0_ref: (2, G)   rows [l0-fwd, l0-bwd] of W_ih[:, 0]              (g rows x2)
    # wih1_ref: (4, G)   rows [l1f-feat0, l1f-feat1, l1b-feat0, l1b-feat1] (g rows x2)
    # b_ref   : (4, G)   rows (l,d) = (0,f),(0,b),(1,f),(1,b); b_ih + b_hh (g rows x2)
    # whh_ref : (4, G)   W_hh[:, 0] rows, same (l,d) order                 (g rows x2)
    # whr_ref : (4, H)   W_hr[0, :] rows, same (l,d) order                 (unscaled)
    # out_ref : (2, T, B)  (p0, p1) time-major; wrapper transposes to (B, 2, T)
    # pre_ref : (T, 2B, G) scratch, reused by both layers (bwd half time-reversed)
    # hist_ref: (T, 2B, 1) scratch, reused by both layers:
    #           hist[t, 0:B] = fwd h_proj at time t, hist[t, B:2B] = bwd h_proj at T-1-t
    T, NB = x_ref.shape
    B = NB // 2
    H = HIDDEN
    G = GATES

    def fuse_rows(ref, rf, rb, width):
        # (1, width) fwd row | (1, width) bwd row -> loop-invariant (2B, width) tile.
        f = jnp.broadcast_to(ref[rf:rf + 1, :], (B, width))
        bk = jnp.broadcast_to(ref[rb:rb + 1, :], (B, width))
        return jnp.concatenate([f, bk], axis=0)

    def run_layer(whh_fused, whr_fused):
        # One fused (fwd|bwd) recurrence: 2B rows advance together, T dependent steps.
        def step(t, carry):
            h_proj, c = carry                                   # (2B, 1), (2B, H)
            # carry-dependent work only: pre_ref[t] already holds bias + x @ W_ih
            gates = pre_ref[t] + h_proj * whh_fused             # (2B, G)
            sg = jax.nn.sigmoid(gates)                          # single EUP push
            i_g = sg[:, 0:H]
            f_g = sg[:, H:2 * H]
            g_g = 2.0 * sg[:, 2 * H:3 * H] - 1.0                # tanh(g) = 2*sigmoid(2g) - 1
            o_g = sg[:, 3 * H:4 * H]
            c = f_g * c + i_g * g_g
            h_full = o_g * jnp.tanh(c)                          # (2B, H)
            hw = h_full * whr_fused
            # proj_size=1: tree-reduce the 5 hidden lanes into the carried scalar state
            h_proj = (hw[:, 0:1] + hw[:, 1:2]) + ((hw[:, 2:3] + hw[:, 3:4]) + hw[:, 4:5])
            hist_ref[t] = h_proj                                # one store per step
            return h_proj, c

        init = (jnp.zeros((NB, 1), jnp.float32), jnp.zeros((NB, H), jnp.float32))
        lax.fori_loop(0, T, step, init, unroll=True)

    # ---- layer 0: input contributions, hoisted & vectorized over all T ---------
    xc = x_ref[...][:, :, None]                                 # (T, 2B, 1)
    pre_ref[...] = (fuse_rows(b_ref, 0, 1, G)[None]
                    + xc * fuse_rows(wih0_ref, 0, 1, G)[None])
    run_layer(fuse_rows(whh_ref, 0, 1, G), fuse_rows(whr_ref, 0, 1, H))

    # ---- layer 1: pre-activations from layer-0 projected outputs ---------------
    h0 = hist_ref[...]                                          # (T, 2B, 1)
    h0r = _flip_time(h0)                                        # single vectorized flip
    y0f = h0[:, 0:B, :]        # fwd output at time t
    y0b = h0r[:, B:NB, :]      # bwd output at time t
    y0f_r = h0r[:, 0:B, :]     # fwd output at time T-1-t
    y0b_r = h0[:, B:NB, :]     # bwd output at time T-1-t
    pre1_f = (b_ref[2:3, :][None] + y0f * wih1_ref[0:1, :][None]
              + y0b * wih1_ref[1:2, :][None])                   # fwd half, abs time t
    pre1_b = (b_ref[3:4, :][None] + y0f_r * wih1_ref[2:3, :][None]
              + y0b_r * wih1_ref[3:4, :][None])                 # bwd half, abs time T-1-t
    pre_ref[...] = jnp.concatenate([pre1_f, pre1_b], axis=1)
    run_layer(fuse_rows(whh_ref, 2, 3, G), fuse_rows(whr_ref, 2, 3, H))

    # ---- epilogue: ss = fwd + bwd; softmax({ss, 1-ss}) == sigmoid(2*ss - 1) -----
    h1 = hist_ref[...]
    h1r = _flip_time(h1)
    y1 = h1[:, 0:B, :] + h1r[:, B:NB, :]                        # (T, B, 1) at abs time t
    ss = jnp.sum(y1, axis=2)                                    # (T, B)
    p0 = jax.nn.sigmoid(2.0 * ss - 1.0)
    out_ref[0] = p0
    out_ref[1] = 1.0 - p0


def lstm_net_forward(x, wih0_p, wih1_p, b_p, whh_p, whr_p):
    B, T = x.shape
    x_tb = jnp.transpose(x)                                     # time-major (XLA plumbing)
    # fused-batch input; backward half already time-reversed on the wrapper side
    x_fused = jnp.concatenate([x_tb, x_tb[::-1]], axis=1)       # (T, 2B)
    out_tb = pl.pallas_call(
        lstm_fused_kernel,
        out_shape=jax.ShapeDtypeStruct((2, T, B), jnp.float32),
        in_specs=[pl.BlockSpec(memory_space=pltpu.MemorySpace.VMEM)] * 6,
        out_specs=pl.BlockSpec(memory_space=pltpu.MemorySpace.VMEM),
        scratch_shapes=[
            pltpu.VMEM((T, 2 * B, GATES), jnp.float32),  # fused pre-activations (both layers)
            pltpu.VMEM((T, 2 * B, 1), jnp.float32),      # fused h_proj history (both layers)
        ],
    )(x_fused, wih0_p, wih1_p, b_p, whh_p, whr_p)
    # TODO(synk): for very long T, chunk the time axis with a grid carrying h/c in
    # persistent scratch (v7x has only 64 MiB VMEM); likewise a leading "parallel"
    # grid axis over independent batch groups would spread work across v7x's 2 TCs.
    return jnp.transpose(out_tb, (2, 0, 1))                     # (B, 2, T), as in PyTorch


def init_lstm_params(key):
    """Deterministic synthetic params with the exact nn.LSTM(proj_size=1) shapes."""
    bound = 1.0 / np.sqrt(HIDDEN)
    params = []
    i = 0
    for l in range(NUM_LAYERS):
        in_f = INPUT_SIZE if l == 0 else NUM_DIRS * PROJ
        layer = []
        for d in range(NUM_DIRS):
            ks = jax.random.split(jax.random.fold_in(key, i), 5)
            i += 1
            layer.append({
                "w_ih": jax.random.uniform(ks[0], (GATES, in_f), jnp.float32, -bound, bound),
                "w_hh": jax.random.uniform(ks[1], (GATES, PROJ), jnp.float32, -bound, bound),
                "b_ih": jax.random.uniform(ks[2], (GATES,), jnp.float32, -bound, bound),
                "b_hh": jax.random.uniform(ks[3], (GATES,), jnp.float32, -bound, bound),
                "w_hr": jax.random.uniform(ks[4], (PROJ, HIDDEN), jnp.float32, -bound, bound),
            })
        params.append(layer)
    return params


def pack_params(params):
    """Pack nn.LSTM(proj_size=1, bidirectional) params; batch-size independent.

    The g-gate rows (tanh gate, rows 2H:3H) of every pre-activation weight/bias are
    pre-scaled by 2 so the kernel can recover tanh(g) = 2*sigmoid(2g) - 1 from a
    single full-tile sigmoid (one EUP push per step instead of two).
    """
    H = HIDDEN

    def g2(row):  # row: (GATES,)
        return row.at[2 * H:3 * H].multiply(2.0)

    order = [(0, 0), (0, 1), (1, 0), (1, 1)]                    # (layer, direction)
    wih0 = jnp.stack([g2(params[0][d]["w_ih"][:, 0]) for d in range(NUM_DIRS)])            # (2, G)
    wih1 = jnp.stack([g2(params[1][d]["w_ih"][:, f])
                      for d in range(NUM_DIRS) for f in range(2)])                          # (4, G)
    bias = jnp.stack([g2(params[l][d]["b_ih"] + params[l][d]["b_hh"]) for l, d in order])   # (4, G)
    whh = jnp.stack([g2(params[l][d]["w_hh"][:, 0]) for l, d in order])                     # (4, G)
    whr = jnp.stack([params[l][d]["w_hr"][0] for l, d in order])                            # (4, H)
    return wih0, wih1, bias, whh, whr


def lstm_net_ref(x, params):
    """Pure-JAX reference matching PyTorch LSTM(proj_size=1, bidirectional) semantics."""
    B, T = x.shape
    inp = x[..., None]  # (B, T, 1)
    for l in range(NUM_LAYERS):
        dir_outs = []
        for d in range(NUM_DIRS):
            p = params[l][d]
            h = jnp.zeros((B, PROJ), jnp.float32)
            c = jnp.zeros((B, HIDDEN), jnp.float32)
            hs = [None] * T
            order = range(T) if d == 0 else range(T - 1, -1, -1)
            for t in order:
                xt = inp[:, t, :]
                gates = xt @ p["w_ih"].T + h @ p["w_hh"].T + p["b_ih"] + p["b_hh"]
                i_g = jax.nn.sigmoid(gates[:, 0:HIDDEN])
                f_g = jax.nn.sigmoid(gates[:, HIDDEN:2 * HIDDEN])
                g_g = jnp.tanh(gates[:, 2 * HIDDEN:3 * HIDDEN])
                o_g = jax.nn.sigmoid(gates[:, 3 * HIDDEN:4 * HIDDEN])
                c = f_g * c + i_g * g_g
                h = (o_g * jnp.tanh(c)) @ p["w_hr"].T
                hs[t] = h
            dir_outs.append(jnp.stack(hs, axis=1))   # (B, T, 1)
        inp = jnp.concatenate(dir_outs, axis=2)       # (B, T, 2)
    ss = inp.sum(axis=2)                              # (B, T)
    stacked = jnp.stack([ss, 1.0 - ss], axis=1)       # (B, 2, T)
    return jax.nn.softmax(stacked, axis=1)


if __name__ == "__main__":
    key = jax.random.PRNGKey(0)
    B, T = 2, 16  # batch_size=2; x.view(B, -1, 1) -> seq_len=16, input_size=1
    x = jax.random.normal(jax.random.fold_in(key, 1000), (B, T), jnp.float32)

    params = init_lstm_params(key)
    packed = pack_params(params)

    out = jax.block_until_ready(lstm_net_forward(x, *packed))
    ref = jax.block_until_ready(lstm_net_ref(x, params))

    assert out.shape == (B, 2, T)
    assert np.all(np.isfinite(np.asarray(out)))
    np.testing.assert_allclose(np.asarray(out).sum(axis=1), 1.0, rtol=1e-4, atol=1e-4)
    np.testing.assert_allclose(np.asarray(out), np.asarray(ref), rtol=1e-3, atol=1e-3)

    print("KERNEL_OK")
</pallas_src>

<mosaic_0001>
module attributes {stable_mosaic.version = 11 : i64} {
  func.func @lstm_fused_kernel(%arg0: memref<16x4xf32, #tpu.memory_space<vmem>>, %arg1: memref<2x20xf32, #tpu.memory_space<vmem>>, %arg2: memref<4x20xf32, #tpu.memory_space<vmem>>, %arg3: memref<4x20xf32, #tpu.memory_space<vmem>>, %arg4: memref<4x20xf32, #tpu.memory_space<vmem>>, %arg5: memref<4x5xf32, #tpu.memory_space<vmem>>, %arg6: memref<2x16x2xf32, #tpu.memory_space<vmem>>, %arg7: memref<16x4x20xf32, #tpu.memory_space<vmem>>, %arg8: memref<16x4x1xf32, #tpu.memory_space<vmem>>) attributes {dimension_semantics = [], scalar_prefetch = 0 : i64, scratch_operands = 2 : i64, tpu.core_type = #tpu.core_type<tc>} {
    %c0 = arith.constant 0 : index
    %c0_0 = arith.constant 0 : index
    %0 = vector.load %arg0[%c0, %c0_0] : memref<16x4xf32, #tpu.memory_space<vmem>>, vector<16x4xf32>
    %1 = vector.shape_cast %0 : vector<16x4xf32> to vector<16x4x1xf32>
    %c0_1 = arith.constant 0 : index
    %c0_2 = arith.constant 0 : index
    %2 = vector.load %arg3[%c0_1, %c0_2] : memref<4x20xf32, #tpu.memory_space<vmem>>, vector<1x20xf32>
    %3 = vector.shape_cast %2 : vector<1x20xf32> to vector<1x20xf32>
    %4 = vector.broadcast %3 : vector<1x20xf32> to vector<2x20xf32>
    %c1 = arith.constant 1 : index
    %c0_3 = arith.constant 0 : index
    %5 = vector.load %arg3[%c1, %c0_3] : memref<4x20xf32, #tpu.memory_space<vmem>>, vector<1x20xf32>
    %6 = vector.shape_cast %5 : vector<1x20xf32> to vector<1x20xf32>
    %7 = vector.broadcast %6 : vector<1x20xf32> to vector<2x20xf32>
    %8 = tpu.concatenate %4, %7 in 0 : vector<2x20xf32>, vector<2x20xf32> -> vector<4x20xf32>
    %9 = vector.shape_cast %8 : vector<4x20xf32> to vector<1x4x20xf32>
    %c0_4 = arith.constant 0 : index
    %c0_5 = arith.constant 0 : index
    %10 = vector.load %arg1[%c0_4, %c0_5] : memref<2x20xf32, #tpu.memory_space<vmem>>, vector<1x20xf32>
    %11 = vector.shape_cast %10 : vector<1x20xf32> to vector<1x20xf32>
    %12 = vector.broadcast %11 : vector<1x20xf32> to vector<2x20xf32>
    %c1_6 = arith.constant 1 : index
    %c0_7 = arith.constant 0 : index
    %13 = vector.load %arg1[%c1_6, %c0_7] : memref<2x20xf32, #tpu.memory_space<vmem>>, vector<1x20xf32>
    %14 = vector.shape_cast %13 : vector<1x20xf32> to vector<1x20xf32>
    %15 = vector.broadcast %14 : vector<1x20xf32> to vector<2x20xf32>
    %16 = tpu.concatenate %12, %15 in 0 : vector<2x20xf32>, vector<2x20xf32> -> vector<4x20xf32>
    %17 = vector.shape_cast %16 : vector<4x20xf32> to vector<1x4x20xf32>
    %18 = vector.broadcast %1 : vector<16x4x1xf32> to vector<16x4x20xf32>
    %19 = vector.broadcast %17 : vector<1x4x20xf32> to vector<16x4x20xf32>
    %20 = arith.mulf %18, %19 : vector<16x4x20xf32>
    %21 = vector.broadcast %9 : vector<1x4x20xf32> to vector<16x4x20xf32>
    %22 = arith.addf %21, %20 : vector<16x4x20xf32>
    %c0_8 = arith.constant 0 : index
    %c0_9 = arith.constant 0 : index
    %c0_10 = arith.constant 0 : index
    %23 = vector.load %arg7[%c0_8, %c0_9, %c0_10] : memref<16x4x20xf32, #tpu.memory_space<vmem>>, vector<16x4x20xf32>
    tpu.vector_store %arg7[%c0_8, %c0_9, %c0_10], %22 {strides = array<i32>} : memref<16x4x20xf32, #tpu.memory_space<vmem>>, vector<16x4x20xf32>,
    %c0_11 = arith.constant 0 : index
    %c0_12 = arith.constant 0 : index
    %24 = vector.load %arg4[%c0_11, %c0_12] : memref<4x20xf32, #tpu.memory_space<vmem>>, vector<1x20xf32>
    %25 = vector.shape_cast %24 : vector<1x20xf32> to vector<1x20xf32>
    %26 = vector.broadcast %25 : vector<1x20xf32> to vector<2x20xf32>
    %c1_13 = arith.constant 1 : index
    %c0_14 = arith.constant 0 : index
    %27 = vector.load %arg4[%c1_13, %c0_14] : memref<4x20xf32, #tpu.memory_space<vmem>>, vector<1x20xf32>
    %28 = vector.shape_cast %27 : vector<1x20xf32> to vector<1x20xf32>
    %29 = vector.broadcast %28 : vector<1x20xf32> to vector<2x20xf32>
    %30 = tpu.concatenate %26, %29 in 0 : vector<2x20xf32>, vector<2x20xf32> -> vector<4x20xf32>
    %c0_15 = arith.constant 0 : index
    %c0_16 = arith.constant 0 : index
    %31 = vector.load %arg5[%c0_15, %c0_16] : memref<4x5xf32, #tpu.memory_space<vmem>>, vector<1x5xf32>
    %32 = vector.shape_cast %31 : vector<1x5xf32> to vector<1x5xf32>
    %33 = vector.broadcast %32 : vector<1x5xf32> to vector<2x5xf32>
    %c1_17 = arith.constant 1 : index
    %c0_18 = arith.constant 0 : index
    %34 = vector.load %arg5[%c1_17, %c0_18] : memref<4x5xf32, #tpu.memory_space<vmem>>, vector<1x5xf32>
    %35 = vector.shape_cast %34 : vector<1x5xf32> to vector<1x5xf32>
    %36 = vector.broadcast %35 : vector<1x5xf32> to vector<2x5xf32>
    %37 = tpu.concatenate %33, %36 in 0 : vector<2x5xf32>, vector<2x5xf32> -> vector<4x5xf32>
    %cst = arith.constant 0.000000e+00 : f32
    %38 = vector.broadcast %cst : f32 to vector<4x1xf32>
    %cst_19 = arith.constant 0.000000e+00 : f32
    %39 = vector.broadcast %cst_19 : f32 to vector<4x5xf32>
    %c0_i32 = arith.constant 0 : i32
    %40 = arith.index_cast %c0_i32 : i32 to index
    %c0_20 = arith.constant 0 : index
    %c0_21 = arith.constant 0 : index
    %41 = vector.load %arg7[%40, %c0_20, %c0_21] : memref<16x4x20xf32, #tpu.memory_space<vmem>>, vector<1x4x20xf32>
    %42 = vector.shape_cast %41 : vector<1x4x20xf32> to vector<4x20xf32>
    %43 = vector.broadcast %38 : vector<4x1xf32> to vector<4x20xf32>
    %44 = arith.mulf %43, %30 : vector<4x20xf32>
    %45 = arith.addf %42, %44 : vector<4x20xf32>
    %46 = arith.negf %45 : vector<4x20xf32>
    %47 = math.exp %46 : vector<4x20xf32>
    %cst_22 = arith.constant 1.000000e+00 : f32
    %48 = vector.broadcast %cst_22 : f32 to vector<4x20xf32>
    %49 = arith.addf %48, %47 : vector<4x20xf32>
    %50 = arith.divf %48, %49 : vector<4x20xf32>
    %51 = vector.extract_strided_slice %50 {offsets = [0, 0], sizes = [4, 5], strides = [1, 1]} : vector<4x20xf32> to vector<4x5xf32>
    %52 = vector.extract_strided_slice %50 {offsets = [0, 5], sizes = [4, 5], strides = [1, 1]} : vector<4x20xf32> to vector<4x5xf32>
    %53 = vector.extract_strided_slice %50 {offsets = [0, 10], sizes = [4, 5], strides = [1, 1]} : vector<4x20xf32> to vector<4x5xf32>
    %cst_23 = arith.constant 2.000000e+00 : f32
    %54 = vector.broadcast %cst_23 : f32 to vector<4x5xf32>
    %55 = arith.mulf %54, %53 : vector<4x5xf32>
    %cst_24 = arith.constant 1.000000e+00 : f32
    %56 = vector.broadcast %cst_24 : f32 to vector<4x5xf32>
    %57 = arith.subf %55, %56 : vector<4x5xf32>
    %58 = vector.extract_strided_slice %50 {offsets = [0, 15], sizes = [4, 5], strides = [1, 1]} : vector<4x20xf32> to vector<4x5xf32>
    %59 = arith.mulf %52, %39 : vector<4x5xf32>
    %60 = arith.mulf %51, %57 : vector<4x5xf32>
    %61 = arith.addf %59, %60 : vector<4x5xf32>
    %62 = math.tanh %61 : vector<4x5xf32>
    %63 = arith.mulf %58, %62 : vector<4x5xf32>
    %64 = arith.mulf %63, %37 : vector<4x5xf32>
    %65 = vector.extract_strided_slice %64 {offsets = [0, 0], sizes = [4, 1], strides = [1, 1]} : vector<4x5xf32> to vector<4x1xf32>
    %66 = vector.extract_strided_slice %64 {offsets = [0, 1], sizes = [4, 1], strides = [1, 1]} : vector<4x5xf32> to vector<4x1xf32>
    %67 = arith.addf %65, %66 : vector<4x1xf32>
    %68 = vector.extract_strided_slice %64 {offsets = [0, 2], sizes = [4, 1], strides = [1, 1]} : vector<4x5xf32> to vector<4x1xf32>
    %69 = vector.extract_strided_slice %64 {offsets = [0, 3], sizes = [4, 1], strides = [1, 1]} : vector<4x5xf32> to vector<4x1xf32>
    %70 = arith.addf %68, %69 : vector<4x1xf32>
    %71 = vector.extract_strided_slice %64 {offsets = [0, 4], sizes = [4, 1], strides = [1, 1]} : vector<4x5xf32> to vector<4x1xf32>
    %72 = arith.addf %70, %71 : vector<4x1xf32>
    %73 = arith.addf %67, %72 : vector<4x1xf32>
    %74 = arith.index_cast %c0_i32 : i32 to index
    %c0_25 = arith.constant 0 : index
    %c0_26 = arith.constant 0 : index
    %75 = vector.load %arg8[%74, %c0_25, %c0_26] : memref<16x4x1xf32, #tpu.memory_space<vmem>>, vector<1x4x1xf32>
    %76 = vector.shape_cast %75 : vector<1x4x1xf32> to vector<4x1xf32>
    %77 = vector.shape_cast %73 : vector<4x1xf32> to vector<1x4x1xf32>
    tpu.vector_store %arg8[%74, %c0_25, %c0_26], %77 {strides = array<i32>} : memref<16x4x1xf32, #tpu.memory_space<vmem>>, vector<1x4x1xf32>,
    %c1_i32 = arith.constant 1 : i32
    %78 = arith.index_cast %c1_i32 : i32 to index
    %c0_27 = arith.constant 0 : index
    %c0_28 = arith.constant 0 : index
    %79 = vector.load %arg7[%78, %c0_27, %c0_28] : memref<16x4x20xf32, #tpu.memory_space<vmem>>, vector<1x4x20xf32>
    %80 = vector.shape_cast %79 : vector<1x4x20xf32> to vector<4x20xf32>
    %81 = vector.broadcast %73 : vector<4x1xf32> to vector<4x20xf32>
    %82 = arith.mulf %81, %30 : vector<4x20xf32>
    %83 = arith.addf %80, %82 : vector<4x20xf32>
    %84 = arith.negf %83 : vector<4x20xf32>
    %85 = math.exp %84 : vector<4x20xf32>
    %cst_29 = arith.constant 1.000000e+00 : f32
    %86 = vector.broadcast %cst_29 : f32 to vector<4x20xf32>
    %87 = arith.addf %86, %85 : vector<4x20xf32>
    %88 = arith.divf %86, %87 : vector<4x20xf32>
    %89 = vector.extract_strided_slice %88 {offsets = [0, 0], sizes = [4, 5], strides = [1, 1]} : vector<4x20xf32> to vector<4x5xf32>
    %90 = vector.extract_strided_slice %88 {offsets = [0, 5], sizes = [4, 5], strides = [1, 1]} : vector<4x20xf32> to vector<4x5xf32>
    %91 = vector.extract_strided_slice %88 {offsets = [0, 10], sizes = [4, 5], strides = [1, 1]} : vector<4x20xf32> to vector<4x5xf32>
    %cst_30 = arith.constant 2.000000e+00 : f32
    %92 = vector.broadcast %cst_30 : f32 to vector<4x5xf32>
    %93 = arith.mulf %92, %91 : vector<4x5xf32>
    %cst_31 = arith.constant 1.000000e+00 : f32
    %94 = vector.broadcast %cst_31 : f32 to vector<4x5xf32>
    %95 = arith.subf %93, %94 : vector<4x5xf32>
    %96 = vector.extract_strided_slice %88 {offsets = [0, 15], sizes = [4, 5], strides = [1, 1]} : vector<4x20xf32> to vector<4x5xf32>
    %97 = arith.mulf %90, %61 : vector<4x5xf32>
    %98 = arith.mulf %89, %95 : vector<4x5xf32>
    %99 = arith.addf %97, %98 : vector<4x5xf32>
    %100 = math.tanh %99 : vector<4x5xf32>
    %101 = arith.mulf %96, %100 : vector<4x5xf32>
    %102 = arith.mulf %101, %37 : vector<4x5xf32>
    %103 = vector.extract_strided_slice %102 {offsets = [0, 0], sizes = [4, 1], strides = [1, 1]} : vector<4x5xf32> to vector<4x1xf32>
    %104 = vector.extract_strided_slice %102 {offsets = [0, 1], sizes = [4, 1], strides = [1, 1]} : vector<4x5xf32> to vector<4x1xf32>
    %105 = arith.addf %103, %104 : vector<4x1xf32>
    %106 = vector.extract_strided_slice %102 {offsets = [0, 2], sizes = [4, 1], strides = [1, 1]} : vector<4x5xf32> to vector<4x1xf32>
    %107 = vector.extract_strided_slice %102 {offsets = [0, 3], sizes = [4, 1], strides = [1, 1]} : vector<4x5xf32> to vector<4x1xf32>
    %108 = arith.addf %106, %107 : vector<4x1xf32>
    %109 = vector.extract_strided_slice %102 {offsets = [0, 4], sizes = [4, 1], strides = [1, 1]} : vector<4x5xf32> to vector<4x1xf32>
    %110 = arith.addf %108, %109 : vector<4x1xf32>
    %111 = arith.addf %105, %110 : vector<4x1xf32>
    %112 = arith.index_cast %c1_i32 : i32 to index
    %c0_32 = arith.constant 0 : index
    %c0_33 = arith.constant 0 : index
    %113 = vector.load %arg8[%112, %c0_32, %c0_33] : memref<16x4x1xf32, #tpu.memory_space<vmem>>, vector<1x4x1xf32>
    %114 = vector.shape_cast %113 : vector<1x4x1xf32> to vector<4x1xf32>
    %115 = vector.shape_cast %111 : vector<4x1xf32> to vector<1x4x1xf32>
    tpu.vector_store %arg8[%112, %c0_32, %c0_33], %115 {strides = array<i32>} : memref<16x4x1xf32, #tpu.memory_space<vmem>>, vector<1x4x1xf32>,
    %c2_i32 = arith.constant 2 : i32
    %116 = arith.index_cast %c2_i32 : i32 to index
    %c0_34 = arith.constant 0 : index
    %c0_35 = arith.constant 0 : index
    %117 = vector.load %arg7[%116, %c0_34, %c0_35] : memref<16x4x20xf32, #tpu.memory_space<vmem>>, vector<1x4x20xf32>
    %118 = vector.shape_cast %117 : vector<1x4x20xf32> to vector<4x20xf32>
    %119 = vector.broadcast %111 : vector<4x1xf32> to vector<4x20xf32>
    %120 = arith.mulf %119, %30 : vector<4x20xf32>
    %121 = arith.addf %118, %120 : vector<4x20xf32>
    %122 = arith.negf %121 : vector<4x20xf32>
    %123 = math.exp %122 : vector<4x20xf32>
    %cst_36 = arith.constant 1.000000e+00 : f32
    %124 = vector.broadcast %cst_36 : f32 to vector<4x20xf32>
    %125 = arith.addf %124, %123 : vector<4x20xf32>
    %126 = arith.divf %124, %125 : vector<4x20xf32>
    %127 = vector.extract_strided_slice %126 {offsets = [0, 0], sizes = [4, 5], strides = [1, 1]} : vector<4x20xf32> to vector<4x5xf32>
    %128 = vector.extract_strided_slice %126 {offsets = [0, 5], sizes = [4, 5], strides = [1, 1]} : vector<4x20xf32> to vector<4x5xf32>
    %129 = vector.extract_strided_slice %126 {offsets = [0, 10], sizes = [4, 5], strides = [1, 1]} : vector<4x20xf32> to vector<4x5xf32>
    %cst_37 = arith.constant 2.000000e+00 : f32
    %130 = vector.broadcast %cst_37 : f32 to vector<4x5xf32>
    %131 = arith.mulf %130, %129 : vector<4x5xf32>
    %cst_38 = arith.constant 1.000000e+00 : f32
    %132 = vector.broadcast %cst_38 : f32 to vector<4x5xf32>
    %133 = arith.subf %131, %132 : vector<4x5xf32>
    %134 = vector.extract_strided_slice %126 {offsets = [0, 15], sizes = [4, 5], strides = [1, 1]} : vector<4x20xf32> to vector<4x5xf32>
    %135 = arith.mulf %128, %99 : vector<4x5xf32>
    %136 = arith.mulf %127, %133 : vector<4x5xf32>
    %137 = arith.addf %135, %136 : vector<4x5xf32>
    %138 = math.tanh %137 : vector<4x5xf32>
    %139 = arith.mulf %134, %138 : vector<4x5xf32>
    %140 = arith.mulf %139, %37 : vector<4x5xf32>
    %141 = vector.extract_strided_slice %140 {offsets = [0, 0], sizes = [4, 1], strides = [1, 1]} : vector<4x5xf32> to vector<4x1xf32>
    %142 = vector.extract_strided_slice %140 {offsets = [0, 1], sizes = [4, 1], strides = [1, 1]} : vector<4x5xf32> to vector<4x1xf32>
    %143 = arith.addf %141, %142 : vector<4x1xf32>
    %144 = vector.extract_strided_slice %140 {offsets = [0, 2], sizes = [4, 1], strides = [1, 1]} : vector<4x5xf32> to vector<4x1xf32>
    %145 = vector.extract_strided_slice %140 {offsets = [0, 3], sizes = [4, 1], strides = [1, 1]} : vector<4x5xf32> to vector<4x1xf32>
    %146 = arith.addf %144, %145 : vector<4x1xf32>
    %147 = vector.extract_strided_slice %140 {offsets = [0, 4], sizes = [4, 1], strides = [1, 1]} : vector<4x5xf32> to vector<4x1xf32>
    %148 = arith.addf %146, %147 : vector<4x1xf32>
    %149 = arith.addf %143, %148 : vector<4x1xf32>
    %150 = arith.index_cast %c2_i32 : i32 to index
    %c0_39 = arith.constant 0 : index
    %c0_40 = arith.constant 0 : index
    %151 = vector.load %arg8[%150, %c0_39, %c0_40] : memref<16x4x1xf32, #tpu.memory_space<vmem>>, vector<1x4x1xf32>
    %152 = vector.shape_cast %151 : vector<1x4x1xf32> to vector<4x1xf32>
    %153 = vector.shape_cast %149 : vector<4x1xf32> to vector<1x4x1xf32>
    tpu.vector_store %arg8[%150, %c0_39, %c0_40], %153 {strides = array<i32>} : memref<16x4x1xf32, #tpu.memory_space<vmem>>, vector<1x4x1xf32>,
    %c3_i32 = arith.constant 3 : i32
    %154 = arith.index_cast %c3_i32 : i32 to index
    %c0_41 = arith.constant 0 : index
    %c0_42 = arith.constant 0 : index
    %155 = vector.load %arg7[%154, %c0_41, %c0_42] : memref<16x4x20xf32, #tpu.memory_space<vmem>>, vector<1x4x20xf32>
    %156 = vector.shape_cast %155 : vector<1x4x20xf32> to vector<4x20xf32>
    %157 = vector.broadcast %149 : vector<4x1xf32> to vector<4x20xf32>
    %158 = arith.mulf %157, %30 : vector<4x20xf32>
    %159 = arith.addf %156, %158 : vector<4x20xf32>
    %160 = arith.negf %159 : vector<4x20xf32>
    %161 = math.exp %160 : vector<4x20xf32>
    %cst_43 = arith.constant 1.000000e+00 : f32
    %162 = vector.broadcast %cst_43 : f32 to vector<4x20xf32>
    %163 = arith.addf %162, %161 : vector<4x20xf32>
    %164 = arith.divf %162, %163 : vector<4x20xf32>
    %165 = vector.extract_strided_slice %164 {offsets = [0, 0], sizes = [4, 5], strides = [1, 1]} : vector<4x20xf32> to vector<4x5xf32>
    %166 = vector.extract_strided_slice %164 {offsets = [0, 5], sizes = [4, 5], strides = [1, 1]} : vector<4x20xf32> to vector<4x5xf32>
    %167 = vector.extract_strided_slice %164 {offsets = [0, 10], sizes = [4, 5], strides = [1, 1]} : vector<4x20xf32> to vector<4x5xf32>
    %cst_44 = arith.constant 2.000000e+00 : f32
    %168 = vector.broadcast %cst_44 : f32 to vector<4x5xf32>
    %169 = arith.mulf %168, %167 : vector<4x5xf32>
    %cst_45 = arith.constant 1.000000e+00 : f32
    %170 = vector.broadcast %cst_45 : f32 to vector<4x5xf32>
    %171 = arith.subf %169, %170 : vector<4x5xf32>
    %172 = vector.extract_strided_slice %164 {offsets = [0, 15], sizes = [4, 5], strides = [1, 1]} : vector<4x20xf32> to vector<4x5xf32>
    %173 = arith.mulf %166, %137 : vector<4x5xf32>
    %174 = arith.mulf %165, %171 : vector<4x5xf32>
    %175 = arith.addf %173, %174 : vector<4x5xf32>
    %176 = math.tanh %175 : vector<4x5xf32>
    %177 = arith.mulf %172, %176 : vector<4x5xf32>
    %178 = arith.mulf %177, %37 : vector<4x5xf32>
    %179 = vector.extract_strided_slice %178 {offsets = [0, 0], sizes = [4, 1], strides = [1, 1]} : vector<4x5xf32> to vector<4x1xf32>
    %180 = vector.extract_strided_slice %178 {offsets = [0, 1], sizes = [4, 1], strides = [1, 1]} : vector<4x5xf32> to vector<4x1xf32>
    %181 = arith.addf %179, %180 : vector<4x1xf32>
    %182 = vector.extract_strided_slice %178 {offsets = [0, 2], sizes = [4, 1], strides = [1, 1]} : vector<4x5xf32> to vector<4x1xf32>
    %183 = vector.extract_strided_slice %178 {offsets = [0, 3], sizes = [4, 1], strides = [1, 1]} : vector<4x5xf32> to vector<4x1xf32>
    %184 = arith.addf %182, %183 : vector<4x1xf32>
    %185 = vector.extract_strided_slice %178 {offsets = [0, 4], sizes = [4, 1], strides = [1, 1]} : vector<4x5xf32> to vector<4x1xf32>
    %186 = arith.addf %184, %185 : vector<4x1xf32>
    %187 = arith.addf %181, %186 : vector<4x1xf32>
    %188 = arith.index_cast %c3_i32 : i32 to index
    %c0_46 = arith.constant 0 : index
    %c0_47 = arith.constant 0 : index
    %189 = vector.load %arg8[%188, %c0_46, %c0_47] : memref<16x4x1xf32, #tpu.memory_space<vmem>>, vector<1x4x1xf32>
    %190 = vector.shape_cast %189 : vector<1x4x1xf32> to vector<4x1xf32>
    %191 = vector.shape_cast %187 : vector<4x1xf32> to vector<1x4x1xf32>
    tpu.vector_store %arg8[%188, %c0_46, %c0_47], %191 {strides = array<i32>} : memref<16x4x1xf32, #tpu.memory_space<vmem>>, vector<1x4x1xf32>,
    %c4_i32 = arith.constant 4 : i32
    %192 = arith.index_cast %c4_i32 : i32 to index
    %c0_48 = arith.constant 0 : index
    %c0_49 = arith.constant 0 : index
    %193 = vector.load %arg7[%192, %c0_48, %c0_49] : memref<16x4x20xf32, #tpu.memory_space<vmem>>, vector<1x4x20xf32>
    %194 = vector.shape_cast %193 : vector<1x4x20xf32> to vector<4x20xf32>
    %195 = vector.broadcast %187 : vector<4x1xf32> to vector<4x20xf32>
    %196 = arith.mulf %195, %30 : vector<4x20xf32>
    %197 = arith.addf %194, %196 : vector<4x20xf32>
    %198 = arith.negf %197 : vector<4x20xf32>
    %199 = math.exp %198 : vector<4x20xf32>
    %cst_50 = arith.constant 1.000000e+00 : f32
    %200 = vector.broadcast %cst_50 : f32 to vector<4x20xf32>
    %201 = arith.addf %200, %199 : vector<4x20xf32>
    %202 = arith.divf %200, %201 : vector<4x20xf32>
    %203 = vector.extract_strided_slice %202 {offsets = [0, 0], sizes = [4, 5], strides = [1, 1]} : vector<4x20xf32> to vector<4x5xf32>
    %204 = vector.extract_strided_slice %202 {offsets = [0, 5], sizes = [4, 5], strides = [1, 1]} : vector<4x20xf32> to vector<4x5xf32>
    %205 = vector.extract_strided_slice %202 {offsets = [0, 10], sizes = [4, 5], strides = [1, 1]} : vector<4x20xf32> to vector<4x5xf32>
    %cst_51 = arith.constant 2.000000e+00 : f32
    %206 = vector.broadcast %cst_51 : f32 to vector<4x5xf32>
    %207 = arith.mulf %206, %205 : vector<4x5xf32>
    %cst_52 = arith.constant 1.000000e+00 : f32
    %208 = vector.broadcast %cst_52 : f32 to vector<4x5xf32>
    %209 = arith.subf %207, %208 : vector<4x5xf32>
    %210 = vector.extract_strided_slice %202 {offsets = [0, 15], sizes = [4, 5], strides = [1, 1]} : vector<4x20xf32> to vector<4x5xf32>
    %211 = arith.mulf %204, %175 : vector<4x5xf32>
    %212 = arith.mulf %203, %209 : vector<4x5xf32>
    %213 = arith.addf %211, %212 : vector<4x5xf32>
    %214 = math.tanh %213 : vector<4x5xf32>
    %215 = arith.mulf %210, %214 : vector<4x5xf32>
    %216 = arith.mulf %215, %37 : vector<4x5xf32>
    %217 = vector.extract_strided_slice %216 {offsets = [0, 0], sizes = [4, 1], strides = [1, 1]} : vector<4x5xf32> to vector<4x1xf32>
    %218 = vector.extract_strided_slice %216 {offsets = [0, 1], sizes = [4, 1], strides = [1, 1]} : vector<4x5xf32> to vector<4x1xf32>
    %219 = arith.addf %217, %218 : vector<4x1xf32>
    %220 = vector.extract_strided_slice %216 {offsets = [0, 2], sizes = [4, 1], strides = [1, 1]} : vector<4x5xf32> to vector<4x1xf32>
    %221 = vector.extract_strided_slice %216 {offsets = [0, 3], sizes = [4, 1], strides = [1, 1]} : vector<4x5xf32> to vector<4x1xf32>
    %222 = arith.addf %220, %221 : vector<4x1xf32>
    %223 = vector.extract_strided_slice %216 {offsets = [0, 4], sizes = [4, 1], strides = [1, 1]} : vector<4x5xf32> to vector<4x1xf32>
    %224 = arith.addf %222, %223 : vector<4x1xf32>
    %225 = arith.addf %219, %224 : vector<4x1xf32>
    %226 = arith.index_cast %c4_i32 : i32 to index
    %c0_53 = arith.constant 0 : index
    %c0_54 = arith.constant 0 : index
    %227 = vector.load %arg8[%226, %c0_53, %c0_54] : memref<16x4x1xf32, #tpu.memory_space<vmem>>, vector<1x4x1xf32>
    %228 = vector.shape_cast %227 : vector<1x4x1xf32> to vector<4x1xf32>
    %229 = vector.shape_cast %225 : vector<4x1xf32> to vector<1x4x1xf32>
    tpu.vector_store %arg8[%226, %c0_53, %c0_54], %229 {strides = array<i32>} : memref<16x4x1xf32, #tpu.memory_space<vmem>>, vector<1x4x1xf32>,
    %c5_i32 = arith.constant 5 : i32
    %230 = arith.index_cast %c5_i32 : i32 to index
    %c0_55 = arith.constant 0 : index
    %c0_56 = arith.constant 0 : index
    %231 = vector.load %arg7[%230, %c0_55, %c0_56] : memref<16x4x20xf32, #tpu.memory_space<vmem>>, vector<1x4x20xf32>
    %232 = vector.shape_cast %231 : vector<1x4x20xf32> to vector<4x20xf32>
    %233 = vector.broadcast %225 : vector<4x1xf32> to vector<4x20xf32>
    %234 = arith.mulf %233, %30 : vector<4x20xf32>
    %235 = arith.addf %232, %234 : vector<4x20xf32>
    %236 = arith.negf %235 : vector<4x20xf32>
    %237 = math.exp %236 : vector<4x20xf32>
    %cst_57 = arith.constant 1.000000e+00 : f32
    %238 = vector.broadcast %cst_57 : f32 to vector<4x20xf32>
    %239 = arith.addf %238, %237 : vector<4x20xf32>
    %240 = arith.divf %238, %239 : vector<4x20xf32>
    %241 = vector.extract_strided_slice %240 {offsets = [0, 0], sizes = [4, 5], strides = [1, 1]} : vector<4x20xf32> to vector<4x5xf32>
    %242 = vector.extract_strided_slice %240 {offsets = [0, 5], sizes = [4, 5], strides = [1, 1]} : vector<4x20xf32> to vector<4x5xf32>
    %243 = vector.extract_strided_slice %240 {offsets = [0, 10], sizes = [4, 5], strides = [1, 1]} : vector<4x20xf32> to vector<4x5xf32>
    %cst_58 = arith.constant 2.000000e+00 : f32
    %244 = vector.broadcast %cst_58 : f32 to vector<4x5xf32>
    %245 = arith.mulf %244, %243 : vector<4x5xf32>
    %cst_59 = arith.constant 1.000000e+00 : f32
    %246 = vector.broadcast %cst_59 : f32 to vector<4x5xf32>
    %247 = arith.subf %245, %246 : vector<4x5xf32>
    %248 = vector.extract_strided_slice %240 {offsets = [0, 15], sizes = [4, 5], strides = [1, 1]} : vector<4x20xf32> to vector<4x5xf32>
    %249 = arith.mulf %242, %213 : vector<4x5xf32>
    %250 = arith.mulf %241, %247 : vector<4x5xf32>
    %251 = arith.addf %249, %250 : vector<4x5xf32>
    %252 = math.tanh %251 : vector<4x5xf32>
    %253 = arith.mulf %248, %252 : vector<4x5xf32>
    %254 = arith.mulf %253, %37 : vector<4x5xf32>
    %255 = vector.extract_strided_slice %254 {offsets = [0, 0], sizes = [4, 1], strides = [1, 1]} : vector<4x5xf32> to vector<4x1xf32>
    %256 = vector.extract_strided_slice %254 {offsets = [0, 1], sizes = [4, 1], strides = [1, 1]} : vector<4x5xf32> to vector<4x1xf32>
    %257 = arith.addf %255, %256 : vector<4x1xf32>
    %258 = vector.extract_strided_slice %254 {offsets = [0, 2], sizes = [4, 1], strides = [1, 1]} : vector<4x5xf32> to vector<4x1xf32>
    %259 = vector.extract_strided_slice %254 {offsets = [0, 3], sizes = [4, 1], strides = [1, 1]} : vector<4x5xf32> to vector<4x1xf32>
    %260 = arith.addf %258, %259 : vector<4x1xf32>
    %261 = vector.extract_strided_slice %254 {offsets = [0, 4], sizes = [4, 1], strides = [1, 1]} : vector<4x5xf32> to vector<4x1xf32>
    %262 = arith.addf %260, %261 : vector<4x1xf32>
    %263 = arith.addf %257, %262 : vector<4x1xf32>
    %264 = arith.index_cast %c5_i32 : i32 to index
    %c0_60 = arith.constant 0 : index
    %c0_61 = arith.constant 0 : index
    %265 = vector.load %arg8[%264, %c0_60, %c0_61] : memref<16x4x1xf32, #tpu.memory_space<vmem>>, vector<1x4x1xf32>
    %266 = vector.shape_cast %265 : vector<1x4x1xf32> to vector<4x1xf32>
    %267 = vector.shape_cast %263 : vector<4x1xf32> to vector<1x4x1xf32>
    tpu.vector_store %arg8[%264, %c0_60, %c0_61], %267 {strides = array<i32>} : memref<16x4x1xf32, #tpu.memory_space<vmem>>, vector<1x4x1xf32>,
    %c6_i32 = arith.constant 6 : i32
    %268 = arith.index_cast %c6_i32 : i32 to index
    %c0_62 = arith.constant 0 : index
    %c0_63 = arith.constant 0 : index
    %269 = vector.load %arg7[%268, %c0_62, %c0_63] : memref<16x4x20xf32, #tpu.memory_space<vmem>>, vector<1x4x20xf32>
    %270 = vector.shape_cast %269 : vector<1x4x20xf32> to vector<4x20xf32>
    %271 = vector.broadcast %263 : vector<4x1xf32> to vector<4x20xf32>
    %272 = arith.mulf %271, %30 : vector<4x20xf32>
    %273 = arith.addf %270, %272 : vector<4x20xf32>
    %274 = arith.negf %273 : vector<4x20xf32>
    %275 = math.exp %274 : vector<4x20xf32>
    %cst_64 = arith.constant 1.000000e+00 : f32
    %276 = vector.broadcast %cst_64 : f32 to vector<4x20xf32>
    %277 = arith.addf %276, %275 : vector<4x20xf32>
    %278 = arith.divf %276, %277 : vector<4x20xf32>
    %279 = vector.extract_strided_slice %278 {offsets = [0, 0], sizes = [4, 5], strides = [1, 1]} : vector<4x20xf32> to vector<4x5xf32>
    %280 = vector.extract_strided_slice %278 {offsets = [0, 5], sizes = [4, 5], strides = [1, 1]} : vector<4x20xf32> to vector<4x5xf32>
    %281 = vector.extract_strided_slice %278 {offsets = [0, 10], sizes = [4, 5], strides = [1, 1]} : vector<4x20xf32> to vector<4x5xf32>
    %cst_65 = arith.constant 2.000000e+00 : f32
    %282 = vector.broadcast %cst_65 : f32 to vector<4x5xf32>
    %283 = arith.mulf %282, %281 : vector<4x5xf32>
    %cst_66 = arith.constant 1.000000e+00 : f32
    %284 = vector.broadcast %cst_66 : f32 to vector<4x5xf32>
    %285 = arith.subf %283, %284 : vector<4x5xf32>
    %286 = vector.extract_strided_slice %278 {offsets = [0, 15], sizes = [4, 5], strides = [1, 1]} : vector<4x20xf32> to vector<4x5xf32>
    %287 = arith.mulf %280, %251 : vector<4x5xf32>
    %288 = arith.mulf %279, %285 : vector<4x5xf32>
    %289 = arith.addf %287, %288 : vector<4x5xf32>
    %290 = math.tanh %289 : vector<4x5xf32>
    %291 = arith.mulf %286, %290 : vector<4x5xf32>
    %292 = arith.mulf %291, %37 : vector<4x5xf32>
    %293 = vector.extract_strided_slice %292 {offsets = [0, 0], sizes = [4, 1], strides = [1, 1]} : vector<4x5xf32> to vector<4x1xf32>
    %294 = vector.extract_strided_slice %292 {offsets = [0, 1], sizes = [4, 1], strides = [1, 1]} : vector<4x5xf32> to vector<4x1xf32>
    %295 = arith.addf %293, %294 : vector<4x1xf32>
    %296 = vector.extract_strided_slice %292 {offsets = [0, 2], sizes = [4, 1], strides = [1, 1]} : vector<4x5xf32> to vector<4x1xf32>
    %297 = vector.extract_strided_slice %292 {offsets = [0, 3], sizes = [4, 1], strides = [1, 1]} : vector<4x5xf32> to vector<4x1xf32>
    %298 = arith.addf %296, %297 : vector<4x1xf32>
    %299 = vector.extract_strided_slice %292 {offsets = [0, 4], sizes = [4, 1], strides = [1, 1]} : vector<4x5xf32> to vector<4x1xf32>
    %300 = arith.addf %298, %299 : vector<4x1xf32>
    %301 = arith.addf %295, %300 : vector<4x1xf32>
    %302 = arith.index_cast %c6_i32 : i32 to index
    %c0_67 = arith.constant 0 : index
    %c0_68 = arith.constant 0 : index
    %303 = vector.load %arg8[%302, %c0_67, %c0_68] : memref<16x4x1xf32, #tpu.memory_space<vmem>>, vector<1x4x1xf32>
    %304 = vector.shape_cast %303 : vector<1x4x1xf32> to vector<4x1xf32>
    %305 = vector.shape_cast %301 : vector<4x1xf32> to vector<1x4x1xf32>
    tpu.vector_store %arg8[%302, %c0_67, %c0_68], %305 {strides = array<i32>} : memref<16x4x1xf32, #tpu.memory_space<vmem>>, vector<1x4x1xf32>,
    %c7_i32 = arith.constant 7 : i32
    %306 = arith.index_cast %c7_i32 : i32 to index
    %c0_69 = arith.constant 0 : index
    %c0_70 = arith.constant 0 : index
    %307 = vector.load %arg7[%306, %c0_69, %c0_70] : memref<16x4x20xf32, #tpu.memory_space<vmem>>, vector<1x4x20xf32>
    %308 = vector.shape_cast %307 : vector<1x4x20xf32> to vector<4x20xf32>
    %309 = vector.broadcast %301 : vector<4x1xf32> to vector<4x20xf32>
    %310 = arith.mulf %309, %30 : vector<4x20xf32>
    %311 = arith.addf %308, %310 : vector<4x20xf32>
    %312 = arith.negf %311 : vector<4x20xf32>
    %313 = math.exp %312 : vector<4x20xf32>
    %cst_71 = arith.constant 1.000000e+00 : f32
    %314 = vector.broadcast %cst_71 : f32 to vector<4x20xf32>
    %315 = arith.addf %314, %313 : vector<4x20xf32>
    %316 = arith.divf %314, %315 : vector<4x20xf32>
    %317 = vector.extract_strided_slice %316 {offsets = [0, 0], sizes = [4, 5], strides = [1, 1]} : vector<4x20xf32> to vector<4x5xf32>
    %318 = vector.extract_strided_slice %316 {offsets = [0, 5], sizes = [4, 5], strides = [1, 1]} : vector<4x20xf32> to vector<4x5xf32>
    %319 = vector.extract_strided_slice %316 {offsets = [0, 10], sizes = [4, 5], strides = [1, 1]} : vector<4x20xf32> to vector<4x5xf32>
    %cst_72 = arith.constant 2.000000e+00 : f32
    %320 = vector.broadcast %cst_72 : f32 to vector<4x5xf32>
    %321 = arith.mulf %320, %319 : vector<4x5xf32>
    %cst_73 = arith.constant 1.000000e+00 : f32
    %322 = vector.broadcast %cst_73 : f32 to vector<4x5xf32>
    %323 = arith.subf %321, %322 : vector<4x5xf32>
    %324 = vector.extract_strided_slice %316 {offsets = [0, 15], sizes = [4, 5], strides = [1, 1]} : vector<4x20xf32> to vector<4x5xf32>
    %325 = arith.mulf %318, %289 : vector<4x5xf32>
    %326 = arith.mulf %317, %323 : vector<4x5xf32>
    %327 = arith.addf %325, %326 : vector<4x5xf32>
    %328 = math.tanh %327 : vector<4x5xf32>
    %329 = arith.mulf %324, %328 : vector<4x5xf32>
    %330 = arith.mulf %329, %37 : vector<4x5xf32>
    %331 = vector.extract_strided_slice %330 {offsets = [0, 0], sizes = [4, 1], strides = [1, 1]} : vector<4x5xf32> to vector<4x1xf32>
    %332 = vector.extract_strided_slice %330 {offsets = [0, 1], sizes = [4, 1], strides = [1, 1]} : vector<4x5xf32> to vector<4x1xf32>
    %333 = arith.addf %331, %332 : vector<4x1xf32>
    %334 = vector.extract_strided_slice %330 {offsets = [0, 2], sizes = [4, 1], strides = [1, 1]} : vector<4x5xf32> to vector<4x1xf32>
    %335 = vector.extract_strided_slice %330 {offsets = [0, 3], sizes = [4, 1], strides = [1, 1]} : vector<4x5xf32> to vector<4x1xf32>
    %336 = arith.addf %334, %335 : vector<4x1xf32>
    %337 = vector.extract_strided_slice %330 {offsets = [0, 4], sizes = [4, 1], strides = [1, 1]} : vector<4x5xf32> to vector<4x1xf32>
    %338 = arith.addf %336, %337 : vector<4x1xf32>
    %339 = arith.addf %333, %338 : vector<4x1xf32>
    %340 = arith.index_cast %c7_i32 : i32 to index
    %c0_74 = arith.constant 0 : index
    %c0_75 = arith.constant 0 : index
    %341 = vector.load %arg8[%340, %c0_74, %c0_75] : memref<16x4x1xf32, #tpu.memory_space<vmem>>, vector<1x4x1xf32>
    %342 = vector.shape_cast %341 : vector<1x4x1xf32> to vector<4x1xf32>
    %343 = vector.shape_cast %339 : vector<4x1xf32> to vector<1x4x1xf32>
    tpu.vector_store %arg8[%340, %c0_74, %c0_75], %343 {strides = array<i32>} : memref<16x4x1xf32, #tpu.memory_space<vmem>>, vector<1x4x1xf32>,
    %c8_i32 = arith.constant 8 : i32
    %344 = arith.index_cast %c8_i32 : i32 to index
    %c0_76 = arith.constant 0 : index
    %c0_77 = arith.constant 0 : index
    %345 = vector.load %arg7[%344, %c0_76, %c0_77] : memref<16x4x20xf32, #tpu.memory_space<vmem>>, vector<1x4x20xf32>
    %346 = vector.shape_cast %345 : vector<1x4x20xf32> to vector<4x20xf32>
    %347 = vector.broadcast %339 : vector<4x1xf32> to vector<4x20xf32>
    %348 = arith.mulf %347, %30 : vector<4x20xf32>
    %349 = arith.addf %346, %348 : vector<4x20xf32>
    %350 = arith.negf %349 : vector<4x20xf32>
    %351 = math.exp %350 : vector<4x20xf32>
    %cst_78 = arith.constant 1.000000e+00 : f32
    %352 = vector.broadcast %cst_78 : f32 to vector<4x20xf32>
    %353 = arith.addf %352, %351 : vector<4x20xf32>
    %354 = arith.divf %352, %353 : vector<4x20xf32>
    %355 = vector.extract_strided_slice %354 {offsets = [0, 0], sizes = [4, 5], strides = [1, 1]} : vector<4x20xf32> to vector<4x5xf32>
    %356 = vector.extract_strided_slice %354 {offsets = [0, 5], sizes = [4, 5], strides = [1, 1]} : vector<4x20xf32> to vector<4x5xf32>
    %357 = vector.extract_strided_slice %354 {offsets = [0, 10], sizes = [4, 5], strides = [1, 1]} : vector<4x20xf32> to vector<4x5xf32>
    %cst_79 = arith.constant 2.000000e+00 : f32
    %358 = vector.broadcast %cst_79 : f32 to vector<4x5xf32>
    %359 = arith.mulf %358, %357 : vector<4x5xf32>
    %cst_80 = arith.constant 1.000000e+00 : f32
    %360 = vector.broadcast %cst_80 : f32 to vector<4x5xf32>
    %361 = arith.subf %359, %360 : vector<4x5xf32>
    %362 = vector.extract_strided_slice %354 {offsets = [0, 15], sizes = [4, 5], strides = [1, 1]} : vector<4x20xf32> to vector<4x5xf32>
    %363 = arith.mulf %356, %327 : vector<4x5xf32>
    %364 = arith.mulf %355, %361 : vector<4x5xf32>
    %365 = arith.addf %363, %364 : vector<4x5xf32>
    %366 = math.tanh %365 : vector<4x5xf32>
    %367 = arith.mulf %362, %366 : vector<4x5xf32>
    %368 = arith.mulf %367, %37 : vector<4x5xf32>
    %369 = vector.extract_strided_slice %368 {offsets = [0, 0], sizes = [4, 1], strides = [1, 1]} : vector<4x5xf32> to vector<4x1xf32>
    %370 = vector.extract_strided_slice %368 {offsets = [0, 1], sizes = [4, 1], strides = [1, 1]} : vector<4x5xf32> to vector<4x1xf32>
    %371 = arith.addf %369, %370 : vector<4x1xf32>
    %372 = vector.extract_strided_slice %368 {offsets = [0, 2], sizes = [4, 1], strides = [1, 1]} : vector<4x5xf32> to vector<4x1xf32>
    %373 = vector.extract_strided_slice %368 {offsets = [0, 3], sizes = [4, 1], strides = [1, 1]} : vector<4x5xf32> to vector<4x1xf32>
    %374 = arith.addf %372, %373 : vector<4x1xf32>
    %375 = vector.extract_strided_slice %368 {offsets = [0, 4], sizes = [4, 1], strides = [1, 1]} : vector<4x5xf32> to vector<4x1xf32>
    %376 = arith.addf %374, %375 : vector<4x1xf32>
    %377 = arith.addf %371, %376 : vector<4x1xf32>
    %378 = arith.index_cast %c8_i32 : i32 to index
    %c0_81 = arith.constant 0 : index
    %c0_82 = arith.constant 0 : index
    %379 = vector.load %arg8[%378, %c0_81, %c0_82] : memref<16x4x1xf32, #tpu.memory_space<vmem>>, vector<1x4x1xf32>
    %380 = vector.shape_cast %379 : vector<1x4x1xf32> to vector<4x1xf32>
    %381 = vector.shape_cast %377 : vector<4x1xf32> to vector<1x4x1xf32>
    tpu.vector_store %arg8[%378, %c0_81, %c0_82], %381 {strides = array<i32>} : memref<16x4x1xf32, #tpu.memory_space<vmem>>, vector<1x4x1xf32>,
    %c9_i32 = arith.constant 9 : i32
    %382 = arith.index_cast %c9_i32 : i32 to index
    %c0_83 = arith.constant 0 : index
    %c0_84 = arith.constant 0 : index
    %383 = vector.load %arg7[%382, %c0_83, %c0_84] : memref<16x4x20xf32, #tpu.memory_space<vmem>>, vector<1x4x20xf32>
    %384 = vector.shape_cast %383 : vector<1x4x20xf32> to vector<4x20xf32>
    %385 = vector.broadcast %377 : vector<4x1xf32> to vector<4x20xf32>
    %386 = arith.mulf %385, %30 : vector<4x20xf32>
    %387 = arith.addf %384, %386 : vector<4x20xf32>
    %388 = arith.negf %387 : vector<4x20xf32>
    %389 = math.exp %388 : vector<4x20xf32>
    %cst_85 = arith.constant 1.000000e+00 : f32
    %390 = vector.broadcast %cst_85 : f32 to vector<4x20xf32>
    %391 = arith.addf %390, %389 : vector<4x20xf32>
    %392 = arith.divf %390, %391 : vector<4x20xf32>
    %393 = vector.extract_strided_slice %392 {offsets = [0, 0], sizes = [4, 5], strides = [1, 1]} : vector<4x20xf32> to vector<4x5xf32>
    %394 = vector.extract_strided_slice %392 {offsets = [0, 5], sizes = [4, 5], strides = [1, 1]} : vector<4x20xf32> to vector<4x5xf32>
    %395 = vector.extract_strided_slice %392 {offsets = [0, 10], sizes = [4, 5], strides = [1, 1]} : vector<4x20xf32> to vector<4x5xf32>
    %cst_86 = arith.constant 2.000000e+00 : f32
    %396 = vector.broadcast %cst_86 : f32 to vector<4x5xf32>
    %397 = arith.mulf %396, %395 : vector<4x5xf32>
    %cst_87 = arith.constant 1.000000e+00 : f32
    %398 = vector.broadcast %cst_87 : f32 to vector<4x5xf32>
    %399 = arith.subf %397, %398 : vector<4x5xf32>
    %400 = vector.extract_strided_slice %392 {offsets = [0, 15], sizes = [4, 5], strides = [1, 1]} : vector<4x20xf32> to vector<4x5xf32>
    %401 = arith.mulf %394, %365 : vector<4x5xf32>
    %402 = arith.mulf %393, %399 : vector<4x5xf32>
    %403 = arith.addf %401, %402 : vector<4x5xf32>
    %404 = math.tanh %403 : vector<4x5xf32>
    %405 = arith.mulf %400, %404 : vector<4x5xf32>
    %406 = arith.mulf %405, %37 : vector<4x5xf32>
    %407 = vector.extract_strided_slice %406 {offsets = [0, 0], sizes = [4, 1], strides = [1, 1]} : vector<4x5xf32> to vector<4x1xf32>
    %408 = vector.extract_strided_slice %406 {offsets = [0, 1], sizes = [4, 1], strides = [1, 1]} : vector<4x5xf32> to vector<4x1xf32>
    %409 = arith.addf %407, %408 : vector<4x1xf32>
    %410 = vector.extract_strided_slice %406 {offsets = [0, 2], sizes = [4, 1], strides = [1, 1]} : vector<4x5xf32> to vector<4x1xf32>
    %411 = vector.extract_strided_slice %406 {offsets = [0, 3], sizes = [4, 1], strides = [1, 1]} : vector<4x5xf32> to vector<4x1xf32>
    %412 = arith.addf %410, %411 : vector<4x1xf32>
    %413 = vector.extract_strided_slice %406 {offsets = [0, 4], sizes = [4, 1], strides = [1, 1]} : vector<4x5xf32> to vector<4x1xf32>
    %414 = arith.addf %412, %413 : vector<4x1xf32>
    %415 = arith.addf %409, %414 : vector<4x1xf32>
    %416 = arith.index_cast %c9_i32 : i32 to index
    %c0_88 = arith.constant 0 : index
    %c0_89 = arith.constant 0 : index
    %417 = vector.load %arg8[%416, %c0_88, %c0_89] : memref<16x4x1xf32, #tpu.memory_space<vmem>>, vector<1x4x1xf32>
    %418 = vector.shape_cast %417 : vector<1x4x1xf32> to vector<4x1xf32>
    %419 = vector.shape_cast %415 : vector<4x1xf32> to vector<1x4x1xf32>
    tpu.vector_store %arg8[%416, %c0_88, %c0_89], %419 {strides = array<i32>} : memref<16x4x1xf32, #tpu.memory_space<vmem>>, vector<1x4x1xf32>,
    %c10_i32 = arith.constant 10 : i32
    %420 = arith.index_cast %c10_i32 : i32 to index
    %c0_90 = arith.constant 0 : index
    %c0_91 = arith.constant 0 : index
    %421 = vector.load %arg7[%420, %c0_90, %c0_91] : memref<16x4x20xf32, #tpu.memory_space<vmem>>, vector<1x4x20xf32>
    %422 = vector.shape_cast %421 : vector<1x4x20xf32> to vector<4x20xf32>
    %423 = vector.broadcast %415 : vector<4x1xf32> to vector<4x20xf32>
    %424 = arith.mulf %423, %30 : vector<4x20xf32>
    %425 = arith.addf %422, %424 : vector<4x20xf32>
    %426 = arith.negf %425 : vector<4x20xf32>
    %427 = math.exp %426 : vector<4x20xf32>
    %cst_92 = arith.constant 1.000000e+00 : f32
    %428 = vector.broadcast %cst_92 : f32 to vector<4x20xf32>
    %429 = arith.addf %428, %427 : vector<4x20xf32>
    %430 = arith.divf %428, %429 : vector<4x20xf32>
    %431 = vector.extract_strided_slice %430 {offsets = [0, 0], sizes = [4, 5], strides = [1, 1]} : vector<4x20xf32> to vector<4x5xf32>
    %432 = vector.extract_strided_slice %430 {offsets = [0, 5], sizes = [4, 5], strides = [1, 1]} : vector<4x20xf32> to vector<4x5xf32>
    %433 = vector.extract_strided_slice %430 {offsets = [0, 10], sizes = [4, 5], strides = [1, 1]} : vector<4x20xf32> to vector<4x5xf32>
    %cst_93 = arith.constant 2.000000e+00 : f32
    %434 = vector.broadcast %cst_93 : f32 to vector<4x5xf32>
    %435 = arith.mulf %434, %433 : vector<4x5xf32>
    %cst_94 = arith.constant 1.000000e+00 : f32
    %436 = vector.broadcast %cst_94 : f32 to vector<4x5xf32>
    %437 = arith.subf %435, %436 : vector<4x5xf32>
    %438 = vector.extract_strided_slice %430 {offsets = [0, 15], sizes = [4, 5], strides = [1, 1]} : vector<4x20xf32> to vector<4x5xf32>
    %439 = arith.mulf %432, %403 : vector<4x5xf32>
    %440 = arith.mulf %431, %437 : vector<4x5xf32>
    %441 = arith.addf %439, %440 : vector<4x5xf32>
    %442 = math.tanh %441 : vector<4x5xf32>
    %443 = arith.mulf %438, %442 : vector<4x5xf32>
    %444 = arith.mulf %443, %37 : vector<4x5xf32>
    %445 = vector.extract_strided_slice %444 {offsets = [0, 0], sizes = [4, 1], strides = [1, 1]} : vector<4x5xf32> to vector<4x1xf32>
    %446 = vector.extract_strided_slice %444 {offsets = [0, 1], sizes = [4, 1], strides = [1, 1]} : vector<4x5xf32> to vector<4x1xf32>
    %447 = arith.addf %445, %446 : vector<4x1xf32>
    %448 = vector.extract_strided_slice %444 {offsets = [0, 2], sizes = [4, 1], strides = [1, 1]} : vector<4x5xf32> to vector<4x1xf32>
    %449 = vector.extract_strided_slice %444 {offsets = [0, 3], sizes = [4, 1], strides = [1, 1]} : vector<4x5xf32> to vector<4x1xf32>
    %450 = arith.addf %448, %449 : vector<4x1xf32>
    %451 = vector.extract_strided_slice %444 {offsets = [0, 4], sizes = [4, 1], strides = [1, 1]} : vector<4x5xf32> to vector<4x1xf32>
    %452 = arith.addf %450, %451 : vector<4x1xf32>
    %453 = arith.addf %447, %452 : vector<4x1xf32>
    %454 = arith.index_cast %c10_i32 : i32 to index
    %c0_95 = arith.constant 0 : index
    %c0_96 = arith.constant 0 : index
    %455 = vector.load %arg8[%454, %c0_95, %c0_96] : memref<16x4x1xf32, #tpu.memory_space<vmem>>, vector<1x4x1xf32>
    %456 = vector.shape_cast %455 : vector<1x4x1xf32> to vector<4x1xf32>
    %457 = vector.shape_cast %453 : vector<4x1xf32> to vector<1x4x1xf32>
    tpu.vector_store %arg8[%454, %c0_95, %c0_96], %457 {strides = array<i32>} : memref<16x4x1xf32, #tpu.memory_space<vmem>>, vector<1x4x1xf32>,
    %c11_i32 = arith.constant 11 : i32
    %458 = arith.index_cast %c11_i32 : i32 to index
    %c0_97 = arith.constant 0 : index
    %c0_98 = arith.constant 0 : index
    %459 = vector.load %arg7[%458, %c0_97, %c0_98] : memref<16x4x20xf32, #tpu.memory_space<vmem>>, vector<1x4x20xf32>
    %460 = vector.shape_cast %459 : vector<1x4x20xf32> to vector<4x20xf32>
    %461 = vector.broadcast %453 : vector<4x1xf32> to vector<4x20xf32>
    %462 = arith.mulf %461, %30 : vector<4x20xf32>
    %463 = arith.addf %460, %462 : vector<4x20xf32>
    %464 = arith.negf %463 : vector<4x20xf32>
    %465 = math.exp %464 : vector<4x20xf32>
    %cst_99 = arith.constant 1.000000e+00 : f32
    %466 = vector.broadcast %cst_99 : f32 to vector<4x20xf32>
    %467 = arith.addf %466, %465 : vector<4x20xf32>
    %468 = arith.divf %466, %467 : vector<4x20xf32>
    %469 = vector.extract_strided_slice %468 {offsets = [0, 0], sizes = [4, 5], strides = [1, 1]} : vector<4x20xf32> to vector<4x5xf32>
    %470 = vector.extract_strided_slice %468 {offsets = [0, 5], sizes = [4, 5], strides = [1, 1]} : vector<4x20xf32> to vector<4x5xf32>
    %471 = vector.extract_strided_slice %468 {offsets = [0, 10], sizes = [4, 5], strides = [1, 1]} : vector<4x20xf32> to vector<4x5xf32>
    %cst_100 = arith.constant 2.000000e+00 : f32
    %472 = vector.broadcast %cst_100 : f32 to vector<4x5xf32>
    %473 = arith.mulf %472, %471 : vector<4x5xf32>
    %cst_101 = arith.constant 1.000000e+00 : f32
    %474 = vector.broadcast %cst_101 : f32 to vector<4x5xf32>
    %475 = arith.subf %473, %474 : vector<4x5xf32>
    %476 = vector.extract_strided_slice %468 {offsets = [0, 15], sizes = [4, 5], strides = [1, 1]} : vector<4x20xf32> to vector<4x5xf32>
    %477 = arith.mulf %470, %441 : vector<4x5xf32>
    %478 = arith.mulf %469, %475 : vector<4x5xf32>
    %479 = arith.addf %477, %478 : vector<4x5xf32>
    %480 = math.tanh %479 : vector<4x5xf32>
    %481 = arith.mulf %476, %480 : vector<4x5xf32>
    %482 = arith.mulf %481, %37 : vector<4x5xf32>
    %483 = vector.extract_strided_slice %482 {offsets = [0, 0], sizes = [4, 1], strides = [1, 1]} : vector<4x5xf32> to vector<4x1xf32>
    %484 = vector.extract_strided_slice %482 {offsets = [0, 1], sizes = [4, 1], strides = [1, 1]} : vector<4x5xf32> to vector<4x1xf32>
    %485 = arith.addf %483, %484 : vector<4x1xf32>
    %486 = vector.extract_strided_slice %482 {offsets = [0, 2], sizes = [4, 1], strides = [1, 1]} : vector<4x5xf32> to vector<4x1xf32>
    %487 = vector.extract_strided_slice %482 {offsets = [0, 3], sizes = [4, 1], strides = [1, 1]} : vector<4x5xf32> to vector<4x1xf32>
    %488 = arith.addf %486, %487 : vector<4x1xf32>
    %489 = vector.extract_strided_slice %482 {offsets = [0, 4], sizes = [4, 1], strides = [1, 1]} : vector<4x5xf32> to vector<4x1xf32>
    %490 = arith.addf %488, %489 : vector<4x1xf32>
    %491 = arith.addf %485, %490 : vector<4x1xf32>
    %492 = arith.index_cast %c11_i32 : i32 to index
    %c0_102 = arith.constant 0 : index
    %c0_103 = arith.constant 0 : index
    %493 = vector.load %arg8[%492, %c0_102, %c0_103] : memref<16x4x1xf32, #tpu.memory_space<vmem>>, vector<1x4x1xf32>
    %494 = vector.shape_cast %493 : vector<1x4x1xf32> to vector<4x1xf32>
    %495 = vector.shape_cast %491 : vector<4x1xf32> to vector<1x4x1xf32>
    tpu.vector_store %arg8[%492, %c0_102, %c0_103], %495 {strides = array<i32>} : memref<16x4x1xf32, #tpu.memory_space<vmem>>, vector<1x4x1xf32>,
    %c12_i32 = arith.constant 12 : i32
    %496 = arith.index_cast %c12_i32 : i32 to index
    %c0_104 = arith.constant 0 : index
    %c0_105 = arith.constant 0 : index
    %497 = vector.load %arg7[%496, %c0_104, %c0_105] : memref<16x4x20xf32, #tpu.memory_space<vmem>>, vector<1x4x20xf32>
    %498 = vector.shape_cast %497 : vector<1x4x20xf32> to vector<4x20xf32>
    %499 = vector.broadcast %491 : vector<4x1xf32> to vector<4x20xf32>
    %500 = arith.mulf %499, %30 : vector<4x20xf32>
    %501 = arith.addf %498, %500 : vector<4x20xf32>
    %502 = arith.negf %501 : vector<4x20xf32>
    %503 = math.exp %502 : vector<4x20xf32>
    %cst_106 = arith.constant 1.000000e+00 : f32
    %504 = vector.broadcast %cst_106 : f32 to vector<4x20xf32>
    %505 = arith.addf %504, %503 : vector<4x20xf32>
    %506 = arith.divf %504, %505 : vector<4x20xf32>
    %507 = vector.extract_strided_slice %506 {offsets = [0, 0], sizes = [4, 5], strides = [1, 1]} : vector<4x20xf32> to vector<4x5xf32>
    %508 = vector.extract_strided_slice %506 {offsets = [0, 5], sizes = [4, 5], strides = [1, 1]} : vector<4x20xf32> to vector<4x5xf32>
    %509 = vector.extract_strided_slice %506 {offsets = [0, 10], sizes = [4, 5], strides = [1, 1]} : vector<4x20xf32> to vector<4x5xf32>
    %cst_107 = arith.constant 2.000000e+00 : f32
    %510 = vector.broadcast %cst_107 : f32 to vector<4x5xf32>
    %511 = arith.mulf %510, %509 : vector<4x5xf32>
    %cst_108 = arith.constant 1.000000e+00 : f32
    %512 = vector.broadcast %cst_108 : f32 to vector<4x5xf32>
    %513 = arith.subf %511, %512 : vector<4x5xf32>
    %514 = vector.extract_strided_slice %506 {offsets = [0, 15], sizes = [4, 5], strides = [1, 1]} : vector<4x20xf32> to vector<4x5xf32>
    %515 = arith.mulf %508, %479 : vector<4x5xf32>
    %516 = arith.mulf %507, %513 : vector<4x5xf32>
    %517 = arith.addf %515, %516 : vector<4x5xf32>
    %518 = math.tanh %517 : vector<4x5xf32>
    %519 = arith.mulf %514, %518 : vector<4x5xf32>
    %520 = arith.mulf %519, %37 : vector<4x5xf32>
    %521 = vector.extract_strided_slice %520 {offsets = [0, 0], sizes = [4, 1], strides = [1, 1]} : vector<4x5xf32> to vector<4x1xf32>
    %522 = vector.extract_strided_slice %520 {offsets = [0, 1], sizes = [4, 1], strides = [1, 1]} : vector<4x5xf32> to vector<4x1xf32>
    %523 = arith.addf %521, %522 : vector<4x1xf32>
    %524 = vector.extract_strided_slice %520 {offsets = [0, 2], sizes = [4, 1], strides = [1, 1]} : vector<4x5xf32> to vector<4x1xf32>
    %525 = vector.extract_strided_slice %520 {offsets = [0, 3], sizes = [4, 1], strides = [1, 1]} : vector<4x5xf32> to vector<4x1xf32>
    %526 = arith.addf %524, %525 : vector<4x1xf32>
    %527 = vector.extract_strided_slice %520 {offsets = [0, 4], sizes = [4, 1], strides = [1, 1]} : vector<4x5xf32> to vector<4x1xf32>
    %528 = arith.addf %526, %527 : vector<4x1xf32>
    %529 = arith.addf %523, %528 : vector<4x1xf32>
    %530 = arith.index_cast %c12_i32 : i32 to index
    %c0_109 = arith.constant 0 : index
    %c0_110 = arith.constant 0 : index
    %531 = vector.load %arg8[%530, %c0_109, %c0_110] : memref<16x4x1xf32, #tpu.memory_space<vmem>>, vector<1x4x1xf32>
    %532 = vector.shape_cast %531 : vector<1x4x1xf32> to vector<4x1xf32>
    %533 = vector.shape_cast %529 : vector<4x1xf32> to vector<1x4x1xf32>
    tpu.vector_store %arg8[%530, %c0_109, %c0_110], %533 {strides = array<i32>} : memref<16x4x1xf32, #tpu.memory_space<vmem>>, vector<1x4x1xf32>,
    %c13_i32 = arith.constant 13 : i32
    %534 = arith.index_cast %c13_i32 : i32 to index
    %c0_111 = arith.constant 0 : index
    %c0_112 = arith.constant 0 : index
    %535 = vector.load %arg7[%534, %c0_111, %c0_112] : memref<16x4x20xf32, #tpu.memory_space<vmem>>, vector<1x4x20xf32>
    %536 = vector.shape_cast %535 : vector<1x4x20xf32> to vector<4x20xf32>
    %537 = vector.broadcast %529 : vector<4x1xf32> to vector<4x20xf32>
    %538 = arith.mulf %537, %30 : vector<4x20xf32>
    %539 = arith.addf %536, %538 : vector<4x20xf32>
    %540 = arith.negf %539 : vector<4x20xf32>
    %541 = math.exp %540 : vector<4x20xf32>
    %cst_113 = arith.constant 1.000000e+00 : f32
    %542 = vector.broadcast %cst_113 : f32 to vector<4x20xf32>
    %543 = arith.addf %542, %541 : vector<4x20xf32>
    %544 = arith.divf %542, %543 : vector<4x20xf32>
    %545 = vector.extract_strided_slice %544 {offsets = [0, 0], sizes = [4, 5], strides = [1, 1]} : vector<4x20xf32> to vector<4x5xf32>
    %546 = vector.extract_strided_slice %544 {offsets = [0, 5], sizes = [4, 5], strides = [1, 1]} : vector<4x20xf32> to vector<4x5xf32>
    %547 = vector.extract_strided_slice %544 {offsets = [0, 10], sizes = [4, 5], strides = [1, 1]} : vector<4x20xf32> to vector<4x5xf32>
    %cst_114 = arith.constant 2.000000e+00 : f32
    %548 = vector.broadcast %cst_114 : f32 to vector<4x5xf32>
    %549 = arith.mulf %548, %547 : vector<4x5xf32>
    %cst_115 = arith.constant 1.000000e+00 : f32
    %550 = vector.broadcast %cst_115 : f32 to vector<4x5xf32>
    %551 = arith.subf %549, %550 : vector<4x5xf32>
    %552 = vector.extract_strided_slice %544 {offsets = [0, 15], sizes = [4, 5], strides = [1, 1]} : vector<4x20xf32> to vector<4x5xf32>
    %553 = arith.mulf %546, %517 : vector<4x5xf32>
    %554 = arith.mulf %545, %551 : vector<4x5xf32>
    %555 = arith.addf %553, %554 : vector<4x5xf32>
    %556 = math.tanh %555 : vector<4x5xf32>
    %557 = arith.mulf %552, %556 : vector<4x5xf32>
    %558 = arith.mulf %557, %37 : vector<4x5xf32>
    %559 = vector.extract_strided_slice %558 {offsets = [0, 0], sizes = [4, 1], strides = [1, 1]} : vector<4x5xf32> to vector<4x1xf32>
    %560 = vector.extract_strided_slice %558 {offsets = [0, 1], sizes = [4, 1], strides = [1, 1]} : vector<4x5xf32> to vector<4x1xf32>
    %561 = arith.addf %559, %560 : vector<4x1xf32>
    %562 = vector.extract_strided_slice %558 {offsets = [0, 2], sizes = [4, 1], strides = [1, 1]} : vector<4x5xf32> to vector<4x1xf32>
    %563 = vector.extract_strided_slice %558 {offsets = [0, 3], sizes = [4, 1], strides = [1, 1]} : vector<4x5xf32> to vector<4x1xf32>
    %564 = arith.addf %562, %563 : vector<4x1xf32>
    %565 = vector.extract_strided_slice %558 {offsets = [0, 4], sizes = [4, 1], strides = [1, 1]} : vector<4x5xf32> to vector<4x1xf32>
    %566 = arith.addf %564, %565 : vector<4x1xf32>
    %567 = arith.addf %561, %566 : vector<4x1xf32>
    %568 = arith.index_cast %c13_i32 : i32 to index
    %c0_116 = arith.constant 0 : index
    %c0_117 = arith.constant 0 : index
    %569 = vector.load %arg8[%568, %c0_116, %c0_117] : memref<16x4x1xf32, #tpu.memory_space<vmem>>, vector<1x4x1xf32>
    %570 = vector.shape_cast %569 : vector<1x4x1xf32> to vector<4x1xf32>
    %571 = vector.shape_cast %567 : vector<4x1xf32> to vector<1x4x1xf32>
    tpu.vector_store %arg8[%568, %c0_116, %c0_117], %571 {strides = array<i32>} : memref<16x4x1xf32, #tpu.memory_space<vmem>>, vector<1x4x1xf32>,
    %c14_i32 = arith.constant 14 : i32
    %572 = arith.index_cast %c14_i32 : i32 to index
    %c0_118 = arith.constant 0 : index
    %c0_119 = arith.constant 0 : index
    %573 = vector.load %arg7[%572, %c0_118, %c0_119] : memref<16x4x20xf32, #tpu.memory_space<vmem>>, vector<1x4x20xf32>
    %574 = vector.shape_cast %573 : vector<1x4x20xf32> to vector<4x20xf32>
    %575 = vector.broadcast %567 : vector<4x1xf32> to vector<4x20xf32>
    %576 = arith.mulf %575, %30 : vector<4x20xf32>
    %577 = arith.addf %574, %576 : vector<4x20xf32>
    %578 = arith.negf %577 : vector<4x20xf32>
    %579 = math.exp %578 : vector<4x20xf32>
    %cst_120 = arith.constant 1.000000e+00 : f32
    %580 = vector.broadcast %cst_120 : f32 to vector<4x20xf32>
    %581 = arith.addf %580, %579 : vector<4x20xf32>
    %582 = arith.divf %580, %581 : vector<4x20xf32>
    %583 = vector.extract_strided_slice %582 {offsets = [0, 0], sizes = [4, 5], strides = [1, 1]} : vector<4x20xf32> to vector<4x5xf32>
    %584 = vector.extract_strided_slice %582 {offsets = [0, 5], sizes = [4, 5], strides = [1, 1]} : vector<4x20xf32> to vector<4x5xf32>
    %585 = vector.extract_strided_slice %582 {offsets = [0, 10], sizes = [4, 5], strides = [1, 1]} : vector<4x20xf32> to vector<4x5xf32>
    %cst_121 = arith.constant 2.000000e+00 : f32
    %586 = vector.broadcast %cst_121 : f32 to vector<4x5xf32>
    %587 = arith.mulf %586, %585 : vector<4x5xf32>
    %cst_122 = arith.constant 1.000000e+00 : f32
    %588 = vector.broadcast %cst_122 : f32 to vector<4x5xf32>
    %589 = arith.subf %587, %588 : vector<4x5xf32>
    %590 = vector.extract_strided_slice %582 {offsets = [0, 15], sizes = [4, 5], strides = [1, 1]} : vector<4x20xf32> to vector<4x5xf32>
    %591 = arith.mulf %584, %555 : vector<4x5xf32>
    %592 = arith.mulf %583, %589 : vector<4x5xf32>
    %593 = arith.addf %591, %592 : vector<4x5xf32>
    %594 = math.tanh %593 : vector<4x5xf32>
    %595 = arith.mulf %590, %594 : vector<4x5xf32>
    %596 = arith.mulf %595, %37 : vector<4x5xf32>
    %597 = vector.extract_strided_slice %596 {offsets = [0, 0], sizes = [4, 1], strides = [1, 1]} : vector<4x5xf32> to vector<4x1xf32>
    %598 = vector.extract_strided_slice %596 {offsets = [0, 1], sizes = [4, 1], strides = [1, 1]} : vector<4x5xf32> to vector<4x1xf32>
    %599 = arith.addf %597, %598 : vector<4x1xf32>
    %600 = vector.extract_strided_slice %596 {offsets = [0, 2], sizes = [4, 1], strides = [1, 1]} : vector<4x5xf32> to vector<4x1xf32>
    %601 = vector.extract_strided_slice %596 {offsets = [0, 3], sizes = [4, 1], strides = [1, 1]} : vector<4x5xf32> to vector<4x1xf32>
    %602 = arith.addf %600, %601 : vector<4x1xf32>
    %603 = vector.extract_strided_slice %596 {offsets = [0, 4], sizes = [4, 1], strides = [1, 1]} : vector<4x5xf32> to vector<4x1xf32>
    %604 = arith.addf %602, %603 : vector<4x1xf32>
    %605 = arith.addf %599, %604 : vector<4x1xf32>
    %606 = arith.index_cast %c14_i32 : i32 to index
    %c0_123 = arith.constant 0 : index
    %c0_124 = arith.constant 0 : index
    %607 = vector.load %arg8[%606, %c0_123, %c0_124] : memref<16x4x1xf32, #tpu.memory_space<vmem>>, vector<1x4x1xf32>
    %608 = vector.shape_cast %607 : vector<1x4x1xf32> to vector<4x1xf32>
    %609 = vector.shape_cast %605 : vector<4x1xf32> to vector<1x4x1xf32>
    tpu.vector_store %arg8[%606, %c0_123, %c0_124], %609 {strides = array<i32>} : memref<16x4x1xf32, #tpu.memory_space<vmem>>, vector<1x4x1xf32>,
    %c15_i32 = arith.constant 15 : i32
    %610 = arith.index_cast %c15_i32 : i32 to index
    %c0_125 = arith.constant 0 : index
    %c0_126 = arith.constant 0 : index
    %611 = vector.load %arg7[%610, %c0_125, %c0_126] : memref<16x4x20xf32, #tpu.memory_space<vmem>>, vector<1x4x20xf32>
    %612 = vector.shape_cast %611 : vector<1x4x20xf32> to vector<4x20xf32>
    %613 = vector.broadcast %605 : vector<4x1xf32> to vector<4x20xf32>
    %614 = arith.mulf %613, %30 : vector<4x20xf32>
    %615 = arith.addf %612, %614 : vector<4x20xf32>
    %616 = arith.negf %615 : vector<4x20xf32>
    %617 = math.exp %616 : vector<4x20xf32>
    %cst_127 = arith.constant 1.000000e+00 : f32
    %618 = vector.broadcast %cst_127 : f32 to vector<4x20xf32>
    %619 = arith.addf %618, %617 : vector<4x20xf32>
    %620 = arith.divf %618, %619 : vector<4x20xf32>
    %621 = vector.extract_strided_slice %620 {offsets = [0, 0], sizes = [4, 5], strides = [1, 1]} : vector<4x20xf32> to vector<4x5xf32>
    %622 = vector.extract_strided_slice %620 {offsets = [0, 5], sizes = [4, 5], strides = [1, 1]} : vector<4x20xf32> to vector<4x5xf32>
    %623 = vector.extract_strided_slice %620 {offsets = [0, 10], sizes = [4, 5], strides = [1, 1]} : vector<4x20xf32> to vector<4x5xf32>
    %cst_128 = arith.constant 2.000000e+00 : f32
    %624 = vector.broadcast %cst_128 : f32 to vector<4x5xf32>
    %625 = arith.mulf %624, %623 : vector<4x5xf32>
    %cst_129 = arith.constant 1.000000e+00 : f32
    %626 = vector.broadcast %cst_129 : f32 to vector<4x5xf32>
    %627 = arith.subf %625, %626 : vector<4x5xf32>
    %628 = vector.extract_strided_slice %620 {offsets = [0, 15], sizes = [4, 5], strides = [1, 1]} : vector<4x20xf32> to vector<4x5xf32>
    %629 = arith.mulf %622, %593 : vector<4x5xf32>
    %630 = arith.mulf %621, %627 : vector<4x5xf32>
    %631 = arith.addf %629, %630 : vector<4x5xf32>
    %632 = math.tanh %631 : vector<4x5xf32>
    %633 = arith.mulf %628, %632 : vector<4x5xf32>
    %634 = arith.mulf %633, %37 : vector<4x5xf32>
    %635 = vector.extract_strided_slice %634 {offsets = [0, 0], sizes = [4, 1], strides = [1, 1]} : vector<4x5xf32> to vector<4x1xf32>
    %636 = vector.extract_strided_slice %634 {offsets = [0, 1], sizes = [4, 1], strides = [1, 1]} : vector<4x5xf32> to vector<4x1xf32>
    %637 = arith.addf %635, %636 : vector<4x1xf32>
    %638 = vector.extract_strided_slice %634 {offsets = [0, 2], sizes = [4, 1], strides = [1, 1]} : vector<4x5xf32> to vector<4x1xf32>
    %639 = vector.extract_strided_slice %634 {offsets = [0, 3], sizes = [4, 1], strides = [1, 1]} : vector<4x5xf32> to vector<4x1xf32>
    %640 = arith.addf %638, %639 : vector<4x1xf32>
    %641 = vector.extract_strided_slice %634 {offsets = [0, 4], sizes = [4, 1], strides = [1, 1]} : vector<4x5xf32> to vector<4x1xf32>
    %642 = arith.addf %640, %641 : vector<4x1xf32>
    %643 = arith.addf %637, %642 : vector<4x1xf32>
    %644 = arith.index_cast %c15_i32 : i32 to index
    %c0_130 = arith.constant 0 : index
    %c0_131 = arith.constant 0 : index
    %645 = vector.load %arg8[%644, %c0_130, %c0_131] : memref<16x4x1xf32, #tpu.memory_space<vmem>>, vector<1x4x1xf32>
    %646 = vector.shape_cast %645 : vector<1x4x1xf32> to vector<4x1xf32>
    %647 = vector.shape_cast %643 : vector<4x1xf32> to vector<1x4x1xf32>
    tpu.vector_store %arg8[%644, %c0_130, %c0_131], %647 {strides = array<i32>} : memref<16x4x1xf32, #tpu.memory_space<vmem>>, vector<1x4x1xf32>,
    %c16_i32 = arith.constant 16 : i32
    %c0_132 = arith.constant 0 : index
    %c0_133 = arith.constant 0 : index
    %c0_134 = arith.constant 0 : index
    %648 = vector.load %arg8[%c0_132, %c0_133, %c0_134] : memref<16x4x1xf32, #tpu.memory_space<vmem>>, vector<16x4x1xf32>
    %649 = vector.extract_strided_slice %648 {offsets = [15, 0, 0], sizes = [1, 4, 1], strides = [1, 1, 1]} : vector<16x4x1xf32> to vector<1x4x1xf32>
    %650 = vector.extract_strided_slice %648 {offsets = [14, 0, 0], sizes = [1, 4, 1], strides = [1, 1, 1]} : vector<16x4x1xf32> to vector<1x4x1xf32>
    %651 = vector.extract_strided_slice %648 {offsets = [13, 0, 0], sizes = [1, 4, 1], strides = [1, 1, 1]} : vector<16x4x1xf32> to vector<1x4x1xf32>
    %652 = vector.extract_strided_slice %648 {offsets = [12, 0, 0], sizes = [1, 4, 1], strides = [1, 1, 1]} : vector<16x4x1xf32> to vector<1x4x1xf32>
    %653 = vector.extract_strided_slice %648 {offsets = [11, 0, 0], sizes = [1, 4, 1], strides = [1, 1, 1]} : vector<16x4x1xf32> to vector<1x4x1xf32>
    %654 = vector.extract_strided_slice %648 {offsets = [10, 0, 0], sizes = [1, 4, 1], strides = [1, 1, 1]} : vector<16x4x1xf32> to vector<1x4x1xf32>
    %655 = vector.extract_strided_slice %648 {offsets = [9, 0, 0], sizes = [1, 4, 1], strides = [1, 1, 1]} : vector<16x4x1xf32> to vector<1x4x1xf32>
    %656 = vector.extract_strided_slice %648 {offsets = [8, 0, 0], sizes = [1, 4, 1], strides = [1, 1, 1]} : vector<16x4x1xf32> to vector<1x4x1xf32>
    %657 = vector.extract_strided_slice %648 {offsets = [7, 0, 0], sizes = [1, 4, 1], strides = [1, 1, 1]} : vector<16x4x1xf32> to vector<1x4x1xf32>
    %658 = vector.extract_strided_slice %648 {offsets = [6, 0, 0], sizes = [1, 4, 1], strides = [1, 1, 1]} : vector<16x4x1xf32> to vector<1x4x1xf32>
    %659 = vector.extract_strided_slice %648 {offsets = [5, 0, 0], sizes = [1, 4, 1], strides = [1, 1, 1]} : vector<16x4x1xf32> to vector<1x4x1xf32>
    %660 = vector.extract_strided_slice %648 {offsets = [4, 0, 0], sizes = [1, 4, 1], strides = [1, 1, 1]} : vector<16x4x1xf32> to vector<1x4x1xf32>
    %661 = vector.extract_strided_slice %648 {offsets = [3, 0, 0], sizes = [1, 4, 1], strides = [1, 1, 1]} : vector<16x4x1xf32> to vector<1x4x1xf32>
    %662 = vector.extract_strided_slice %648 {offsets = [2, 0, 0], sizes = [1, 4, 1], strides = [1, 1, 1]} : vector<16x4x1xf32> to vector<1x4x1xf32>
    %663 = vector.extract_strided_slice %648 {offsets = [1, 0, 0], sizes = [1, 4, 1], strides = [1, 1, 1]} : vector<16x4x1xf32> to vector<1x4x1xf32>
    %664 = vector.extract_strided_slice %648 {offsets = [0, 0, 0], sizes = [1, 4, 1], strides = [1, 1, 1]} : vector<16x4x1xf32> to vector<1x4x1xf32>
    %665 = tpu.concatenate %649, %650, %651, %652, %653, %654, %655, %656, %657, %658, %659, %660, %661, %662, %663, %664 in 0 : vector<1x4x1xf32>, vector<1x4x1xf32>, vector<1x4x1xf32>, vector<1x4x1xf32>, vector<1x4x1xf32>, vector<1x4x1xf32>, vector<1x4x1xf32>, vector<1x4x1xf32>, vector<1x4x1xf32>, vector<1x4x1xf32>, vector<1x4x1xf32>, vector<1x4x1xf32>, vector<1x4x1xf32>, vector<1x4x1xf32>, vector<1x4x1xf32>, vector<1x4x1xf32> -> vector<16x4x1xf32>
    %666 = vector.extract_strided_slice %648 {offsets = [0, 0, 0], sizes = [16, 2, 1], strides = [1, 1, 1]} : vector<16x4x1xf32> to vector<16x2x1xf32>
    %667 = vector.extract_strided_slice %665 {offsets = [0, 2, 0], sizes = [16, 2, 1], strides = [1, 1, 1]} : vector<16x4x1xf32> to vector<16x2x1xf32>
    %668 = vector.extract_strided_slice %665 {offsets = [0, 0, 0], sizes = [16, 2, 1], strides = [1, 1, 1]} : vector<16x4x1xf32> to vector<16x2x1xf32>
    %669 = vector.extract_strided_slice %648 {offsets = [0, 2, 0], sizes = [16, 2, 1], strides = [1, 1, 1]} : vector<16x4x1xf32> to vector<16x2x1xf32>
    %c2 = arith.constant 2 : index
    %c0_135 = arith.constant 0 : index
    %670 = vector.load %arg3[%c2, %c0_135] : memref<4x20xf32, #tpu.memory_space<vmem>>, vector<1x20xf32>
    %671 = vector.shape_cast %670 : vector<1x20xf32> to vector<1x1x20xf32>
    %c0_136 = arith.constant 0 : index
    %c0_137 = arith.constant 0 : index
    %672 = vector.load %arg2[%c0_136, %c0_137] : memref<4x20xf32, #tpu.memory_space<vmem>>, vector<1x20xf32>
    %673 = vector.shape_cast %672 : vector<1x20xf32> to vector<1x1x20xf32>
    %674 = vector.broadcast %666 : vector<16x2x1xf32> to vector<16x2x20xf32>
    %675 = vector.broadcast %673 : vector<1x1x20xf32> to vector<16x2x20xf32>
    %676 = arith.mulf %674, %675 : vector<16x2x20xf32>
    %677 = vector.broadcast %671 : vector<1x1x20xf32> to vector<16x2x20xf32>
    %678 = arith.addf %677, %676 : vector<16x2x20xf32>
    %c1_138 = arith.constant 1 : index
    %c0_139 = arith.constant 0 : index
    %679 = vector.load %arg2[%c1_138, %c0_139] : memref<4x20xf32, #tpu.memory_space<vmem>>, vector<1x20xf32>
    %680 = vector.shape_cast %679 : vector<1x20xf32> to vector<1x1x20xf32>
    %681 = vector.broadcast %667 : vector<16x2x1xf32> to vector<16x2x20xf32>
    %682 = vector.broadcast %680 : vector<1x1x20xf32> to vector<16x2x20xf32>
    %683 = arith.mulf %681, %682 : vector<16x2x20xf32>
    %684 = arith.addf %678, %683 : vector<16x2x20xf32>
    %c3 = arith.constant 3 : index
    %c0_140 = arith.constant 0 : index
    %685 = vector.load %arg3[%c3, %c0_140] : memref<4x20xf32, #tpu.memory_space<vmem>>, vector<1x20xf32>
    %686 = vector.shape_cast %685 : vector<1x20xf32> to vector<1x1x20xf32>
    %c2_141 = arith.constant 2 : index
    %c0_142 = arith.constant 0 : index
    %687 = vector.load %arg2[%c2_141, %c0_142] : memref<4x20xf32, #tpu.memory_space<vmem>>, vector<1x20xf32>
    %688 = vector.shape_cast %687 : vector<1x20xf32> to vector<1x1x20xf32>
    %689 = vector.broadcast %668 : vector<16x2x1xf32> to vector<16x2x20xf32>
    %690 = vector.broadcast %688 : vector<1x1x20xf32> to vector<16x2x20xf32>
    %691 = arith.mulf %689, %690 : vector<16x2x20xf32>
    %692 = vector.broadcast %686 : vector<1x1x20xf32> to vector<16x2x20xf32>
    %693 = arith.addf %692, %691 : vector<16x2x20xf32>
    %c3_143 = arith.constant 3 : index
    %c0_144 = arith.constant 0 : index
    %694 = vector.load %arg2[%c3_143, %c0_144] : memref<4x20xf32, #tpu.memory_space<vmem>>, vector<1x20xf32>
    %695 = vector.shape_cast %694 : vector<1x20xf32> to vector<1x1x20xf32>
    %696 = vector.broadcast %669 : vector<16x2x1xf32> to vector<16x2x20xf32>
    %697 = vector.broadcast %695 : vector<1x1x20xf32> to vector<16x2x20xf32>
    %698 = arith.mulf %696, %697 : vector<16x2x20xf32>
    %699 = arith.addf %693, %698 : vector<16x2x20xf32>
    %700 = tpu.concatenate %684, %699 in 1 : vector<16x2x20xf32>, vector<16x2x20xf32> -> vector<16x4x20xf32>
    %c0_145 = arith.constant 0 : index
    %c0_146 = arith.constant 0 : index
    %c0_147 = arith.constant 0 : index
    %701 = vector.load %arg7[%c0_145, %c0_146, %c0_147] : memref<16x4x20xf32, #tpu.memory_space<vmem>>, vector<16x4x20xf32>
    tpu.vector_store %arg7[%c0_145, %c0_146, %c0_147], %700 {strides = array<i32>} : memref<16x4x20xf32, #tpu.memory_space<vmem>>, vector<16x4x20xf32>,
    %c2_148 = arith.constant 2 : index
    %c0_149 = arith.constant 0 : index
    %702 = vector.load %arg4[%c2_148, %c0_149] : memref<4x20xf32, #tpu.memory_space<vmem>>, vector<1x20xf32>
    %703 = vector.shape_cast %702 : vector<1x20xf32> to vector<1x20xf32>
    %704 = vector.broadcast %703 : vector<1x20xf32> to vector<2x20xf32>
    %c3_150 = arith.constant 3 : index
    %c0_151 = arith.constant 0 : index
    %705 = vector.load %arg4[%c3_150, %c0_151] : memref<4x20xf32, #tpu.memory_space<vmem>>, vector<1x20xf32>
    %706 = vector.shape_cast %705 : vector<1x20xf32> to vector<1x20xf32>
    %707 = vector.broadcast %706 : vector<1x20xf32> to vector<2x20xf32>
    %708 = tpu.concatenate %704, %707 in 0 : vector<2x20xf32>, vector<2x20xf32> -> vector<4x20xf32>
    %c2_152 = arith.constant 2 : index
    %c0_153 = arith.constant 0 : index
    %709 = vector.load %arg5[%c2_152, %c0_153] : memref<4x5xf32, #tpu.memory_space<vmem>>, vector<1x5xf32>
    %710 = vector.shape_cast %709 : vector<1x5xf32> to vector<1x5xf32>
    %711 = vector.broadcast %710 : vector<1x5xf32> to vector<2x5xf32>
    %c3_154 = arith.constant 3 : index
    %c0_155 = arith.constant 0 : index
    %712 = vector.load %arg5[%c3_154, %c0_155] : memref<4x5xf32, #tpu.memory_space<vmem>>, vector<1x5xf32>
    %713 = vector.shape_cast %712 : vector<1x5xf32> to vector<1x5xf32>
    %714 = vector.broadcast %713 : vector<1x5xf32> to vector<2x5xf32>
    %715 = tpu.concatenate %711, %714 in 0 : vector<2x5xf32>, vector<2x5xf32> -> vector<4x5xf32>
    %cst_156 = arith.constant 0.000000e+00 : f32
    %716 = vector.broadcast %cst_156 : f32 to vector<4x1xf32>
    %cst_157 = arith.constant 0.000000e+00 : f32
    %717 = vector.broadcast %cst_157 : f32 to vector<4x5xf32>
    %c0_i32_158 = arith.constant 0 : i32
    %718 = arith.index_cast %c0_i32_158 : i32 to index
    %c0_159 = arith.constant 0 : index
    %c0_160 = arith.constant 0 : index
    %719 = vector.load %arg7[%718, %c0_159, %c0_160] : memref<16x4x20xf32, #tpu.memory_space<vmem>>, vector<1x4x20xf32>
    %720 = vector.shape_cast %719 : vector<1x4x20xf32> to vector<4x20xf32>
    %721 = vector.broadcast %716 : vector<4x1xf32> to vector<4x20xf32>
    %722 = arith.mulf %721, %708 : vector<4x20xf32>
    %723 = arith.addf %720, %722 : vector<4x20xf32>
    %724 = arith.negf %723 : vector<4x20xf32>
    %725 = math.exp %724 : vector<4x20xf32>
    %cst_161 = arith.constant 1.000000e+00 : f32
    %726 = vector.broadcast %cst_161 : f32 to vector<4x20xf32>
    %727 = arith.addf %726, %725 : vector<4x20xf32>
    %728 = arith.divf %726, %727 : vector<4x20xf32>
    %729 = vector.extract_strided_slice %728 {offsets = [0, 0], sizes = [4, 5], strides = [1, 1]} : vector<4x20xf32> to vector<4x5xf32>
    %730 = vector.extract_strided_slice %728 {offsets = [0, 5], sizes = [4, 5], strides = [1, 1]} : vector<4x20xf32> to vector<4x5xf32>
    %731 = vector.extract_strided_slice %728 {offsets = [0, 10], sizes = [4, 5], strides = [1, 1]} : vector<4x20xf32> to vector<4x5xf32>
    %cst_162 = arith.constant 2.000000e+00 : f32
    %732 = vector.broadcast %cst_162 : f32 to vector<4x5xf32>
    %733 = arith.mulf %732, %731 : vector<4x5xf32>
    %cst_163 = arith.constant 1.000000e+00 : f32
    %734 = vector.broadcast %cst_163 : f32 to vector<4x5xf32>
    %735 = arith.subf %733, %734 : vector<4x5xf32>
    %736 = vector.extract_strided_slice %728 {offsets = [0, 15], sizes = [4, 5], strides = [1, 1]} : vector<4x20xf32> to vector<4x5xf32>
    %737 = arith.mulf %730, %717 : vector<4x5xf32>
    %738 = arith.mulf %729, %735 : vector<4x5xf32>
    %739 = arith.addf %737, %738 : vector<4x5xf32>
    %740 = math.tanh %739 : vector<4x5xf32>
    %741 = arith.mulf %736, %740 : vector<4x5xf32>
    %742 = arith.mulf %741, %715 : vector<4x5xf32>
    %743 = vector.extract_strided_slice %742 {offsets = [0, 0], sizes = [4, 1], strides = [1, 1]} : vector<4x5xf32> to vector<4x1xf32>
    %744 = vector.extract_strided_slice %742 {offsets = [0, 1], sizes = [4, 1], strides = [1, 1]} : vector<4x5xf32> to vector<4x1xf32>
    %745 = arith.addf %743, %744 : vector<4x1xf32>
    %746 = vector.extract_strided_slice %742 {offsets = [0, 2], sizes = [4, 1], strides = [1, 1]} : vector<4x5xf32> to vector<4x1xf32>
    %747 = vector.extract_strided_slice %742 {offsets = [0, 3], sizes = [4, 1], strides = [1, 1]} : vector<4x5xf32> to vector<4x1xf32>
    %748 = arith.addf %746, %747 : vector<4x1xf32>
    %749 = vector.extract_strided_slice %742 {offsets = [0, 4], sizes = [4, 1], strides = [1, 1]} : vector<4x5xf32> to vector<4x1xf32>
    %750 = arith.addf %748, %749 : vector<4x1xf32>
    %751 = arith.addf %745, %750 : vector<4x1xf32>
    %752 = arith.index_cast %c0_i32_158 : i32 to index
    %c0_164 = arith.constant 0 : index
    %c0_165 = arith.constant 0 : index
    %753 = vector.load %arg8[%752, %c0_164, %c0_165] : memref<16x4x1xf32, #tpu.memory_space<vmem>>, vector<1x4x1xf32>
    %754 = vector.shape_cast %753 : vector<1x4x1xf32> to vector<4x1xf32>
    %755 = vector.shape_cast %751 : vector<4x1xf32> to vector<1x4x1xf32>
    tpu.vector_store %arg8[%752, %c0_164, %c0_165], %755 {strides = array<i32>} : memref<16x4x1xf32, #tpu.memory_space<vmem>>, vector<1x4x1xf32>,
    %c1_i32_166 = arith.constant 1 : i32
    %756 = arith.index_cast %c1_i32_166 : i32 to index
    %c0_167 = arith.constant 0 : index
    %c0_168 = arith.constant 0 : index
    %757 = vector.load %arg7[%756, %c0_167, %c0_168] : memref<16x4x20xf32, #tpu.memory_space<vmem>>, vector<1x4x20xf32>
    %758 = vector.shape_cast %757 : vector<1x4x20xf32> to vector<4x20xf32>
    %759 = vector.broadcast %751 : vector<4x1xf32> to vector<4x20xf32>
    %760 = arith.mulf %759, %708 : vector<4x20xf32>
    %761 = arith.addf %758, %760 : vector<4x20xf32>
    %762 = arith.negf %761 : vector<4x20xf32>
    %763 = math.exp %762 : vector<4x20xf32>
    %cst_169 = arith.constant 1.000000e+00 : f32
    %764 = vector.broadcast %cst_169 : f32 to vector<4x20xf32>
    %765 = arith.addf %764, %763 : vector<4x20xf32>
    %766 = arith.divf %764, %765 : vector<4x20xf32>
    %767 = vector.extract_strided_slice %766 {offsets = [0, 0], sizes = [4, 5], strides = [1, 1]} : vector<4x20xf32> to vector<4x5xf32>
    %768 = vector.extract_strided_slice %766 {offsets = [0, 5], sizes = [4, 5], strides = [1, 1]} : vector<4x20xf32> to vector<4x5xf32>
    %769 = vector.extract_strided_slice %766 {offsets = [0, 10], sizes = [4, 5], strides = [1, 1]} : vector<4x20xf32> to vector<4x5xf32>
    %cst_170 = arith.constant 2.000000e+00 : f32
    %770 = vector.broadcast %cst_170 : f32 to vector<4x5xf32>
    %771 = arith.mulf %770, %769 : vector<4x5xf32>
    %cst_171 = arith.constant 1.000000e+00 : f32
    %772 = vector.broadcast %cst_171 : f32 to vector<4x5xf32>
    %773 = arith.subf %771, %772 : vector<4x5xf32>
    %774 = vector.extract_strided_slice %766 {offsets = [0, 15], sizes = [4, 5], strides = [1, 1]} : vector<4x20xf32> to vector<4x5xf32>
    %775 = arith.mulf %768, %739 : vector<4x5xf32>
    %776 = arith.mulf %767, %773 : vector<4x5xf32>
    %777 = arith.addf %775, %776 : vector<4x5xf32>
    %778 = math.tanh %777 : vector<4x5xf32>
    %779 = arith.mulf %774, %778 : vector<4x5xf32>
    %780 = arith.mulf %779, %715 : vector<4x5xf32>
    %781 = vector.extract_strided_slice %780 {offsets = [0, 0], sizes = [4, 1], strides = [1, 1]} : vector<4x5xf32> to vector<4x1xf32>
    %782 = vector.extract_strided_slice %780 {offsets = [0, 1], sizes = [4, 1], strides = [1, 1]} : vector<4x5xf32> to vector<4x1xf32>
    %783 = arith.addf %781, %782 : vector<4x1xf32>
    %784 = vector.extract_strided_slice %780 {offsets = [0, 2], sizes = [4, 1], strides = [1, 1]} : vector<4x5xf32> to vector<4x1xf32>
    %785 = vector.extract_strided_slice %780 {offsets = [0, 3], sizes = [4, 1], strides = [1, 1]} : vector<4x5xf32> to vector<4x1xf32>
    %786 = arith.addf %784, %785 : vector<4x1xf32>
    %787 = vector.extract_strided_slice %780 {offsets = [0, 4], sizes = [4, 1], strides = [1, 1]} : vector<4x5xf32> to vector<4x1xf32>
    %788 = arith.addf %786, %787 : vector<4x1xf32>
    %789 = arith.addf %783, %788 : vector<4x1xf32>
    %790 = arith.index_cast %c1_i32_166 : i32 to index
    %c0_172 = arith.constant 0 : index
    %c0_173 = arith.constant 0 : index
    %791 = vector.load %arg8[%790, %c0_172, %c0_173] : memref<16x4x1xf32, #tpu.memory_space<vmem>>, vector<1x4x1xf32>
    %792 = vector.shape_cast %791 : vector<1x4x1xf32> to vector<4x1xf32>
    %793 = vector.shape_cast %789 : vector<4x1xf32> to vector<1x4x1xf32>
    tpu.vector_store %arg8[%790, %c0_172, %c0_173], %793 {strides = array<i32>} : memref<16x4x1xf32, #tpu.memory_space<vmem>>, vector<1x4x1xf32>,
    %c2_i32_174 = arith.constant 2 : i32
    %794 = arith.index_cast %c2_i32_174 : i32 to index
    %c0_175 = arith.constant 0 : index
    %c0_176 = arith.constant 0 : index
    %795 = vector.load %arg7[%794, %c0_175, %c0_176] : memref<16x4x20xf32, #tpu.memory_space<vmem>>, vector<1x4x20xf32>
    %796 = vector.shape_cast %795 : vector<1x4x20xf32> to vector<4x20xf32>
    %797 = vector.broadcast %789 : vector<4x1xf32> to vector<4x20xf32>
    %798 = arith.mulf %797, %708 : vector<4x20xf32>
    %799 = arith.addf %796, %798 : vector<4x20xf32>
    %800 = arith.negf %799 : vector<4x20xf32>
    %801 = math.exp %800 : vector<4x20xf32>
    %cst_177 = arith.constant 1.000000e+00 : f32
    %802 = vector.broadcast %cst_177 : f32 to vector<4x20xf32>
    %803 = arith.addf %802, %801 : vector<4x20xf32>
    %804 = arith.divf %802, %803 : vector<4x20xf32>
    %805 = vector.extract_strided_slice %804 {offsets = [0, 0], sizes = [4, 5], strides = [1, 1]} : vector<4x20xf32> to vector<4x5xf32>
    %806 = vector.extract_strided_slice %804 {offsets = [0, 5], sizes = [4, 5], strides = [1, 1]} : vector<4x20xf32> to vector<4x5xf32>
    %807 = vector.extract_strided_slice %804 {offsets = [0, 10], sizes = [4, 5], strides = [1, 1]} : vector<4x20xf32> to vector<4x5xf32>
    %cst_178 = arith.constant 2.000000e+00 : f32
    %808 = vector.broadcast %cst_178 : f32 to vector<4x5xf32>
    %809 = arith.mulf %808, %807 : vector<4x5xf32>
    %cst_179 = arith.constant 1.000000e+00 : f32
    %810 = vector.broadcast %cst_179 : f32 to vector<4x5xf32>
    %811 = arith.subf %809, %810 : vector<4x5xf32>
    %812 = vector.extract_strided_slice %804 {offsets = [0, 15], sizes = [4, 5], strides = [1, 1]} : vector<4x20xf32> to vector<4x5xf32>
    %813 = arith.mulf %806, %777 : vector<4x5xf32>
    %814 = arith.mulf %805, %811 : vector<4x5xf32>
    %815 = arith.addf %813, %814 : vector<4x5xf32>
    %816 = math.tanh %815 : vector<4x5xf32>
    %817 = arith.mulf %812, %816 : vector<4x5xf32>
    %818 = arith.mulf %817, %715 : vector<4x5xf32>
    %819 = vector.extract_strided_slice %818 {offsets = [0, 0], sizes = [4, 1], strides = [1, 1]} : vector<4x5xf32> to vector<4x1xf32>
    %820 = vector.extract_strided_slice %818 {offsets = [0, 1], sizes = [4, 1], strides = [1, 1]} : vector<4x5xf32> to vector<4x1xf32>
    %821 = arith.addf %819, %820 : vector<4x1xf32>
    %822 = vector.extract_strided_slice %818 {offsets = [0, 2], sizes = [4, 1], strides = [1, 1]} : vector<4x5xf32> to vector<4x1xf32>
    %823 = vector.extract_strided_slice %818 {offsets = [0, 3], sizes = [4, 1], strides = [1, 1]} : vector<4x5xf32> to vector<4x1xf32>
    %824 = arith.addf %822, %823 : vector<4x1xf32>
    %825 = vector.extract_strided_slice %818 {offsets = [0, 4], sizes = [4, 1], strides = [1, 1]} : vector<4x5xf32> to vector<4x1xf32>
    %826 = arith.addf %824, %825 : vector<4x1xf32>
    %827 = arith.addf %821, %826 : vector<4x1xf32>
    %828 = arith.index_cast %c2_i32_174 : i32 to index
    %c0_180 = arith.constant 0 : index
    %c0_181 = arith.constant 0 : index
    %829 = vector.load %arg8[%828, %c0_180, %c0_181] : memref<16x4x1xf32, #tpu.memory_space<vmem>>, vector<1x4x1xf32>
    %830 = vector.shape_cast %829 : vector<1x4x1xf32> to vector<4x1xf32>
    %831 = vector.shape_cast %827 : vector<4x1xf32> to vector<1x4x1xf32>
    tpu.vector_store %arg8[%828, %c0_180, %c0_181], %831 {strides = array<i32>} : memref<16x4x1xf32, #tpu.memory_space<vmem>>, vector<1x4x1xf32>,
    %c3_i32_182 = arith.constant 3 : i32
    %832 = arith.index_cast %c3_i32_182 : i32 to index
    %c0_183 = arith.constant 0 : index
    %c0_184 = arith.constant 0 : index
    %833 = vector.load %arg7[%832, %c0_183, %c0_184] : memref<16x4x20xf32, #tpu.memory_space<vmem>>, vector<1x4x20xf32>
    %834 = vector.shape_cast %833 : vector<1x4x20xf32> to vector<4x20xf32>
    %835 = vector.broadcast %827 : vector<4x1xf32> to vector<4x20xf32>
    %836 = arith.mulf %835, %708 : vector<4x20xf32>
    %837 = arith.addf %834, %836 : vector<4x20xf32>
    %838 = arith.negf %837 : vector<4x20xf32>
    %839 = math.exp %838 : vector<4x20xf32>
    %cst_185 = arith.constant 1.000000e+00 : f32
    %840 = vector.broadcast %cst_185 : f32 to vector<4x20xf32>
    %841 = arith.addf %840, %839 : vector<4x20xf32>
    %842 = arith.divf %840, %841 : vector<4x20xf32>
    %843 = vector.extract_strided_slice %842 {offsets = [0, 0], sizes = [4, 5], strides = [1, 1]} : vector<4x20xf32> to vector<4x5xf32>
    %844 = vector.extract_strided_slice %842 {offsets = [0, 5], sizes = [4, 5], strides = [1, 1]} : vector<4x20xf32> to vector<4x5xf32>
    %845 = vector.extract_strided_slice %842 {offsets = [0, 10], sizes = [4, 5], strides = [1, 1]} : vector<4x20xf32> to vector<4x5xf32>
    %cst_186 = arith.constant 2.000000e+00 : f32
    %846 = vector.broadcast %cst_186 : f32 to vector<4x5xf32>
    %847 = arith.mulf %846, %845 : vector<4x5xf32>
    %cst_187 = arith.constant 1.000000e+00 : f32
    %848 = vector.broadcast %cst_187 : f32 to vector<4x5xf32>
    %849 = arith.subf %847, %848 : vector<4x5xf32>
    %850 = vector.extract_strided_slice %842 {offsets = [0, 15], sizes = [4, 5], strides = [1, 1]} : vector<4x20xf32> to vector<4x5xf32>
    %851 = arith.mulf %844, %815 : vector<4x5xf32>
    %852 = arith.mulf %843, %849 : vector<4x5xf32>
    %853 = arith.addf %851, %852 : vector<4x5xf32>
    %854 = math.tanh %853 : vector<4x5xf32>
    %855 = arith.mulf %850, %854 : vector<4x5xf32>
    %856 = arith.mulf %855, %715 : vector<4x5xf32>
    %857 = vector.extract_strided_slice %856 {offsets = [0, 0], sizes = [4, 1], strides = [1, 1]} : vector<4x5xf32> to vector<4x1xf32>
    %858 = vector.extract_strided_slice %856 {offsets = [0, 1], sizes = [4, 1], strides = [1, 1]} : vector<4x5xf32> to vector<4x1xf32>
    %859 = arith.addf %857, %858 : vector<4x1xf32>
    %860 = vector.extract_strided_slice %856 {offsets = [0, 2], sizes = [4, 1], strides = [1, 1]} : vector<4x5xf32> to vector<4x1xf32>
    %861 = vector.extract_strided_slice %856 {offsets = [0, 3], sizes = [4, 1], strides = [1, 1]} : vector<4x5xf32> to vector<4x1xf32>
    %862 = arith.addf %860, %861 : vector<4x1xf32>
    %863 = vector.extract_strided_slice %856 {offsets = [0, 4], sizes = [4, 1], strides = [1, 1]} : vector<4x5xf32> to vector<4x1xf32>
    %864 = arith.addf %862, %863 : vector<4x1xf32>
    %865 = arith.addf %859, %864 : vector<4x1xf32>
    %866 = arith.index_cast %c3_i32_182 : i32 to index
    %c0_188 = arith.constant 0 : index
    %c0_189 = arith.constant 0 : index
    %867 = vector.load %arg8[%866, %c0_188, %c0_189] : memref<16x4x1xf32, #tpu.memory_space<vmem>>, vector<1x4x1xf32>
    %868 = vector.shape_cast %867 : vector<1x4x1xf32> to vector<4x1xf32>
    %869 = vector.shape_cast %865 : vector<4x1xf32> to vector<1x4x1xf32>
    tpu.vector_store %arg8[%866, %c0_188, %c0_189], %869 {strides = array<i32>} : memref<16x4x1xf32, #tpu.memory_space<vmem>>, vector<1x4x1xf32>,
    %c4_i32_190 = arith.constant 4 : i32
    %870 = arith.index_cast %c4_i32_190 : i32 to index
    %c0_191 = arith.constant 0 : index
    %c0_192 = arith.constant 0 : index
    %871 = vector.load %arg7[%870, %c0_191, %c0_192] : memref<16x4x20xf32, #tpu.memory_space<vmem>>, vector<1x4x20xf32>
    %872 = vector.shape_cast %871 : vector<1x4x20xf32> to vector<4x20xf32>
    %873 = vector.broadcast %865 : vector<4x1xf32> to vector<4x20xf32>
    %874 = arith.mulf %873, %708 : vector<4x20xf32>
    %875 = arith.addf %872, %874 : vector<4x20xf32>
    %876 = arith.negf %875 : vector<4x20xf32>
    %877 = math.exp %876 : vector<4x20xf32>
    %cst_193 = arith.constant 1.000000e+00 : f32
    %878 = vector.broadcast %cst_193 : f32 to vector<4x20xf32>
    %879 = arith.addf %878, %877 : vector<4x20xf32>
    %880 = arith.divf %878, %879 : vector<4x20xf32>
    %881 = vector.extract_strided_slice %880 {offsets = [0, 0], sizes = [4, 5], strides = [1, 1]} : vector<4x20xf32> to vector<4x5xf32>
    %882 = vector.extract_strided_slice %880 {offsets = [0, 5], sizes = [4, 5], strides = [1, 1]} : vector<4x20xf32> to vector<4x5xf32>
    %883 = vector.extract_strided_slice %880 {offsets = [0, 10], sizes = [4, 5], strides = [1, 1]} : vector<4x20xf32> to vector<4x5xf32>
    %cst_194 = arith.constant 2.000000e+00 : f32
    %884 = vector.broadcast %cst_194 : f32 to vector<4x5xf32>
    %885 = arith.mulf %884, %883 : vector<4x5xf32>
    %cst_195 = arith.constant 1.000000e+00 : f32
    %886 = vector.broadcast %cst_195 : f32 to vector<4x5xf32>
    %887 = arith.subf %885, %886 : vector<4x5xf32>
    %888 = vector.extract_strided_slice %880 {offsets = [0, 15], sizes = [4, 5], strides = [1, 1]} : vector<4x20xf32> to vector<4x5xf32>
    %889 = arith.mulf %882, %853 : vector<4x5xf32>
    %890 = arith.mulf %881, %887 : vector<4x5xf32>
    %891 = arith.addf %889, %890 : vector<4x5xf32>
    %892 = math.tanh %891 : vector<4x5xf32>
    %893 = arith.mulf %888, %892 : vector<4x5xf32>
    %894 = arith.mulf %893, %715 : vector<4x5xf32>
    %895 = vector.extract_strided_slice %894 {offsets = [0, 0], sizes = [4, 1], strides = [1, 1]} : vector<4x5xf32> to vector<4x1xf32>
    %896 = vector.extract_strided_slice %894 {offsets = [0, 1], sizes = [4, 1], strides = [1, 1]} : vector<4x5xf32> to vector<4x1xf32>
    %897 = arith.addf %895, %896 : vector<4x1xf32>
    %898 = vector.extract_strided_slice %894 {offsets = [0, 2], sizes = [4, 1], strides = [1, 1]} : vector<4x5xf32> to vector<4x1xf32>
    %899 = vector.extract_strided_slice %894 {offsets = [0, 3], sizes = [4, 1], strides = [1, 1]} : vector<4x5xf32> to vector<4x1xf32>
    %900 = arith.addf %898, %899 : vector<4x1xf32>
    %901 = vector.extract_strided_slice %894 {offsets = [0, 4], sizes = [4, 1], strides = [1, 1]} : vector<4x5xf32> to vector<4x1xf32>
    %902 = arith.addf %900, %901 : vector<4x1xf32>
    %903 = arith.addf %897, %902 : vector<4x1xf32>
    %904 = arith.index_cast %c4_i32_190 : i32 to index
    %c0_196 = arith.constant 0 : index
    %c0_197 = arith.constant 0 : index
    %905 = vector.load %arg8[%904, %c0_196, %c0_197] : memref<16x4x1xf32, #tpu.memory_space<vmem>>, vector<1x4x1xf32>
    %906 = vector.shape_cast %905 : vector<1x4x1xf32> to vector<4x1xf32>
    %907 = vector.shape_cast %903 : vector<4x1xf32> to vector<1x4x1xf32>
    tpu.vector_store %arg8[%904, %c0_196, %c0_197], %907 {strides = array<i32>} : memref<16x4x1xf32, #tpu.memory_space<vmem>>, vector<1x4x1xf32>,
    %c5_i32_198 = arith.constant 5 : i32
    %908 = arith.index_cast %c5_i32_198 : i32 to index
    %c0_199 = arith.constant 0 : index
    %c0_200 = arith.constant 0 : index
    %909 = vector.load %arg7[%908, %c0_199, %c0_200] : memref<16x4x20xf32, #tpu.memory_space<vmem>>, vector<1x4x20xf32>
    %910 = vector.shape_cast %909 : vector<1x4x20xf32> to vector<4x20xf32>
    %911 = vector.broadcast %903 : vector<4x1xf32> to vector<4x20xf32>
    %912 = arith.mulf %911, %708 : vector<4x20xf32>
    %913 = arith.addf %910, %912 : vector<4x20xf32>
    %914 = arith.negf %913 : vector<4x20xf32>
    %915 = math.exp %914 : vector<4x20xf32>
    %cst_201 = arith.constant 1.000000e+00 : f32
    %916 = vector.broadcast %cst_201 : f32 to vector<4x20xf32>
    %917 = arith.addf %916, %915 : vector<4x20xf32>
    %918 = arith.divf %916, %917 : vector<4x20xf32>
    %919 = vector.extract_strided_slice %918 {offsets = [0, 0], sizes = [4, 5], strides = [1, 1]} : vector<4x20xf32> to vector<4x5xf32>
    %920 = vector.extract_strided_slice %918 {offsets = [0, 5], sizes = [4, 5], strides = [1, 1]} : vector<4x20xf32> to vector<4x5xf32>
    %921 = vector.extract_strided_slice %918 {offsets = [0, 10], sizes = [4, 5], strides = [1, 1]} : vector<4x20xf32> to vector<4x5xf32>
    %cst_202 = arith.constant 2.000000e+00 : f32
    %922 = vector.broadcast %cst_202 : f32 to vector<4x5xf32>
    %923 = arith.mulf %922, %921 : vector<4x5xf32>
    %cst_203 = arith.constant 1.000000e+00 : f32
    %924 = vector.broadcast %cst_203 : f32 to vector<4x5xf32>
    %925 = arith.subf %923, %924 : vector<4x5xf32>
    %926 = vector.extract_strided_slice %918 {offsets = [0, 15], sizes = [4, 5], strides = [1, 1]} : vector<4x20xf32> to vector<4x5xf32>
    %927 = arith.mulf %920, %891 : vector<4x5xf32>
    %928 = arith.mulf %919, %925 : vector<4x5xf32>
    %929 = arith.addf %927, %928 : vector<4x5xf32>
    %930 = math.tanh %929 : vector<4x5xf32>
    %931 = arith.mulf %926, %930 : vector<4x5xf32>
    %932 = arith.mulf %931, %715 : vector<4x5xf32>
    %933 = vector.extract_strided_slice %932 {offsets = [0, 0], sizes = [4, 1], strides = [1, 1]} : vector<4x5xf32> to vector<4x1xf32>
    %934 = vector.extract_strided_slice %932 {offsets = [0, 1], sizes = [4, 1], strides = [1, 1]} : vector<4x5xf32> to vector<4x1xf32>
    %935 = arith.addf %933, %934 : vector<4x1xf32>
    %936 = vector.extract_strided_slice %932 {offsets = [0, 2], sizes = [4, 1], strides = [1, 1]} : vector<4x5xf32> to vector<4x1xf32>
    %937 = vector.extract_strided_slice %932 {offsets = [0, 3], sizes = [4, 1], strides = [1, 1]} : vector<4x5xf32> to vector<4x1xf32>
    %938 = arith.addf %936, %937 : vector<4x1xf32>
    %939 = vector.extract_strided_slice %932 {offsets = [0, 4], sizes = [4, 1], strides = [1, 1]} : vector<4x5xf32> to vector<4x1xf32>
    %940 = arith.addf %938, %939 : vector<4x1xf32>
    %941 = arith.addf %935, %940 : vector<4x1xf32>
    %942 = arith.index_cast %c5_i32_198 : i32 to index
    %c0_204 = arith.constant 0 : index
    %c0_205 = arith.constant 0 : index
    %943 = vector.load %arg8[%942, %c0_204, %c0_205] : memref<16x4x1xf32, #tpu.memory_space<vmem>>, vector<1x4x1xf32>
    %944 = vector.shape_cast %943 : vector<1x4x1xf32> to vector<4x1xf32>
    %945 = vector.shape_cast %941 : vector<4x1xf32> to vector<1x4x1xf32>
    tpu.vector_store %arg8[%942, %c0_204, %c0_205], %945 {strides = array<i32>} : memref<16x4x1xf32, #tpu.memory_space<vmem>>, vector<1x4x1xf32>,
    %c6_i32_206 = arith.constant 6 : i32
    %946 = arith.index_cast %c6_i32_206 : i32 to index
    %c0_207 = arith.constant 0 : index
    %c0_208 = arith.constant 0 : index
    %947 = vector.load %arg7[%946, %c0_207, %c0_208] : memref<16x4x20xf32, #tpu.memory_space<vmem>>, vector<1x4x20xf32>
    %948 = vector.shape_cast %947 : vector<1x4x20xf32> to vector<4x20xf32>
    %949 = vector.broadcast %941 : vector<4x1xf32> to vector<4x20xf32>
    %950 = arith.mulf %949, %708 : vector<4x20xf32>
    %951 = arith.addf %948, %950 : vector<4x20xf32>
    %952 = arith.negf %951 : vector<4x20xf32>
    %953 = math.exp %952 : vector<4x20xf32>
    %cst_209 = arith.constant 1.000000e+00 : f32
    %954 = vector.broadcast %cst_209 : f32 to vector<4x20xf32>
    %955 = arith.addf %954, %953 : vector<4x20xf32>
    %956 = arith.divf %954, %955 : vector<4x20xf32>
    %957 = vector.extract_strided_slice %956 {offsets = [0, 0], sizes = [4, 5], strides = [1, 1]} : vector<4x20xf32> to vector<4x5xf32>
    %958 = vector.extract_strided_slice %956 {offsets = [0, 5], sizes = [4, 5], strides = [1, 1]} : vector<4x20xf32> to vector<4x5xf32>
    %959 = vector.extract_strided_slice %956 {offsets = [0, 10], sizes = [4, 5], strides = [1, 1]} : vector<4x20xf32> to vector<4x5xf32>
    %cst_210 = arith.constant 2.000000e+00 : f32
    %960 = vector.broadcast %cst_210 : f32 to vector<4x5xf32>
    %961 = arith.mulf %960, %959 : vector<4x5xf32>
    %cst_211 = arith.constant 1.000000e+00 : f32
    %962 = vector.broadcast %cst_211 : f32 to vector<4x5xf32>
    %963 = arith.subf %961, %962 : vector<4x5xf32>
    %964 = vector.extract_strided_slice %956 {offsets = [0, 15], sizes = [4, 5], strides = [1, 1]} : vector<4x20xf32> to vector<4x5xf32>
    %965 = arith.mulf %958, %929 : vector<4x5xf32>
    %966 = arith.mulf %957, %963 : vector<4x5xf32>
    %967 = arith.addf %965, %966 : vector<4x5xf32>
    %968 = math.tanh %967 : vector<4x5xf32>
    %969 = arith.mulf %964, %968 : vector<4x5xf32>
    %970 = arith.mulf %969, %715 : vector<4x5xf32>
    %971 = vector.extract_strided_slice %970 {offsets = [0, 0], sizes = [4, 1], strides = [1, 1]} : vector<4x5xf32> to vector<4x1xf32>
    %972 = vector.extract_strided_slice %970 {offsets = [0, 1], sizes = [4, 1], strides = [1, 1]} : vector<4x5xf32> to vector<4x1xf32>
    %973 = arith.addf %971, %972 : vector<4x1xf32>
    %974 = vector.extract_strided_slice %970 {offsets = [0, 2], sizes = [4, 1], strides = [1, 1]} : vector<4x5xf32> to vector<4x1xf32>
    %975 = vector.extract_strided_slice %970 {offsets = [0, 3], sizes = [4, 1], strides = [1, 1]} : vector<4x5xf32> to vector<4x1xf32>
    %976 = arith.addf %974, %975 : vector<4x1xf32>
    %977 = vector.extract_strided_slice %970 {offsets = [0, 4], sizes = [4, 1], strides = [1, 1]} : vector<4x5xf32> to vector<4x1xf32>
    %978 = arith.addf %976, %977 : vector<4x1xf32>
    %979 = arith.addf %973, %978 : vector<4x1xf32>
    %980 = arith.index_cast %c6_i32_206 : i32 to index
    %c0_212 = arith.constant 0 : index
    %c0_213 = arith.constant 0 : index
    %981 = vector.load %arg8[%980, %c0_212, %c0_213] : memref<16x4x1xf32, #tpu.memory_space<vmem>>, vector<1x4x1xf32>
    %982 = vector.shape_cast %981 : vector<1x4x1xf32> to vector<4x1xf32>
    %983 = vector.shape_cast %979 : vector<4x1xf32> to vector<1x4x1xf32>
    tpu.vector_store %arg8[%980, %c0_212, %c0_213], %983 {strides = array<i32>} : memref<16x4x1xf32, #tpu.memory_space<vmem>>, vector<1x4x1xf32>,
    %c7_i32_214 = arith.constant 7 : i32
    %984 = arith.index_cast %c7_i32_214 : i32 to index
    %c0_215 = arith.constant 0 : index
    %c0_216 = arith.constant 0 : index
    %985 = vector.load %arg7[%984, %c0_215, %c0_216] : memref<16x4x20xf32, #tpu.memory_space<vmem>>, vector<1x4x20xf32>
    %986 = vector.shape_cast %985 : vector<1x4x20xf32> to vector<4x20xf32>
    %987 = vector.broadcast %979 : vector<4x1xf32> to vector<4x20xf32>
    %988 = arith.mulf %987, %708 : vector<4x20xf32>
    %989 = arith.addf %986, %988 : vector<4x20xf32>
    %990 = arith.negf %989 : vector<4x20xf32>
    %991 = math.exp %990 : vector<4x20xf32>
    %cst_217 = arith.constant 1.000000e+00 : f32
    %992 = vector.broadcast %cst_217 : f32 to vector<4x20xf32>
    %993 = arith.addf %992, %991 : vector<4x20xf32>
    %994 = arith.divf %992, %993 : vector<4x20xf32>
    %995 = vector.extract_strided_slice %994 {offsets = [0, 0], sizes = [4, 5], strides = [1, 1]} : vector<4x20xf32> to vector<4x5xf32>
    %996 = vector.extract_strided_slice %994 {offsets = [0, 5], sizes = [4, 5], strides = [1, 1]} : vector<4x20xf32> to vector<4x5xf32>
    %997 = vector.extract_strided_slice %994 {offsets = [0, 10], sizes = [4, 5], strides = [1, 1]} : vector<4x20xf32> to vector<4x5xf32>
    %cst_218 = arith.constant 2.000000e+00 : f32
    %998 = vector.broadcast %cst_218 : f32 to vector<4x5xf32>
    %999 = arith.mulf %998, %997 : vector<4x5xf32>
    %cst_219 = arith.constant 1.000000e+00 : f32
    %1000 = vector.broadcast %cst_219 : f32 to vector<4x5xf32>
    %1001 = arith.subf %999, %1000 : vector<4x5xf32>
    %1002 = vector.extract_strided_slice %994 {offsets = [0, 15], sizes = [4, 5], strides = [1, 1]} : vector<4x20xf32> to vector<4x5xf32>
    %1003 = arith.mulf %996, %967 : vector<4x5xf32>
    %1004 = arith.mulf %995, %1001 : vector<4x5xf32>
    %1005 = arith.addf %1003, %1004 : vector<4x5xf32>
    %1006 = math.tanh %1005 : vector<4x5xf32>
    %1007 = arith.mulf %1002, %1006 : vector<4x5xf32>
    %1008 = arith.mulf %1007, %715 : vector<4x5xf32>
    %1009 = vector.extract_strided_slice %1008 {offsets = [0, 0], sizes = [4, 1], strides = [1, 1]} : vector<4x5xf32> to vector<4x1xf32>
    %1010 = vector.extract_strided_slice %1008 {offsets = [0, 1], sizes = [4, 1], strides = [1, 1]} : vector<4x5xf32> to vector<4x1xf32>
    %1011 = arith.addf %1009, %1010 : vector<4x1xf32>
    %1012 = vector.extract_strided_slice %1008 {offsets = [0, 2], sizes = [4, 1], strides = [1, 1]} : vector<4x5xf32> to vector<4x1xf32>
    %1013 = vector.extract_strided_slice %1008 {offsets = [0, 3], sizes = [4, 1], strides = [1, 1]} : vector<4x5xf32> to vector<4x1xf32>
    %1014 = arith.addf %1012, %1013 : vector<4x1xf32>
    %1015 = vector.extract_strided_slice %1008 {offsets = [0, 4], sizes = [4, 1], strides = [1, 1]} : vector<4x5xf32> to vector<4x1xf32>
    %1016 = arith.addf %1014, %1015 : vector<4x1xf32>
    %1017 = arith.addf %1011, %1016 : vector<4x1xf32>
    %1018 = arith.index_cast %c7_i32_214 : i32 to index
    %c0_220 = arith.constant 0 : index
    %c0_221 = arith.constant 0 : index
    %1019 = vector.load %arg8[%1018, %c0_220, %c0_221] : memref<16x4x1xf32, #tpu.memory_space<vmem>>, vector<1x4x1xf32>
    %1020 = vector.shape_cast %1019 : vector<1x4x1xf32> to vector<4x1xf32>
    %1021 = vector.shape_cast %1017 : vector<4x1xf32> to vector<1x4x1xf32>
    tpu.vector_store %arg8[%1018, %c0_220, %c0_221], %1021 {strides = array<i32>} : memref<16x4x1xf32, #tpu.memory_space<vmem>>, vector<1x4x1xf32>,
    %c8_i32_222 = arith.constant 8 : i32
    %1022 = arith.index_cast %c8_i32_222 : i32 to index
    %c0_223 = arith.constant 0 : index
    %c0_224 = arith.constant 0 : index
    %1023 = vector.load %arg7[%1022, %c0_223, %c0_224] : memref<16x4x20xf32, #tpu.memory_space<vmem>>, vector<1x4x20xf32>
    %1024 = vector.shape_cast %1023 : vector<1x4x20xf32> to vector<4x20xf32>
    %1025 = vector.broadcast %1017 : vector<4x1xf32> to vector<4x20xf32>
    %1026 = arith.mulf %1025, %708 : vector<4x20xf32>
    %1027 = arith.addf %1024, %1026 : vector<4x20xf32>
    %1028 = arith.negf %1027 : vector<4x20xf32>
    %1029 = math.exp %1028 : vector<4x20xf32>
    %cst_225 = arith.constant 1.000000e+00 : f32
    %1030 = vector.broadcast %cst_225 : f32 to vector<4x20xf32>
    %1031 = arith.addf %1030, %1029 : vector<4x20xf32>
    %1032 = arith.divf %1030, %1031 : vector<4x20xf32>
    %1033 = vector.extract_strided_slice %1032 {offsets = [0, 0], sizes = [4, 5], strides = [1, 1]} : vector<4x20xf32> to vector<4x5xf32>
    %1034 = vector.extract_strided_slice %1032 {offsets = [0, 5], sizes = [4, 5], strides = [1, 1]} : vector<4x20xf32> to vector<4x5xf32>
    %1035 = vector.extract_strided_slice %1032 {offsets = [0, 10], sizes = [4, 5], strides = [1, 1]} : vector<4x20xf32> to vector<4x5xf32>
    %cst_226 = arith.constant 2.000000e+00 : f32
    %1036 = vector.broadcast %cst_226 : f32 to vector<4x5xf32>
    %1037 = arith.mulf %1036, %1035 : vector<4x5xf32>
    %cst_227 = arith.constant 1.000000e+00 : f32
    %1038 = vector.broadcast %cst_227 : f32 to vector<4x5xf32>
    %1039 = arith.subf %1037, %1038 : vector<4x5xf32>
    %1040 = vector.extract_strided_slice %1032 {offsets = [0, 15], sizes = [4, 5], strides = [1, 1]} : vector<4x20xf32> to vector<4x5xf32>
    %1041 = arith.mulf %1034, %1005 : vector<4x5xf32>
    %1042 = arith.mulf %1033, %1039 : vector<4x5xf32>
    %1043 = arith.addf %1041, %1042 : vector<4x5xf32>
    %1044 = math.tanh %1043 : vector<4x5xf32>
    %1045 = arith.mulf %1040, %1044 : vector<4x5xf32>
    %1046 = arith.mulf %1045, %715 : vector<4x5xf32>
    %1047 = vector.extract_strided_slice %1046 {offsets = [0, 0], sizes = [4, 1], strides = [1, 1]} : vector<4x5xf32> to vector<4x1xf32>
    %1048 = vector.extract_strided_slice %1046 {offsets = [0, 1], sizes = [4, 1], strides = [1, 1]} : vector<4x5xf32> to vector<4x1xf32>
    %1049 = arith.addf %1047, %1048 : vector<4x1xf32>
    %1050 = vector.extract_strided_slice %1046 {offsets = [0, 2], sizes = [4, 1], strides = [1, 1]} : vector<4x5xf32> to vector<4x1xf32>
    %1051 = vector.extract_strided_slice %1046 {offsets = [0, 3], sizes = [4, 1], strides = [1, 1]} : vector<4x5xf32> to vector<4x1xf32>
    %1052 = arith.addf %1050, %1051 : vector<4x1xf32>
    %1053 = vector.extract_strided_slice %1046 {offsets = [0, 4], sizes = [4, 1], strides = [1, 1]} : vector<4x5xf32> to vector<4x1xf32>
    %1054 = arith.addf %1052, %1053 : vector<4x1xf32>
    %1055 = arith.addf %1049, %1054 : vector<4x1xf32>
    %1056 = arith.index_cast %c8_i32_222 : i32 to index
    %c0_228 = arith.constant 0 : index
    %c0_229 = arith.constant 0 : index
    %1057 = vector.load %arg8[%1056, %c0_228, %c0_229] : memref<16x4x1xf32, #tpu.memory_space<vmem>>, vector<1x4x1xf32>
    %1058 = vector.shape_cast %1057 : vector<1x4x1xf32> to vector<4x1xf32>
    %1059 = vector.shape_cast %1055 : vector<4x1xf32> to vector<1x4x1xf32>
    tpu.vector_store %arg8[%1056, %c0_228, %c0_229], %1059 {strides = array<i32>} : memref<16x4x1xf32, #tpu.memory_space<vmem>>, vector<1x4x1xf32>,
    %c9_i32_230 = arith.constant 9 : i32
    %1060 = arith.index_cast %c9_i32_230 : i32 to index
    %c0_231 = arith.constant 0 : index
    %c0_232 = arith.constant 0 : index
    %1061 = vector.load %arg7[%1060, %c0_231, %c0_232] : memref<16x4x20xf32, #tpu.memory_space<vmem>>, vector<1x4x20xf32>
    %1062 = vector.shape_cast %1061 : vector<1x4x20xf32> to vector<4x20xf32>
    %1063 = vector.broadcast %1055 : vector<4x1xf32> to vector<4x20xf32>
    %1064 = arith.mulf %1063, %708 : vector<4x20xf32>
    %1065 = arith.addf %1062, %1064 : vector<4x20xf32>
    %1066 = arith.negf %1065 : vector<4x20xf32>
    %1067 = math.exp %1066 : vector<4x20xf32>
    %cst_233 = arith.constant 1.000000e+00 : f32
    %1068 = vector.broadcast %cst_233 : f32 to vector<4x20xf32>
    %1069 = arith.addf %1068, %1067 : vector<4x20xf32>
    %1070 = arith.divf %1068, %1069 : vector<4x20xf32>
    %1071 = vector.extract_strided_slice %1070 {offsets = [0, 0], sizes = [4, 5], strides = [1, 1]} : vector<4x20xf32> to vector<4x5xf32>
    %1072 = vector.extract_strided_slice %1070 {offsets = [0, 5], sizes = [4, 5], strides = [1, 1]} : vector<4x20xf32> to vector<4x5xf32>
    %1073 = vector.extract_strided_slice %1070 {offsets = [0, 10], sizes = [4, 5], strides = [1, 1]} : vector<4x20xf32> to vector<4x5xf32>
    %cst_234 = arith.constant 2.000000e+00 : f32
    %1074 = vector.broadcast %cst_234 : f32 to vector<4x5xf32>
    %1075 = arith.mulf %1074, %1073 : vector<4x5xf32>
    %cst_235 = arith.constant 1.000000e+00 : f32
    %1076 = vector.broadcast %cst_235 : f32 to vector<4x5xf32>
    %1077 = arith.subf %1075, %1076 : vector<4x5xf32>
    %1078 = vector.extract_strided_slice %1070 {offsets = [0, 15], sizes = [4, 5], strides = [1, 1]} : vector<4x20xf32> to vector<4x5xf32>
    %1079 = arith.mulf %1072, %1043 : vector<4x5xf32>
    %1080 = arith.mulf %1071, %1077 : vector<4x5xf32>
    %1081 = arith.addf %1079, %1080 : vector<4x5xf32>
    %1082 = math.tanh %1081 : vector<4x5xf32>
    %1083 = arith.mulf %1078, %1082 : vector<4x5xf32>
    %1084 = arith.mulf %1083, %715 : vector<4x5xf32>
    %1085 = vector.extract_strided_slice %1084 {offsets = [0, 0], sizes = [4, 1], strides = [1, 1]} : vector<4x5xf32> to vector<4x1xf32>
    %1086 = vector.extract_strided_slice %1084 {offsets = [0, 1], sizes = [4, 1], strides = [1, 1]} : vector<4x5xf32> to vector<4x1xf32>
    %1087 = arith.addf %1085, %1086 : vector<4x1xf32>
    %1088 = vector.extract_strided_slice %1084 {offsets = [0, 2], sizes = [4, 1], strides = [1, 1]} : vector<4x5xf32> to vector<4x1xf32>
    %1089 = vector.extract_strided_slice %1084 {offsets = [0, 3], sizes = [4, 1], strides = [1, 1]} : vector<4x5xf32> to vector<4x1xf32>
    %1090 = arith.addf %1088, %1089 : vector<4x1xf32>
    %1091 = vector.extract_strided_slice %1084 {offsets = [0, 4], sizes = [4, 1], strides = [1, 1]} : vector<4x5xf32> to vector<4x1xf32>
    %1092 = arith.addf %1090, %1091 : vector<4x1xf32>
    %1093 = arith.addf %1087, %1092 : vector<4x1xf32>
    %1094 = arith.index_cast %c9_i32_230 : i32 to index
    %c0_236 = arith.constant 0 : index
    %c0_237 = arith.constant 0 : index
    %1095 = vector.load %arg8[%1094, %c0_236, %c0_237] : memref<16x4x1xf32, #tpu.memory_space<vmem>>, vector<1x4x1xf32>
    %1096 = vector.shape_cast %1095 : vector<1x4x1xf32> to vector<4x1xf32>
    %1097 = vector.shape_cast %1093 : vector<4x1xf32> to vector<1x4x1xf32>
    tpu.vector_store %arg8[%1094, %c0_236, %c0_237], %1097 {strides = array<i32>} : memref<16x4x1xf32, #tpu.memory_space<vmem>>, vector<1x4x1xf32>,
    %c10_i32_238 = arith.constant 10 : i32
    %1098 = arith.index_cast %c10_i32_238 : i32 to index
    %c0_239 = arith.constant 0 : index
    %c0_240 = arith.constant 0 : index
    %1099 = vector.load %arg7[%1098, %c0_239, %c0_240] : memref<16x4x20xf32, #tpu.memory_space<vmem>>, vector<1x4x20xf32>
    %1100 = vector.shape_cast %1099 : vector<1x4x20xf32> to vector<4x20xf32>
    %1101 = vector.broadcast %1093 : vector<4x1xf32> to vector<4x20xf32>
    %1102 = arith.mulf %1101, %708 : vector<4x20xf32>
    %1103 = arith.addf %1100, %1102 : vector<4x20xf32>
    %1104 = arith.negf %1103 : vector<4x20xf32>
    %1105 = math.exp %1104 : vector<4x20xf32>
    %cst_241 = arith.constant 1.000000e+00 : f32
    %1106 = vector.broadcast %cst_241 : f32 to vector<4x20xf32>
    %1107 = arith.addf %1106, %1105 : vector<4x20xf32>
    %1108 = arith.divf %1106, %1107 : vector<4x20xf32>
    %1109 = vector.extract_strided_slice %1108 {offsets = [0, 0], sizes = [4, 5], strides = [1, 1]} : vector<4x20xf32> to vector<4x5xf32>
    %1110 = vector.extract_strided_slice %1108 {offsets = [0, 5], sizes = [4, 5], strides = [1, 1]} : vector<4x20xf32> to vector<4x5xf32>
    %1111 = vector.extract_strided_slice %1108 {offsets = [0, 10], sizes = [4, 5], strides = [1, 1]} : vector<4x20xf32> to vector<4x5xf32>
    %cst_242 = arith.constant 2.000000e+00 : f32
    %1112 = vector.broadcast %cst_242 : f32 to vector<4x5xf32>
    %1113 = arith.mulf %1112, %1111 : vector<4x5xf32>
    %cst_243 = arith.constant 1.000000e+00 : f32
    %1114 = vector.broadcast %cst_243 : f32 to vector<4x5xf32>
    %1115 = arith.subf %1113, %1114 : vector<4x5xf32>
    %1116 = vector.extract_strided_slice %1108 {offsets = [0, 15], sizes = [4, 5], strides = [1, 1]} : vector<4x20xf32> to vector<4x5xf32>
    %1117 = arith.mulf %1110, %1081 : vector<4x5xf32>
    %1118 = arith.mulf %1109, %1115 : vector<4x5xf32>
    %1119 = arith.addf %1117, %1118 : vector<4x5xf32>
    %1120 = math.tanh %1119 : vector<4x5xf32>
    %1121 = arith.mulf %1116, %1120 : vector<4x5xf32>
    %1122 = arith.mulf %1121, %715 : vector<4x5xf32>
    %1123 = vector.extract_strided_slice %1122 {offsets = [0, 0], sizes = [4, 1], strides = [1, 1]} : vector<4x5xf32> to vector<4x1xf32>
    %1124 = vector.extract_strided_slice %1122 {offsets = [0, 1], sizes = [4, 1], strides = [1, 1]} : vector<4x5xf32> to vector<4x1xf32>
    %1125 = arith.addf %1123, %1124 : vector<4x1xf32>
    %1126 = vector.extract_strided_slice %1122 {offsets = [0, 2], sizes = [4, 1], strides = [1, 1]} : vector<4x5xf32> to vector<4x1xf32>
    %1127 = vector.extract_strided_slice %1122 {offsets = [0, 3], sizes = [4, 1], strides = [1, 1]} : vector<4x5xf32> to vector<4x1xf32>
    %1128 = arith.addf %1126, %1127 : vector<4x1xf32>
    %1129 = vector.extract_strided_slice %1122 {offsets = [0, 4], sizes = [4, 1], strides = [1, 1]} : vector<4x5xf32> to vector<4x1xf32>
    %1130 = arith.addf %1128, %1129 : vector<4x1xf32>
    %1131 = arith.addf %1125, %1130 : vector<4x1xf32>
    %1132 = arith.index_cast %c10_i32_238 : i32 to index
    %c0_244 = arith.constant 0 : index
    %c0_245 = arith.constant 0 : index
    %1133 = vector.load %arg8[%1132, %c0_244, %c0_245] : memref<16x4x1xf32, #tpu.memory_space<vmem>>, vector<1x4x1xf32>
    %1134 = vector.shape_cast %1133 : vector<1x4x1xf32> to vector<4x1xf32>
    %1135 = vector.shape_cast %1131 : vector<4x1xf32> to vector<1x4x1xf32>
    tpu.vector_store %arg8[%1132, %c0_244, %c0_245], %1135 {strides = array<i32>} : memref<16x4x1xf32, #tpu.memory_space<vmem>>, vector<1x4x1xf32>,
    %c11_i32_246 = arith.constant 11 : i32
    %1136 = arith.index_cast %c11_i32_246 : i32 to index
    %c0_247 = arith.constant 0 : index
    %c0_248 = arith.constant 0 : index
    %1137 = vector.load %arg7[%1136, %c0_247, %c0_248] : memref<16x4x20xf32, #tpu.memory_space<vmem>>, vector<1x4x20xf32>
    %1138 = vector.shape_cast %1137 : vector<1x4x20xf32> to vector<4x20xf32>
    %1139 = vector.broadcast %1131 : vector<4x1xf32> to vector<4x20xf32>
    %1140 = arith.mulf %1139, %708 : vector<4x20xf32>
    %1141 = arith.addf %1138, %1140 : vector<4x20xf32>
    %1142 = arith.negf %1141 : vector<4x20xf32>
    %1143 = math.exp %1142 : vector<4x20xf32>
    %cst_249 = arith.constant 1.000000e+00 : f32
    %1144 = vector.broadcast %cst_249 : f32 to vector<4x20xf32>
    %1145 = arith.addf %1144, %1143 : vector<4x20xf32>
    %1146 = arith.divf %1144, %1145 : vector<4x20xf32>
    %1147 = vector.extract_strided_slice %1146 {offsets = [0, 0], sizes = [4, 5], strides = [1, 1]} : vector<4x20xf32> to vector<4x5xf32>
    %1148 = vector.extract_strided_slice %1146 {offsets = [0, 5], sizes = [4, 5], strides = [1, 1]} : vector<4x20xf32> to vector<4x5xf32>
    %1149 = vector.extract_strided_slice %1146 {offsets = [0, 10], sizes = [4, 5], strides = [1, 1]} : vector<4x20xf32> to vector<4x5xf32>
    %cst_250 = arith.constant 2.000000e+00 : f32
    %1150 = vector.broadcast %cst_250 : f32 to vector<4x5xf32>
    %1151 = arith.mulf %1150, %1149 : vector<4x5xf32>
    %cst_251 = arith.constant 1.000000e+00 : f32
    %1152 = vector.broadcast %cst_251 : f32 to vector<4x5xf32>
    %1153 = arith.subf %1151, %1152 : vector<4x5xf32>
    %1154 = vector.extract_strided_slice %1146 {offsets = [0, 15], sizes = [4, 5], strides = [1, 1]} : vector<4x20xf32> to vector<4x5xf32>
    %1155 = arith.mulf %1148, %1119 : vector<4x5xf32>
    %1156 = arith.mulf %1147, %1153 : vector<4x5xf32>
    %1157 = arith.addf %1155, %1156 : vector<4x5xf32>
    %1158 = math.tanh %1157 : vector<4x5xf32>
    %1159 = arith.mulf %1154, %1158 : vector<4x5xf32>
    %1160 = arith.mulf %1159, %715 : vector<4x5xf32>
    %1161 = vector.extract_strided_slice %1160 {offsets = [0, 0], sizes = [4, 1], strides = [1, 1]} : vector<4x5xf32> to vector<4x1xf32>
    %1162 = vector.extract_strided_slice %1160 {offsets = [0, 1], sizes = [4, 1], strides = [1, 1]} : vector<4x5xf32> to vector<4x1xf32>
    %1163 = arith.addf %1161, %1162 : vector<4x1xf32>
    %1164 = vector.extract_strided_slice %1160 {offsets = [0, 2], sizes = [4, 1], strides = [1, 1]} : vector<4x5xf32> to vector<4x1xf32>
    %1165 = vector.extract_strided_slice %1160 {offsets = [0, 3], sizes = [4, 1], strides = [1, 1]} : vector<4x5xf32> to vector<4x1xf32>
    %1166 = arith.addf %1164, %1165 : vector<4x1xf32>
    %1167 = vector.extract_strided_slice %1160 {offsets = [0, 4], sizes = [4, 1], strides = [1, 1]} : vector<4x5xf32> to vector<4x1xf32>
    %1168 = arith.addf %1166, %1167 : vector<4x1xf32>
    %1169 = arith.addf %1163, %1168 : vector<4x1xf32>
    %1170 = arith.index_cast %c11_i32_246 : i32 to index
    %c0_252 = arith.constant 0 : index
    %c0_253 = arith.constant 0 : index
    %1171 = vector.load %arg8[%1170, %c0_252, %c0_253] : memref<16x4x1xf32, #tpu.memory_space<vmem>>, vector<1x4x1xf32>
    %1172 = vector.shape_cast %1171 : vector<1x4x1xf32> to vector<4x1xf32>
    %1173 = vector.shape_cast %1169 : vector<4x1xf32> to vector<1x4x1xf32>
    tpu.vector_store %arg8[%1170, %c0_252, %c0_253], %1173 {strides = array<i32>} : memref<16x4x1xf32, #tpu.memory_space<vmem>>, vector<1x4x1xf32>,
    %c12_i32_254 = arith.constant 12 : i32
    %1174 = arith.index_cast %c12_i32_254 : i32 to index
    %c0_255 = arith.constant 0 : index
    %c0_256 = arith.constant 0 : index
    %1175 = vector.load %arg7[%1174, %c0_255, %c0_256] : memref<16x4x20xf32, #tpu.memory_space<vmem>>, vector<1x4x20xf32>
    %1176 = vector.shape_cast %1175 : vector<1x4x20xf32> to vector<4x20xf32>
    %1177 = vector.broadcast %1169 : vector<4x1xf32> to vector<4x20xf32>
    %1178 = arith.mulf %1177, %708 : vector<4x20xf32>
    %1179 = arith.addf %1176, %1178 : vector<4x20xf32>
    %1180 = arith.negf %1179 : vector<4x20xf32>
    %1181 = math.exp %1180 : vector<4x20xf32>
    %cst_257 = arith.constant 1.000000e+00 : f32
    %1182 = vector.broadcast %cst_257 : f32 to vector<4x20xf32>
    %1183 = arith.addf %1182, %1181 : vector<4x20xf32>
    %1184 = arith.divf %1182, %1183 : vector<4x20xf32>
    %1185 = vector.extract_strided_slice %1184 {offsets = [0, 0], sizes = [4, 5], strides = [1, 1]} : vector<4x20xf32> to vector<4x5xf32>
    %1186 = vector.extract_strided_slice %1184 {offsets = [0, 5], sizes = [4, 5], strides = [1, 1]} : vector<4x20xf32> to vector<4x5xf32>
    %1187 = vector.extract_strided_slice %1184 {offsets = [0, 10], sizes = [4, 5], strides = [1, 1]} : vector<4x20xf32> to vector<4x5xf32>
    %cst_258 = arith.constant 2.000000e+00 : f32
    %1188 = vector.broadcast %cst_258 : f32 to vector<4x5xf32>
    %1189 = arith.mulf %1188, %1187 : vector<4x5xf32>
    %cst_259 = arith.constant 1.000000e+00 : f32
    %1190 = vector.broadcast %cst_259 : f32 to vector<4x5xf32>
    %1191 = arith.subf %1189, %1190 : vector<4x5xf32>
    %1192 = vector.extract_strided_slice %1184 {offsets = [0, 15], sizes = [4, 5], strides = [1, 1]} : vector<4x20xf32> to vector<4x5xf32>
    %1193 = arith.mulf %1186, %1157 : vector<4x5xf32>
    %1194 = arith.mulf %1185, %1191 : vector<4x5xf32>
    %1195 = arith.addf %1193, %1194 : vector<4x5xf32>
    %1196 = math.tanh %1195 : vector<4x5xf32>
    %1197 = arith.mulf %1192, %1196 : vector<4x5xf32>
    %1198 = arith.mulf %1197, %715 : vector<4x5xf32>
    %1199 = vector.extract_strided_slice %1198 {offsets = [0, 0], sizes = [4, 1], strides = [1, 1]} : vector<4x5xf32> to vector<4x1xf32>
    %1200 = vector.extract_strided_slice %1198 {offsets = [0, 1], sizes = [4, 1], strides = [1, 1]} : vector<4x5xf32> to vector<4x1xf32>
    %1201 = arith.addf %1199, %1200 : vector<4x1xf32>
    %1202 = vector.extract_strided_slice %1198 {offsets = [0, 2], sizes = [4, 1], strides = [1, 1]} : vector<4x5xf32> to vector<4x1xf32>
    %1203 = vector.extract_strided_slice %1198 {offsets = [0, 3], sizes = [4, 1], strides = [1, 1]} : vector<4x5xf32> to vector<4x1xf32>
    %1204 = arith.addf %1202, %1203 : vector<4x1xf32>
    %1205 = vector.extract_strided_slice %1198 {offsets = [0, 4], sizes = [4, 1], strides = [1, 1]} : vector<4x5xf32> to vector<4x1xf32>
    %1206 = arith.addf %1204, %1205 : vector<4x1xf32>
    %1207 = arith.addf %1201, %1206 : vector<4x1xf32>
    %1208 = arith.index_cast %c12_i32_254 : i32 to index
    %c0_260 = arith.constant 0 : index
    %c0_261 = arith.constant 0 : index
    %1209 = vector.load %arg8[%1208, %c0_260, %c0_261] : memref<16x4x1xf32, #tpu.memory_space<vmem>>, vector<1x4x1xf32>
    %1210 = vector.shape_cast %1209 : vector<1x4x1xf32> to vector<4x1xf32>
    %1211 = vector.shape_cast %1207 : vector<4x1xf32> to vector<1x4x1xf32>
    tpu.vector_store %arg8[%1208, %c0_260, %c0_261], %1211 {strides = array<i32>} : memref<16x4x1xf32, #tpu.memory_space<vmem>>, vector<1x4x1xf32>,
    %c13_i32_262 = arith.constant 13 : i32
    %1212 = arith.index_cast %c13_i32_262 : i32 to index
    %c0_263 = arith.constant 0 : index
    %c0_264 = arith.constant 0 : index
    %1213 = vector.load %arg7[%1212, %c0_263, %c0_264] : memref<16x4x20xf32, #tpu.memory_space<vmem>>, vector<1x4x20xf32>
    %1214 = vector.shape_cast %1213 : vector<1x4x20xf32> to vector<4x20xf32>
    %1215 = vector.broadcast %1207 : vector<4x1xf32> to vector<4x20xf32>
    %1216 = arith.mulf %1215, %708 : vector<4x20xf32>
    %1217 = arith.addf %1214, %1216 : vector<4x20xf32>
    %1218 = arith.negf %1217 : vector<4x20xf32>
    %1219 = math.exp %1218 : vector<4x20xf32>
    %cst_265 = arith.constant 1.000000e+00 : f32
    %1220 = vector.broadcast %cst_265 : f32 to vector<4x20xf32>
    %1221 = arith.addf %1220, %1219 : vector<4x20xf32>
    %1222 = arith.divf %1220, %1221 : vector<4x20xf32>
    %1223 = vector.extract_strided_slice %1222 {offsets = [0, 0], sizes = [4, 5], strides = [1, 1]} : vector<4x20xf32> to vector<4x5xf32>
    %1224 = vector.extract_strided_slice %1222 {offsets = [0, 5], sizes = [4, 5], strides = [1, 1]} : vector<4x20xf32> to vector<4x5xf32>
    %1225 = vector.extract_strided_slice %1222 {offsets = [0, 10], sizes = [4, 5], strides = [1, 1]} : vector<4x20xf32> to vector<4x5xf32>
    %cst_266 = arith.constant 2.000000e+00 : f32
    %1226 = vector.broadcast %cst_266 : f32 to vector<4x5xf32>
    %1227 = arith.mulf %1226, %1225 : vector<4x5xf32>
    %cst_267 = arith.constant 1.000000e+00 : f32
    %1228 = vector.broadcast %cst_267 : f32 to vector<4x5xf32>
    %1229 = arith.subf %1227, %1228 : vector<4x5xf32>
    %1230 = vector.extract_strided_slice %1222 {offsets = [0, 15], sizes = [4, 5], strides = [1, 1]} : vector<4x20xf32> to vector<4x5xf32>
    %1231 = arith.mulf %1224, %1195 : vector<4x5xf32>
    %1232 = arith.mulf %1223, %1229 : vector<4x5xf32>
    %1233 = arith.addf %1231, %1232 : vector<4x5xf32>
    %1234 = math.tanh %1233 : vector<4x5xf32>
    %1235 = arith.mulf %1230, %1234 : vector<4x5xf32>
    %1236 = arith.mulf %1235, %715 : vector<4x5xf32>
    %1237 = vector.extract_strided_slice %1236 {offsets = [0, 0], sizes = [4, 1], strides = [1, 1]} : vector<4x5xf32> to vector<4x1xf32>
    %1238 = vector.extract_strided_slice %1236 {offsets = [0, 1], sizes = [4, 1], strides = [1, 1]} : vector<4x5xf32> to vector<4x1xf32>
    %1239 = arith.addf %1237, %1238 : vector<4x1xf32>
    %1240 = vector.extract_strided_slice %1236 {offsets = [0, 2], sizes = [4, 1], strides = [1, 1]} : vector<4x5xf32> to vector<4x1xf32>
    %1241 = vector.extract_strided_slice %1236 {offsets = [0, 3], sizes = [4, 1], strides = [1, 1]} : vector<4x5xf32> to vector<4x1xf32>
    %1242 = arith.addf %1240, %1241 : vector<4x1xf32>
    %1243 = vector.extract_strided_slice %1236 {offsets = [0, 4], sizes = [4, 1], strides = [1, 1]} : vector<4x5xf32> to vector<4x1xf32>
    %1244 = arith.addf %1242, %1243 : vector<4x1xf32>
    %1245 = arith.addf %1239, %1244 : vector<4x1xf32>
    %1246 = arith.index_cast %c13_i32_262 : i32 to index
    %c0_268 = arith.constant 0 : index
    %c0_269 = arith.constant 0 : index
    %1247 = vector.load %arg8[%1246, %c0_268, %c0_269] : memref<16x4x1xf32, #tpu.memory_space<vmem>>, vector<1x4x1xf32>
    %1248 = vector.shape_cast %1247 : vector<1x4x1xf32> to vector<4x1xf32>
    %1249 = vector.shape_cast %1245 : vector<4x1xf32> to vector<1x4x1xf32>
    tpu.vector_store %arg8[%1246, %c0_268, %c0_269], %1249 {strides = array<i32>} : memref<16x4x1xf32, #tpu.memory_space<vmem>>, vector<1x4x1xf32>,
    %c14_i32_270 = arith.constant 14 : i32
    %1250 = arith.index_cast %c14_i32_270 : i32 to index
    %c0_271 = arith.constant 0 : index
    %c0_272 = arith.constant 0 : index
    %1251 = vector.load %arg7[%1250, %c0_271, %c0_272] : memref<16x4x20xf32, #tpu.memory_space<vmem>>, vector<1x4x20xf32>
    %1252 = vector.shape_cast %1251 : vector<1x4x20xf32> to vector<4x20xf32>
    %1253 = vector.broadcast %1245 : vector<4x1xf32> to vector<4x20xf32>
    %1254 = arith.mulf %1253, %708 : vector<4x20xf32>
    %1255 = arith.addf %1252, %1254 : vector<4x20xf32>
    %1256 = arith.negf %1255 : vector<4x20xf32>
    %1257 = math.exp %1256 : vector<4x20xf32>
    %cst_273 = arith.constant 1.000000e+00 : f32
    %1258 = vector.broadcast %cst_273 : f32 to vector<4x20xf32>
    %1259 = arith.addf %1258, %1257 : vector<4x20xf32>
    %1260 = arith.divf %1258, %1259 : vector<4x20xf32>
    %1261 = vector.extract_strided_slice %1260 {offsets = [0, 0], sizes = [4, 5], strides = [1, 1]} : vector<4x20xf32> to vector<4x5xf32>
    %1262 = vector.extract_strided_slice %1260 {offsets = [0, 5], sizes = [4, 5], strides = [1, 1]} : vector<4x20xf32> to vector<4x5xf32>
    %1263 = vector.extract_strided_slice %1260 {offsets = [0, 10], sizes = [4, 5], strides = [1, 1]} : vector<4x20xf32> to vector<4x5xf32>
    %cst_274 = arith.constant 2.000000e+00 : f32
    %1264 = vector.broadcast %cst_274 : f32 to vector<4x5xf32>
    %1265 = arith.mulf %1264, %1263 : vector<4x5xf32>
    %cst_275 = arith.constant 1.000000e+00 : f32
    %1266 = vector.broadcast %cst_275 : f32 to vector<4x5xf32>
    %1267 = arith.subf %1265, %1266 : vector<4x5xf32>
    %1268 = vector.extract_strided_slice %1260 {offsets = [0, 15], sizes = [4, 5], strides = [1, 1]} : vector<4x20xf32> to vector<4x5xf32>
    %1269 = arith.mulf %1262, %1233 : vector<4x5xf32>
    %1270 = arith.mulf %1261, %1267 : vector<4x5xf32>
    %1271 = arith.addf %1269, %1270 : vector<4x5xf32>
    %1272 = math.tanh %1271 : vector<4x5xf32>
    %1273 = arith.mulf %1268, %1272 : vector<4x5xf32>
    %1274 = arith.mulf %1273, %715 : vector<4x5xf32>
    %1275 = vector.extract_strided_slice %1274 {offsets = [0, 0], sizes = [4, 1], strides = [1, 1]} : vector<4x5xf32> to vector<4x1xf32>
    %1276 = vector.extract_strided_slice %1274 {offsets = [0, 1], sizes = [4, 1], strides = [1, 1]} : vector<4x5xf32> to vector<4x1xf32>
    %1277 = arith.addf %1275, %1276 : vector<4x1xf32>
    %1278 = vector.extract_strided_slice %1274 {offsets = [0, 2], sizes = [4, 1], strides = [1, 1]} : vector<4x5xf32> to vector<4x1xf32>
    %1279 = vector.extract_strided_slice %1274 {offsets = [0, 3], sizes = [4, 1], strides = [1, 1]} : vector<4x5xf32> to vector<4x1xf32>
    %1280 = arith.addf %1278, %1279 : vector<4x1xf32>
    %1281 = vector.extract_strided_slice %1274 {offsets = [0, 4], sizes = [4, 1], strides = [1, 1]} : vector<4x5xf32> to vector<4x1xf32>
    %1282 = arith.addf %1280, %1281 : vector<4x1xf32>
    %1283 = arith.addf %1277, %1282 : vector<4x1xf32>
    %1284 = arith.index_cast %c14_i32_270 : i32 to index
    %c0_276 = arith.constant 0 : index
    %c0_277 = arith.constant 0 : index
    %1285 = vector.load %arg8[%1284, %c0_276, %c0_277] : memref<16x4x1xf32, #tpu.memory_space<vmem>>, vector<1x4x1xf32>
    %1286 = vector.shape_cast %1285 : vector<1x4x1xf32> to vector<4x1xf32>
    %1287 = vector.shape_cast %1283 : vector<4x1xf32> to vector<1x4x1xf32>
    tpu.vector_store %arg8[%1284, %c0_276, %c0_277], %1287 {strides = array<i32>} : memref<16x4x1xf32, #tpu.memory_space<vmem>>, vector<1x4x1xf32>,
    %c15_i32_278 = arith.constant 15 : i32
    %1288 = arith.index_cast %c15_i32_278 : i32 to index
    %c0_279 = arith.constant 0 : index
    %c0_280 = arith.constant 0 : index
    %1289 = vector.load %arg7[%1288, %c0_279, %c0_280] : memref<16x4x20xf32, #tpu.memory_space<vmem>>, vector<1x4x20xf32>
    %1290 = vector.shape_cast %1289 : vector<1x4x20xf32> to vector<4x20xf32>
    %1291 = vector.broadcast %1283 : vector<4x1xf32> to vector<4x20xf32>
    %1292 = arith.mulf %1291, %708 : vector<4x20xf32>
    %1293 = arith.addf %1290, %1292 : vector<4x20xf32>
    %1294 = arith.negf %1293 : vector<4x20xf32>
    %1295 = math.exp %1294 : vector<4x20xf32>
    %cst_281 = arith.constant 1.000000e+00 : f32
    %1296 = vector.broadcast %cst_281 : f32 to vector<4x20xf32>
    %1297 = arith.addf %1296, %1295 : vector<4x20xf32>
    %1298 = arith.divf %1296, %1297 : vector<4x20xf32>
    %1299 = vector.extract_strided_slice %1298 {offsets = [0, 0], sizes = [4, 5], strides = [1, 1]} : vector<4x20xf32> to vector<4x5xf32>
    %1300 = vector.extract_strided_slice %1298 {offsets = [0, 5], sizes = [4, 5], strides = [1, 1]} : vector<4x20xf32> to vector<4x5xf32>
    %1301 = vector.extract_strided_slice %1298 {offsets = [0, 10], sizes = [4, 5], strides = [1, 1]} : vector<4x20xf32> to vector<4x5xf32>
    %cst_282 = arith.constant 2.000000e+00 : f32
    %1302 = vector.broadcast %cst_282 : f32 to vector<4x5xf32>
    %1303 = arith.mulf %1302, %1301 : vector<4x5xf32>
    %cst_283 = arith.constant 1.000000e+00 : f32
    %1304 = vector.broadcast %cst_283 : f32 to vector<4x5xf32>
    %1305 = arith.subf %1303, %1304 : vector<4x5xf32>
    %1306 = vector.extract_strided_slice %1298 {offsets = [0, 15], sizes = [4, 5], strides = [1, 1]} : vector<4x20xf32> to vector<4x5xf32>
    %1307 = arith.mulf %1300, %1271 : vector<4x5xf32>
    %1308 = arith.mulf %1299, %1305 : vector<4x5xf32>
    %1309 = arith.addf %1307, %1308 : vector<4x5xf32>
    %1310 = math.tanh %1309 : vector<4x5xf32>
    %1311 = arith.mulf %1306, %1310 : vector<4x5xf32>
    %1312 = arith.mulf %1311, %715 : vector<4x5xf32>
    %1313 = vector.extract_strided_slice %1312 {offsets = [0, 0], sizes = [4, 1], strides = [1, 1]} : vector<4x5xf32> to vector<4x1xf32>
    %1314 = vector.extract_strided_slice %1312 {offsets = [0, 1], sizes = [4, 1], strides = [1, 1]} : vector<4x5xf32> to vector<4x1xf32>
    %1315 = arith.addf %1313, %1314 : vector<4x1xf32>
    %1316 = vector.extract_strided_slice %1312 {offsets = [0, 2], sizes = [4, 1], strides = [1, 1]} : vector<4x5xf32> to vector<4x1xf32>
    %1317 = vector.extract_strided_slice %1312 {offsets = [0, 3], sizes = [4, 1], strides = [1, 1]} : vector<4x5xf32> to vector<4x1xf32>
    %1318 = arith.addf %1316, %1317 : vector<4x1xf32>
    %1319 = vector.extract_strided_slice %1312 {offsets = [0, 4], sizes = [4, 1], strides = [1, 1]} : vector<4x5xf32> to vector<4x1xf32>
    %1320 = arith.addf %1318, %1319 : vector<4x1xf32>
    %1321 = arith.addf %1315, %1320 : vector<4x1xf32>
    %1322 = arith.index_cast %c15_i32_278 : i32 to index
    %c0_284 = arith.constant 0 : index
    %c0_285 = arith.constant 0 : index
    %1323 = vector.load %arg8[%1322, %c0_284, %c0_285] : memref<16x4x1xf32, #tpu.memory_space<vmem>>, vector<1x4x1xf32>
    %1324 = vector.shape_cast %1323 : vector<1x4x1xf32> to vector<4x1xf32>
    %1325 = vector.shape_cast %1321 : vector<4x1xf32> to vector<1x4x1xf32>
    tpu.vector_store %arg8[%1322, %c0_284, %c0_285], %1325 {strides = array<i32>} : memref<16x4x1xf32, #tpu.memory_space<vmem>>, vector<1x4x1xf32>,
    %c16_i32_286 = arith.constant 16 : i32
    %c0_287 = arith.constant 0 : index
    %c0_288 = arith.constant 0 : index
    %c0_289 = arith.constant 0 : index
    %1326 = vector.load %arg8[%c0_287, %c0_288, %c0_289] : memref<16x4x1xf32, #tpu.memory_space<vmem>>, vector<16x4x1xf32>
    %1327 = vector.extract_strided_slice %1326 {offsets = [15, 0, 0], sizes = [1, 4, 1], strides = [1, 1, 1]} : vector<16x4x1xf32> to vector<1x4x1xf32>
    %1328 = vector.extract_strided_slice %1326 {offsets = [14, 0, 0], sizes = [1, 4, 1], strides = [1, 1, 1]} : vector<16x4x1xf32> to vector<1x4x1xf32>
    %1329 = vector.extract_strided_slice %1326 {offsets = [13, 0, 0], sizes = [1, 4, 1], strides = [1, 1, 1]} : vector<16x4x1xf32> to vector<1x4x1xf32>
    %1330 = vector.extract_strided_slice %1326 {offsets = [12, 0, 0], sizes = [1, 4, 1], strides = [1, 1, 1]} : vector<16x4x1xf32> to vector<1x4x1xf32>
    %1331 = vector.extract_strided_slice %1326 {offsets = [11, 0, 0], sizes = [1, 4, 1], strides = [1, 1, 1]} : vector<16x4x1xf32> to vector<1x4x1xf32>
    %1332 = vector.extract_strided_slice %1326 {offsets = [10, 0, 0], sizes = [1, 4, 1], strides = [1, 1, 1]} : vector<16x4x1xf32> to vector<1x4x1xf32>
    %1333 = vector.extract_strided_slice %1326 {offsets = [9, 0, 0], sizes = [1, 4, 1], strides = [1, 1, 1]} : vector<16x4x1xf32> to vector<1x4x1xf32>
    %1334 = vector.extract_strided_slice %1326 {offsets = [8, 0, 0], sizes = [1, 4, 1], strides = [1, 1, 1]} : vector<16x4x1xf32> to vector<1x4x1xf32>
    %1335 = vector.extract_strided_slice %1326 {offsets = [7, 0, 0], sizes = [1, 4, 1], strides = [1, 1, 1]} : vector<16x4x1xf32> to vector<1x4x1xf32>
    %1336 = vector.extract_strided_slice %1326 {offsets = [6, 0, 0], sizes = [1, 4, 1], strides = [1, 1, 1]} : vector<16x4x1xf32> to vector<1x4x1xf32>
    %1337 = vector.extract_strided_slice %1326 {offsets = [5, 0, 0], sizes = [1, 4, 1], strides = [1, 1, 1]} : vector<16x4x1xf32> to vector<1x4x1xf32>
    %1338 = vector.extract_strided_slice %1326 {offsets = [4, 0, 0], sizes = [1, 4, 1], strides = [1, 1, 1]} : vector<16x4x1xf32> to vector<1x4x1xf32>
    %1339 = vector.extract_strided_slice %1326 {offsets = [3, 0, 0], sizes = [1, 4, 1], strides = [1, 1, 1]} : vector<16x4x1xf32> to vector<1x4x1xf32>
    %1340 = vector.extract_strided_slice %1326 {offsets = [2, 0, 0], sizes = [1, 4, 1], strides = [1, 1, 1]} : vector<16x4x1xf32> to vector<1x4x1xf32>
    %1341 = vector.extract_strided_slice %1326 {offsets = [1, 0, 0], sizes = [1, 4, 1], strides = [1, 1, 1]} : vector<16x4x1xf32> to vector<1x4x1xf32>
    %1342 = vector.extract_strided_slice %1326 {offsets = [0, 0, 0], sizes = [1, 4, 1], strides = [1, 1, 1]} : vector<16x4x1xf32> to vector<1x4x1xf32>
    %1343 = tpu.concatenate %1327, %1328, %1329, %1330, %1331, %1332, %1333, %1334, %1335, %1336, %1337, %1338, %1339, %1340, %1341, %1342 in 0 : vector<1x4x1xf32>, vector<1x4x1xf32>, vector<1x4x1xf32>, vector<1x4x1xf32>, vector<1x4x1xf32>, vector<1x4x1xf32>, vector<1x4x1xf32>, vector<1x4x1xf32>, vector<1x4x1xf32>, vector<1x4x1xf32>, vector<1x4x1xf32>, vector<1x4x1xf32>, vector<1x4x1xf32>, vector<1x4x1xf32>, vector<1x4x1xf32>, vector<1x4x1xf32> -> vector<16x4x1xf32>
    %1344 = vector.extract_strided_slice %1326 {offsets = [0, 0, 0], sizes = [16, 2, 1], strides = [1, 1, 1]} : vector<16x4x1xf32> to vector<16x2x1xf32>
    %1345 = vector.extract_strided_slice %1343 {offsets = [0, 2, 0], sizes = [16, 2, 1], strides = [1, 1, 1]} : vector<16x4x1xf32> to vector<16x2x1xf32>
    %1346 = arith.addf %1344, %1345 : vector<16x2x1xf32>
    %cst_290 = arith.constant dense<0.000000e+00> : vector<16x2xf32>
    %1347 = vector.multi_reduction <add>, %1346, %cst_290 [2] : vector<16x2x1xf32> to vector<16x2xf32>
    %cst_291 = arith.constant 2.000000e+00 : f32
    %1348 = vector.broadcast %cst_291 : f32 to vector<16x2xf32>
    %1349 = arith.mulf %1348, %1347 : vector<16x2xf32>
    %cst_292 = arith.constant 1.000000e+00 : f32
    %1350 = vector.broadcast %cst_292 : f32 to vector<16x2xf32>
    %1351 = arith.subf %1349, %1350 : vector<16x2xf32>
    %1352 = arith.negf %1351 : vector<16x2xf32>
    %1353 = math.exp %1352 : vector<16x2xf32>
    %cst_293 = arith.constant 1.000000e+00 : f32
    %1354 = vector.broadcast %cst_293 : f32 to vector<16x2xf32>
    %1355 = arith.addf %1354, %1353 : vector<16x2xf32>
    %1356 = arith.divf %1354, %1355 : vector<16x2xf32>
    %c0_294 = arith.constant 0 : index
    %c0_295 = arith.constant 0 : index
    %c0_296 = arith.constant 0 : index
    %1357 = vector.load %arg6[%c0_294, %c0_295, %c0_296] : memref<2x16x2xf32, #tpu.memory_space<vmem>>, vector<1x16x2xf32>
    %1358 = vector.shape_cast %1357 : vector<1x16x2xf32> to vector<16x2xf32>
    %1359 = vector.shape_cast %1356 : vector<16x2xf32> to vector<1x16x2xf32>
    tpu.vector_store %arg6[%c0_294, %c0_295, %c0_296], %1359 {strides = array<i32>} : memref<2x16x2xf32, #tpu.memory_space<vmem>>, vector<1x16x2xf32>,
    %cst_297 = arith.constant 1.000000e+00 : f32
    %1360 = vector.broadcast %cst_297 : f32 to vector<16x2xf32>
    %1361 = arith.subf %1360, %1356 : vector<16x2xf32>
    %c1_298 = arith.constant 1 : index
    %c0_299 = arith.constant 0 : index
    %c0_300 = arith.constant 0 : index
    %1362 = vector.load %arg6[%c1_298, %c0_299, %c0_300] : memref<2x16x2xf32, #tpu.memory_space<vmem>>, vector<1x16x2xf32>
    %1363 = vector.shape_cast %1362 : vector<1x16x2xf32> to vector<16x2xf32>
    %1364 = vector.shape_cast %1361 : vector<16x2xf32> to vector<1x16x2xf32>
    tpu.vector_store %arg6[%c1_298, %c0_299, %c0_300], %1364 {strides = array<i32>} : memref<2x16x2xf32, #tpu.memory_space<vmem>>, vector<1x16x2xf32>,
    return
  }
}

</mosaic_0001>

<bundles_post_ra>
// kernel: tpu_custom_call.1
= control target key start
LH: loop header
LB: loop body
LE: loop exit
PB: predicated region body
PF: predicated region fallthrough
CT: control target
= control target key end

     0   :  { %v25_v0 = vlaneseq  ;;  %vm147_vm0 = vcmask 1041408   ;;  %vm192_vm1 = vcmask 158720   ;;  %s3331_s10 = smov 118   ;;  %s3332_s11 = smov 5   ;;  %v3337_v39 = vmov 15   ;;  %s4360_s0 = inlined_call_operand.vmem [shape: f32[16,4], index: 0, kind: input, shape index: {}]   ;;  %s4361_s1 = inlined_call_operand.vmem [shape: f32[2,20], index: 1, kind: input, shape index: {}]   ;;  %s4362_s3 = inlined_call_operand.vmem [shape: f32[4,20], index: 3, kind: input, shape index: {}]   ;;  %s4363_s4 = inlined_call_operand.vmem [shape: f32[4,20], index: 4, kind: input, shape index: {}]   ;;  %s4364_s5 = inlined_call_operand.vmem [shape: f32[4,5], index: 5, kind: input, shape index: {}]   ;;  %s4365_s2 = inlined_call_operand.vmem [shape: f32[4,20], index: 2, kind: input, shape index: {}]   ;;  %s4366_s6 = inlined_call_operand.vmem [shape: f32[2,16,2], index: 6, kind: output, shape index: {}]  }
   0x1   :  { %v3381_v2 = vld [vmem:[%s4360_s0] sm:$0xff]  ;;  %s3333_s16 = smov 15   ;;  %s3334_s17 = smov 10   ;;  %3050 = vset.pattern.permute.xlu1 %v3337_v39  ;;  %vm282_vm2 = vcmask 3072   ;;  %vm2732_vm3 = vcmask 1041409   ;;  %vm2734_vm4 = vcmask 1042434  }
   0x2   :  { %v3376_v1 = vshrl.u32 %v25_v0, 7  ;;  %v2927_v5 = vld [vmem:[%s4361_s1] ss:$0 sm:$0xff]  ;;  %v2928_v6 = vld [vmem:[%s4361_s1 + $0x1] ss:$0 sm:$0xff]  ;;  %s3335_s18 = smov 126  }
   0x3   :  { %v2925_v7 = vld [vmem:[%s4362_s3] ss:$0 sm:$0xff]  ;;  %v2926_v8 = vld [vmem:[%s4362_s3 + $0x1] ss:$0 sm:$0xff]  ;;  %v3400_v9 = vsel %vm147_vm0, %v2927_v5, %v2928_v6  ;;  %s3336_s19 = smov 127   ;;  %vm2736_vm5 = vcmask 1043459  }
   0x4   :  { %v27_v3 = vsub.s32 0, %v3376_v1  ;;  %v3403_v10 = vsel %vm147_vm0, %v2925_v7, %v2926_v8  ;;  %v2929_v13 = vld [vmem:[%s4363_s4] ss:$0 sm:$0xff]  ;;  %v2930_v14 = vld [vmem:[%s4363_s4 + $0x1] ss:$0 sm:$0xff]  ;;  %v34_v40 = vsub.s32 1, %v3376_v1 }
   0x5   :  { %v3415_v16 = vsel %vm147_vm0, %v2929_v13, %v2930_v14  ;;  %v2931_v28 = vld [vmem:[%s4364_s5] ss:$0 sm:$0xff]  ;;  %v2932_v29 = vld [vmem:[%s4364_s5 + $0x1] ss:$0 sm:$0xff]  ;;  %vm2738_vm6 = vcmask 1044484   ;;  %vm2740_vm7 = vcmask 1045509  }
   0x6   :  { %v28_v4 = vrot.slane %v3381_v2, %v27_v3  ;;  %v232_v17 = vmul.f32 0.0, %v3415_v16  ;;  %v230_v30 = vsel %vm147_vm0, %v2931_v28, %v2932_v29  ;;  %v35_v41 = vrot.slane %v3381_v2, %v34_v40 }
   0x7   :  { %vm2742_vm8 = vcmask 1046534   ;;  %vm2744_vm9 = vcmask 1047559   ;;  %vm2755_vm10 = vcmask 15360  }
   0x8   :  { %30 = vbcast.lane.b32.xlu0 %v28_v4, 256 }
  0x7a   :  { %v31_v11 = vpop.permute.xlu0 %30 }
  0x7b   :  { %v160_v12 = vmul.f32 %v3400_v9, %v31_v11 }
  0x7d   :  { %v176_v15 = vadd.f32 %v160_v12, %v3403_v10  ;;  %v41_v12 = vsub.s32 2, %v3376_v1 }
  0x7f   :  { %193 = vst.msk [vmem:[#allocation2] sm:$0xf] %vm192_vm1, %v176_v15  ;;  %v42_v13 = vrot.slane %v3381_v2, %v41_v12 }
  0x86   :  { %v231_v18 = vld [vmem:[#allocation2] sm:$0xf] }
  0x87   :  { %v233_v19 = vadd.f32 %v232_v17, %v231_v18 }
  0x89   :  { %v2933_v20 = vmul.f32 -1.442695, %v233_v19 }
  0x8b   :  { %3069 = vpow2.f32 %v2933_v20 }
  0x95   :  { %v3070_v21 = vpop.eup %3069 }
  0x96   :  { %v237_v22 = vadd.f32 1.0, %v3070_v21 }
  0x98   :  { %3071 = vrcp.f32 %v237_v22 }
  0xa2   :  { %v3072_v23 = vpop.eup %3071 }
  0xa3   :  { %v240_v24 = vmul.f32 2.0, %v3072_v23  ;;  %v242_v31 = vmul.f32 0.0, %v3072_v23 }
  0xa5   :  { %v2934_v25 = vadd.f32 -1.0, %v240_v24 }
  0xa7   :  { %244 = vrot.lane.b32.xlu0 %v2934_v25, %s3331_s10 }
  0xab   :  { %260 = vrot.lane.b32.xlu0 %v230_v30, %s3333_s16 }
 0x119   :  { %v245_v26 = vpop.permute.xlu0 %244 }
 0x11a   :  { %v247_v27 = vmul.f32 %v3072_v23, %v245_v26 }
 0x11c   :  { %249 = vrot.lane.b32.xlu1 %v247_v27, %s3332_s11 }
 0x11d   :  { %v3429_v36 = vpop.permute.xlu0 %260 }
 0x18e   :  { %v250_v32 = vpop.permute.xlu1 %249 }
 0x18f   :  { %v252_v33 = vadd.f32 %v250_v32, %v242_v31 }
 0x191   :  { %3073 = vtanh.f32 %v252_v33 }
 0x19b   :  { %v3074_v34 = vpop.eup %3073 }
 0x19c   :  { %255 = vrot.lane.b32.xlu1 %v3074_v34, %s3334_s17 }
 0x20e   :  { %v256_v35 = vpop.permute.xlu1 %255 }
 0x20f   :  { %v258_v37 = vmul.f32 %v3072_v23, %v256_v35 }
 0x211   :  { %v263_v38 = vmul.f32 %v3429_v36, %v258_v37 }
 0x213   :  { %269 = vrot.lane.b32.xlu0 %v263_v38, %s3335_s18  ;;  %265 = vrot.lane.b32.xlu1 %v263_v38, %s3336_s19 }
 0x217   :  { %37 = vbcast.lane.b32.xlu0 %v35_v41, 256 }
 0x285   :  { %v266_v42 = vpop.permute.xlu1 %265  ;;  %v270_v44 = vpop.permute.xlu0 %269 }
 0x286   :  { %v268_v43 = vadd.f32 %v266_v42, %v263_v38 }
 0x288   :  { %v272_v45 = vadd.f32 %v270_v44, %v268_v43 }
 0x289   :  { %v38_v46 = vpop.permute.xlu0 %37 }
 0x28a   :  { %274 = vrot.lane.b32.xlu1 %v272_v45, %s3335_s18  ;;  %v161_v47 = vmul.f32 %v3400_v9, %v38_v46  ;;  %v48_v46 = vsub.s32 3, %v3376_v1 }
 0x28c   :  { %v177_v48 = vadd.f32 %v161_v47, %v3403_v10  ;;  %v49_v47 = vrot.slane %v3381_v2, %v48_v46 }
 0x28e   :  { %194 = vst.msk [vmem:[#allocation2 + $0x4] sm:$0xf] %vm192_vm1, %v177_v48 }
 0x295   :  { %v285_v51 = vld [vmem:[#allocation2 + $0x4] sm:$0xf] }
 0x2fc   :  { %v275_v49 = vpop.permute.xlu1 %274 }
 0x2fd   :  { %v3443_v50 = vadd.f32 %v275_v49, %v268_v43 }
 0x2ff   :  { %287 = vperm.xlu1 %3050, %v3443_v50  }
 0x37e   :  { %v288_v52 = vpop.permute.xlu1 %287 }
 0x37f   :  { %v290_v53 = vmul.f32 %v288_v52, %v3415_v16 }
 0x381   :  { %v291_v54 = vadd.f32 %v290_v53, %v285_v51 }
 0x383   :  { %v2935_v55 = vmul.f32 -1.442695, %v291_v54 }
 0x385   :  { %3075 = vpow2.f32 %v2935_v55 }
 0x38f   :  { %v3076_v56 = vpop.eup %3075 }
 0x390   :  { %v295_v57 = vadd.f32 1.0, %v3076_v56 }
 0x392   :  { %3077 = vrcp.f32 %v295_v57 }
 0x39c   :  { %v3078_v58 = vpop.eup %3077 }
 0x39d   :  { %v298_v59 = vmul.f32 2.0, %v3078_v58  ;;  %v300_v63 = vmul.f32 %v3078_v58, %v252_v33 }
 0x39f   :  { %v2936_v60 = vadd.f32 -1.0, %v298_v59 }
 0x3a1   :  { %302 = vrot.lane.b32.xlu0 %v2936_v60, %s3331_s10 }
 0x413   :  { %v303_v61 = vpop.permute.xlu0 %302 }
 0x414   :  { %v305_v62 = vmul.f32 %v3078_v58, %v303_v61 }
 0x416   :  { %307 = vrot.lane.b32.xlu1 %v305_v62, %s3332_s11 }
 0x488   :  { %v308_v4 = vpop.permute.xlu1 %307 }
 0x489   :  { %v310_v5 = vadd.f32 %v308_v4, %v300_v63 }
 0x48b   :  { %3079 = vtanh.f32 %v310_v5 }
 0x495   :  { %v3080_v6 = vpop.eup %3079 }
 0x496   :  { %313 = vrot.lane.b32.xlu0 %v3080_v6, %s3334_s17 }
 0x508   :  { %v314_v7 = vpop.permute.xlu0 %313 }
 0x509   :  { %v316_v8 = vmul.f32 %v3078_v58, %v314_v7 }
 0x50b   :  { %v317_v11 = vmul.f32 %v316_v8, %v3429_v36 }
 0x50d   :  { %323 = vrot.lane.b32.xlu0 %v317_v11, %s3335_s18  ;;  %319 = vrot.lane.b32.xlu1 %v317_v11, %s3336_s19 }
 0x511   :  { %44 = vbcast.lane.b32.xlu0 %v42_v13, 256 }
 0x57f   :  { %v320_v14 = vpop.permute.xlu1 %319  ;;  %v324_v17 = vpop.permute.xlu0 %323 }
 0x580   :  { %v322_v15 = vadd.f32 %v320_v14, %v317_v11 }
 0x582   :  { %v326_v18 = vadd.f32 %v324_v17, %v322_v15 }
 0x583   :  { %v45_v19 = vpop.permute.xlu0 %44 }
 0x584   :  { %328 = vrot.lane.b32.xlu1 %v326_v18, %s3335_s18  ;;  %v162_v20 = vmul.f32 %v3400_v9, %v45_v19 }
 0x586   :  { %v178_v21 = vadd.f32 %v162_v20, %v3403_v10 }
 0x588   :  { %195 = vst.msk [vmem:[#allocation2 + $0x8] sm:$0xf] %vm192_vm1, %v178_v21  ;;  %v55_v21 = vsub.s32 4, %v3376_v1 }
 0x58f   :  { %v339_v24 = vld [vmem:[#allocation2 + $0x8] sm:$0xf] }
 0x5f6   :  { %v329_v22 = vpop.permute.xlu1 %328 }
 0x5f7   :  { %v3461_v23 = vadd.f32 %v329_v22, %v322_v15  ;;  %v56_v22 = vrot.slane %v3381_v2, %v55_v21 }
 0x5f9   :  { %341 = vperm.xlu1 %3050, %v3461_v23  }
 0x678   :  { %v342_v25 = vpop.permute.xlu1 %341 }
 0x679   :  { %v344_v26 = vmul.f32 %v342_v25, %v3415_v16 }
 0x67b   :  { %v345_v27 = vadd.f32 %v344_v26, %v339_v24 }
 0x67d   :  { %v2937_v28 = vmul.f32 -1.442695, %v345_v27 }
 0x67f   :  { %3081 = vpow2.f32 %v2937_v28 }
 0x689   :  { %v3082_v29 = vpop.eup %3081 }
 0x68a   :  { %v349_v30 = vadd.f32 1.0, %v3082_v29 }
 0x68c   :  { %3083 = vrcp.f32 %v349_v30 }
 0x696   :  { %v3084_v31 = vpop.eup %3083 }
 0x697   :  { %v352_v32 = vmul.f32 2.0, %v3084_v31  ;;  %v354_v37 = vmul.f32 %v3084_v31, %v310_v5 }
 0x699   :  { %v2938_v33 = vadd.f32 -1.0, %v352_v32 }
 0x69b   :  { %356 = vrot.lane.b32.xlu0 %v2938_v33, %s3331_s10 }
 0x70d   :  { %v357_v34 = vpop.permute.xlu0 %356 }
 0x70e   :  { %v359_v35 = vmul.f32 %v3084_v31, %v357_v34 }
 0x710   :  { %361 = vrot.lane.b32.xlu1 %v359_v35, %s3332_s11 }
 0x782   :  { %v362_v38 = vpop.permute.xlu1 %361 }
 0x783   :  { %v364_v41 = vadd.f32 %v362_v38, %v354_v37 }
 0x785   :  { %3085 = vtanh.f32 %v364_v41 }
 0x78f   :  { %v3086_v42 = vpop.eup %3085 }
 0x790   :  { %367 = vrot.lane.b32.xlu0 %v3086_v42, %s3334_s17 }
 0x802   :  { %v368_v43 = vpop.permute.xlu0 %367 }
 0x803   :  { %v370_v44 = vmul.f32 %v3084_v31, %v368_v43 }
 0x805   :  { %v371_v45 = vmul.f32 %v370_v44, %v3429_v36 }
 0x807   :  { %377 = vrot.lane.b32.xlu0 %v371_v45, %s3335_s18  ;;  %373 = vrot.lane.b32.xlu1 %v371_v45, %s3336_s19 }
 0x80b   :  { %51 = vbcast.lane.b32.xlu0 %v49_v47, 256 }
 0x879   :  { %v374_v48 = vpop.permute.xlu1 %373  ;;  %v378_v51 = vpop.permute.xlu0 %377 }
 0x87a   :  { %v376_v49 = vadd.f32 %v374_v48, %v371_v45 }
 0x87c   :  { %v380_v52 = vadd.f32 %v378_v51, %v376_v49 }
 0x87d   :  { %v52_v53 = vpop.permute.xlu0 %51 }
 0x87e   :  { %382 = vrot.lane.b32.xlu1 %v380_v52, %s3335_s18  ;;  %v163_v54 = vmul.f32 %v3400_v9, %v52_v53 }
 0x880   :  { %v179_v55 = vadd.f32 %v163_v54, %v3403_v10 }
 0x882   :  { %196 = vst.msk [vmem:[#allocation2 + $0xc] sm:$0xf] %vm192_vm1, %v179_v55 }
 0x889   :  { %v393_v58 = vld [vmem:[#allocation2 + $0xc] sm:$0xf] }
 0x8f0   :  { %v383_v56 = vpop.permute.xlu1 %382 }
 0x8f1   :  { %v3479_v57 = vadd.f32 %v383_v56, %v376_v49 }
 0x8f3   :  { %395 = vperm.xlu1 %3050, %v3479_v57  }
 0x972   :  { %v396_v59 = vpop.permute.xlu1 %395 }
 0x973   :  { %v398_v60 = vmul.f32 %v396_v59, %v3415_v16 }
 0x975   :  { %v399_v61 = vadd.f32 %v398_v60, %v393_v58  ;;  %v62_v58 = vsub.s32 5, %v3376_v1 }
 0x977   :  { %v2939_v62 = vmul.f32 -1.442695, %v399_v61  ;;  %v63_v59 = vrot.slane %v3381_v2, %v62_v58 }
 0x979   :  { %3087 = vpow2.f32 %v2939_v62 }
 0x983   :  { %v3088_v63 = vpop.eup %3087 }
 0x984   :  { %v403_v4 = vadd.f32 1.0, %v3088_v63 }
 0x986   :  { %3089 = vrcp.f32 %v403_v4 }
 0x990   :  { %v3090_v5 = vpop.eup %3089 }
 0x991   :  { %v406_v6 = vmul.f32 2.0, %v3090_v5  ;;  %v408_v13 = vmul.f32 %v3090_v5, %v364_v41 }
 0x993   :  { %v2940_v7 = vadd.f32 -1.0, %v406_v6 }
 0x995   :  { %410 = vrot.lane.b32.xlu0 %v2940_v7, %s3331_s10 }
 0xa07   :  { %v411_v8 = vpop.permute.xlu0 %410 }
 0xa08   :  { %v413_v11 = vmul.f32 %v3090_v5, %v411_v8 }
 0xa0a   :  { %415 = vrot.lane.b32.xlu1 %v413_v11, %s3332_s11 }
 0xa7c   :  { %v416_v14 = vpop.permute.xlu1 %415 }
 0xa7d   :  { %v418_v15 = vadd.f32 %v416_v14, %v408_v13 }
 0xa7f   :  { %3091 = vtanh.f32 %v418_v15 }
 0xa89   :  { %v3092_v17 = vpop.eup %3091 }
 0xa8a   :  { %421 = vrot.lane.b32.xlu0 %v3092_v17, %s3334_s17 }
 0xafc   :  { %v422_v18 = vpop.permute.xlu0 %421 }
 0xafd   :  { %v424_v19 = vmul.f32 %v3090_v5, %v422_v18 }
 0xaff   :  { %v425_v20 = vmul.f32 %v424_v19, %v3429_v36 }
 0xb01   :  { %431 = vrot.lane.b32.xlu0 %v425_v20, %s3335_s18  ;;  %427 = vrot.lane.b32.xlu1 %v425_v20, %s3336_s19 }
 0xb05   :  { %58 = vbcast.lane.b32.xlu0 %v56_v22, 256 }
 0xb73   :  { %v428_v24 = vpop.permute.xlu1 %427  ;;  %v432_v26 = vpop.permute.xlu0 %431 }
 0xb74   :  { %v430_v25 = vadd.f32 %v428_v24, %v425_v20 }
 0xb76   :  { %v434_v27 = vadd.f32 %v432_v26, %v430_v25 }
 0xb77   :  { %v59_v28 = vpop.permute.xlu0 %58 }
 0xb78   :  { %436 = vrot.lane.b32.xlu1 %v434_v27, %s3335_s18  ;;  %v164_v29 = vmul.f32 %v3400_v9, %v59_v28 }
 0xb7a   :  { %v180_v30 = vadd.f32 %v164_v29, %v3403_v10 }
 0xb7c   :  { %197 = vst.msk [vmem:[#allocation2 + $0x10] sm:$0xf] %vm192_vm1, %v180_v30 }
 0xb83   :  { %v447_v33 = vld [vmem:[#allocation2 + $0x10] sm:$0xf] }
 0xbea   :  { %v437_v31 = vpop.permute.xlu1 %436 }
 0xbeb   :  { %v3497_v32 = vadd.f32 %v437_v31, %v430_v25 }
 0xbed   :  { %449 = vperm.xlu1 %3050, %v3497_v32  }
 0xc6c   :  { %v450_v34 = vpop.permute.xlu1 %449 }
 0xc6d   :  { %v452_v35 = vmul.f32 %v450_v34, %v3415_v16 }
 0xc6f   :  { %v453_v37 = vadd.f32 %v452_v35, %v447_v33  ;;  %v69_v35 = vsub.s32 6, %v3376_v1 }
 0xc71   :  { %v2941_v38 = vmul.f32 -1.442695, %v453_v37  ;;  %v70_v37 = vrot.slane %v3381_v2, %v69_v35 }
 0xc73   :  { %3093 = vpow2.f32 %v2941_v38 }
 0xc7d   :  { %v3094_v41 = vpop.eup %3093 }
 0xc7e   :  { %v457_v42 = vadd.f32 1.0, %v3094_v41 }
 0xc80   :  { %3095 = vrcp.f32 %v457_v42 }
 0xc8a   :  { %v3096_v43 = vpop.eup %3095 }
 0xc8b   :  { %v460_v44 = vmul.f32 2.0, %v3096_v43  ;;  %v462_v49 = vmul.f32 %v3096_v43, %v418_v15 }
 0xc8d   :  { %v2942_v45 = vadd.f32 -1.0, %v460_v44 }
 0xc8f   :  { %464 = vrot.lane.b32.xlu0 %v2942_v45, %s3331_s10 }
 0xd01   :  { %v465_v47 = vpop.permute.xlu0 %464 }
 0xd02   :  { %v467_v48 = vmul.f32 %v3096_v43, %v465_v47 }
 0xd04   :  { %469 = vrot.lane.b32.xlu1 %v467_v48, %s3332_s11 }
 0xd76   :  { %v470_v51 = vpop.permute.xlu1 %469 }
 0xd77   :  { %v472_v52 = vadd.f32 %v470_v51, %v462_v49 }
 0xd79   :  { %3097 = vtanh.f32 %v472_v52 }
 0xd83   :  { %v3098_v53 = vpop.eup %3097 }
 0xd84   :  { %475 = vrot.lane.b32.xlu0 %v3098_v53, %s3334_s17 }
 0xdf6   :  { %v476_v54 = vpop.permute.xlu0 %475 }
 0xdf7   :  { %v478_v55 = vmul.f32 %v3096_v43, %v476_v54 }
 0xdf9   :  { %v479_v56 = vmul.f32 %v478_v55, %v3429_v36 }
 0xdfb   :  { %485 = vrot.lane.b32.xlu0 %v479_v56, %s3335_s18  ;;  %481 = vrot.lane.b32.xlu1 %v479_v56, %s3336_s19 }
 0xdff   :  { %65 = vbcast.lane.b32.xlu0 %v63_v59, 256 }
 0xe6d   :  { %v482_v60 = vpop.permute.xlu1 %481  ;;  %v486_v62 = vpop.permute.xlu0 %485 }
 0xe6e   :  { %v484_v61 = vadd.f32 %v482_v60, %v479_v56 }
 0xe70   :  { %v488_v63 = vadd.f32 %v486_v62, %v484_v61 }
 0xe71   :  { %v66_v4 = vpop.permute.xlu0 %65 }
 0xe72   :  { %490 = vrot.lane.b32.xlu1 %v488_v63, %s3335_s18  ;;  %v165_v5 = vmul.f32 %v3400_v9, %v66_v4 }
 0xe74   :  { %v181_v6 = vadd.f32 %v165_v5, %v3403_v10 }
 0xe76   :  { %198 = vst.msk [vmem:[#allocation2 + $0x14] sm:$0xf] %vm192_vm1, %v181_v6 }
 0xe7d   :  { %v501_v11 = vld [vmem:[#allocation2 + $0x14] sm:$0xf] }
 0xee4   :  { %v491_v7 = vpop.permute.xlu1 %490 }
 0xee5   :  { %v3515_v8 = vadd.f32 %v491_v7, %v484_v61 }
 0xee7   :  { %503 = vperm.xlu1 %3050, %v3515_v8  }
 0xf66   :  { %v504_v13 = vpop.permute.xlu1 %503 }
 0xf67   :  { %v506_v14 = vmul.f32 %v504_v13, %v3415_v16 }
 0xf69   :  { %v507_v15 = vadd.f32 %v506_v14, %v501_v11 }
 0xf6b   :  { %v2943_v17 = vmul.f32 -1.442695, %v507_v15 }
 0xf6d   :  { %3099 = vpow2.f32 %v2943_v17  ;;  %v76_v17 = vsub.s32 7, %v3376_v1 }
 0xf77   :  { %v3100_v18 = vpop.eup %3099 }
 0xf78   :  { %v511_v19 = vadd.f32 1.0, %v3100_v18  ;;  %v77_v18 = vrot.slane %v3381_v2, %v76_v17 }
 0xf7a   :  { %3101 = vrcp.f32 %v511_v19 }
 0xf84   :  { %v3102_v20 = vpop.eup %3101 }
 0xf85   :  { %v514_v22 = vmul.f32 2.0, %v3102_v20  ;;  %v516_v27 = vmul.f32 %v3102_v20, %v472_v52 }
 0xf87   :  { %v2944_v24 = vadd.f32 -1.0, %v514_v22 }
 0xf89   :  { %518 = vrot.lane.b32.xlu0 %v2944_v24, %s3331_s10 }
 0xffb   :  { %v519_v25 = vpop.permute.xlu0 %518 }
 0xffc   :  { %v521_v26 = vmul.f32 %v3102_v20, %v519_v25 }
 0xffe   :  { %523 = vrot.lane.b32.xlu1 %v521_v26, %s3332_s11 }
0x1070   :  { %v524_v28 = vpop.permute.xlu1 %523 }
0x1071   :  { %v526_v29 = vadd.f32 %v524_v28, %v516_v27 }
0x1073   :  { %3103 = vtanh.f32 %v526_v29 }
0x107d   :  { %v3104_v30 = vpop.eup %3103 }
0x107e   :  { %529 = vrot.lane.b32.xlu0 %v3104_v30, %s3334_s17 }
0x10f0   :  { %v530_v31 = vpop.permute.xlu0 %529 }
0x10f1   :  { %v532_v33 = vmul.f32 %v3102_v20, %v530_v31 }
0x10f3   :  { %v533_v34 = vmul.f32 %v532_v33, %v3429_v36 }
0x10f5   :  { %539 = vrot.lane.b32.xlu0 %v533_v34, %s3335_s18  ;;  %535 = vrot.lane.b32.xlu1 %v533_v34, %s3336_s19 }
0x10f9   :  { %72 = vbcast.lane.b32.xlu0 %v70_v37, 256 }
0x1167   :  { %v536_v38 = vpop.permute.xlu1 %535  ;;  %v540_v42 = vpop.permute.xlu0 %539 }
0x1168   :  { %v538_v41 = vadd.f32 %v536_v38, %v533_v34 }
0x116a   :  { %v542_v43 = vadd.f32 %v540_v42, %v538_v41 }
0x116b   :  { %v73_v44 = vpop.permute.xlu0 %72 }
0x116c   :  { %544 = vrot.lane.b32.xlu1 %v542_v43, %s3335_s18  ;;  %v166_v45 = vmul.f32 %v3400_v9, %v73_v44 }
0x116e   :  { %v182_v47 = vadd.f32 %v166_v45, %v3403_v10 }
0x1170   :  { %199 = vst.msk [vmem:[#allocation2 + $0x18] sm:$0xf] %vm192_vm1, %v182_v47 }
0x1177   :  { %v555_v51 = vld [vmem:[#allocation2 + $0x18] sm:$0xf] }
0x11de   :  { %v545_v48 = vpop.permute.xlu1 %544 }
0x11df   :  { %v3533_v49 = vadd.f32 %v545_v48, %v538_v41 }
0x11e1   :  { %557 = vperm.xlu1 %3050, %v3533_v49  }
0x1260   :  { %v558_v52 = vpop.permute.xlu1 %557 }
0x1261   :  { %v560_v53 = vmul.f32 %v558_v52, %v3415_v16 }
0x1263   :  { %v561_v54 = vadd.f32 %v560_v53, %v555_v51 }
0x1265   :  { %v2945_v55 = vmul.f32 -1.442695, %v561_v54 }
0x1267   :  { %3105 = vpow2.f32 %v2945_v55 }
0x1271   :  { %v3106_v56 = vpop.eup %3105 }
0x1272   :  { %v565_v59 = vadd.f32 1.0, %v3106_v56  ;;  %v3564_v56 = vld [vmem:[%s4360_s0 + $0x8] sm:$0xff]  ;;  %s3339_s0 = smov 113  }
0x1274   :  { %3107 = vrcp.f32 %v565_v59  ;;  %v84_v59 = vrot.slane %v3564_v56, %v27_v3 }
0x127e   :  { %v3108_v60 = vpop.eup %3107 }
0x127f   :  { %v568_v61 = vmul.f32 2.0, %v3108_v60  ;;  %v570_v5 = vmul.f32 %v3108_v60, %v526_v29 }
0x1281   :  { %v2946_v62 = vadd.f32 -1.0, %v568_v61 }
0x1283   :  { %572 = vrot.lane.b32.xlu0 %v2946_v62, %s3331_s10 }
0x12f5   :  { %v573_v63 = vpop.permute.xlu0 %572 }
0x12f6   :  { %v575_v4 = vmul.f32 %v3108_v60, %v573_v63 }
0x12f8   :  { %577 = vrot.lane.b32.xlu1 %v575_v4, %s3332_s11 }
0x136a   :  { %v578_v6 = vpop.permute.xlu1 %577 }
0x136b   :  { %v580_v7 = vadd.f32 %v578_v6, %v570_v5 }
0x136d   :  { %3109 = vtanh.f32 %v580_v7 }
0x1377   :  { %v3110_v11 = vpop.eup %3109 }
0x1378   :  { %583 = vrot.lane.b32.xlu0 %v3110_v11, %s3334_s17 }
0x13ea   :  { %v584_v13 = vpop.permute.xlu0 %583 }
0x13eb   :  { %v586_v14 = vmul.f32 %v3108_v60, %v584_v13 }
0x13ed   :  { %v587_v15 = vmul.f32 %v586_v14, %v3429_v36 }
0x13ef   :  { %593 = vrot.lane.b32.xlu0 %v587_v15, %s3335_s18  ;;  %589 = vrot.lane.b32.xlu1 %v587_v15, %s3336_s19 }
0x13f3   :  { %79 = vbcast.lane.b32.xlu0 %v77_v18, 256 }
0x1461   :  { %v590_v19 = vpop.permute.xlu1 %589  ;;  %v594_v22 = vpop.permute.xlu0 %593 }
0x1462   :  { %v592_v20 = vadd.f32 %v590_v19, %v587_v15 }
0x1464   :  { %v596_v24 = vadd.f32 %v594_v22, %v592_v20 }
0x1465   :  { %v80_v25 = vpop.permute.xlu0 %79 }
0x1466   :  { %598 = vrot.lane.b32.xlu1 %v596_v24, %s3335_s18  ;;  %v167_v26 = vmul.f32 %v3400_v9, %v80_v25 }
0x1468   :  { %v183_v27 = vadd.f32 %v167_v26, %v3403_v10 }
0x146a   :  { %200 = vst.msk [vmem:[#allocation2 + $0x1c] sm:$0xf] %vm192_vm1, %v183_v27 }
0x1471   :  { %v609_v2 = vld [vmem:[#allocation2 + $0x1c] sm:$0xf] }
0x14d8   :  { %v599_v28 = vpop.permute.xlu1 %598 }
0x14d9   :  { %v3551_v29 = vadd.f32 %v599_v28, %v592_v20 }
0x14db   :  { %611 = vperm.xlu1 %3050, %v3551_v29  }
0x155a   :  { %v612_v30 = vpop.permute.xlu1 %611 }
0x155b   :  { %v614_v31 = vmul.f32 %v612_v30, %v3415_v16 }
0x155d   :  { %v615_v33 = vadd.f32 %v614_v31, %v609_v2 }
0x155f   :  { %v2947_v34 = vmul.f32 -1.442695, %v615_v33 }
0x1561   :  { %3111 = vpow2.f32 %v2947_v34 }
0x156b   :  { %v3112_v37 = vpop.eup %3111 }
0x156c   :  { %v619_v38 = vadd.f32 1.0, %v3112_v37 }
0x156e   :  { %3113 = vrcp.f32 %v619_v38  ;;  %v91_v38 = vrot.slane %v3564_v56, %v34_v40 }
0x1578   :  { %v3114_v41 = vpop.eup %3113 }
0x1579   :  { %v622_v42 = vmul.f32 2.0, %v3114_v41  ;;  %v624_v47 = vmul.f32 %v3114_v41, %v580_v7 }
0x157b   :  { %v2948_v43 = vadd.f32 -1.0, %v622_v42 }
0x157d   :  { %626 = vrot.lane.b32.xlu0 %v2948_v43, %s3331_s10 }
0x15ef   :  { %v627_v44 = vpop.permute.xlu0 %626 }
0x15f0   :  { %v629_v45 = vmul.f32 %v3114_v41, %v627_v44 }
0x15f2   :  { %631 = vrot.lane.b32.xlu1 %v629_v45, %s3332_s11 }
0x1664   :  { %v632_v48 = vpop.permute.xlu1 %631 }
0x1665   :  { %v634_v51 = vadd.f32 %v632_v48, %v624_v47 }
0x1667   :  { %3115 = vtanh.f32 %v634_v51 }
0x1671   :  { %v3116_v52 = vpop.eup %3115 }
0x1672   :  { %637 = vrot.lane.b32.xlu0 %v3116_v52, %s3334_s17 }
0x16e4   :  { %v638_v53 = vpop.permute.xlu0 %637 }
0x16e5   :  { %v640_v54 = vmul.f32 %v3114_v41, %v638_v53 }
0x16e7   :  { %v641_v55 = vmul.f32 %v640_v54, %v3429_v36 }
0x16e9   :  { %647 = vrot.lane.b32.xlu0 %v641_v55, %s3335_s18  ;;  %643 = vrot.lane.b32.xlu1 %v641_v55, %s3336_s19 }
0x16ed   :  { %86 = vbcast.lane.b32.xlu0 %v84_v59, 256 }
0x175b   :  { %v644_v60 = vpop.permute.xlu1 %643  ;;  %v648_v62 = vpop.permute.xlu0 %647 }
0x175c   :  { %v646_v61 = vadd.f32 %v644_v60, %v641_v55 }
0x175e   :  { %v650_v63 = vadd.f32 %v648_v62, %v646_v61 }
0x175f   :  { %v87_v4 = vpop.permute.xlu0 %86 }
0x1760   :  { %652 = vrot.lane.b32.xlu1 %v650_v63, %s3335_s18  ;;  %v168_v5 = vmul.f32 %v3400_v9, %v87_v4 }
0x1762   :  { %v184_v6 = vadd.f32 %v168_v5, %v3403_v10 }
0x1764   :  { %201 = vst.msk [vmem:[#allocation2 + $0x20] sm:$0xf] %vm192_vm1, %v184_v6 }
0x176b   :  { %v663_v3 = vld [vmem:[#allocation2 + $0x20] sm:$0xf] }
0x17d2   :  { %v653_v7 = vpop.permute.xlu1 %652 }
0x17d3   :  { %v3573_v11 = vadd.f32 %v653_v7, %v646_v61 }
0x17d5   :  { %665 = vperm.xlu1 %3050, %v3573_v11  }
0x1854   :  { %v666_v13 = vpop.permute.xlu1 %665 }
0x1855   :  { %v668_v14 = vmul.f32 %v666_v13, %v3415_v16 }
0x1857   :  { %v669_v15 = vadd.f32 %v668_v14, %v663_v3 }
0x1859   :  { %v2949_v18 = vmul.f32 -1.442695, %v669_v15 }
0x185b   :  { %3117 = vpow2.f32 %v2949_v18 }
0x1865   :  { %v3118_v19 = vpop.eup %3117 }
0x1866   :  { %v673_v20 = vadd.f32 1.0, %v3118_v19 }
0x1868   :  { %3119 = vrcp.f32 %v673_v20  ;;  %v98_v20 = vrot.slane %v3564_v56, %v41_v12 }
0x1872   :  { %v3120_v22 = vpop.eup %3119 }
0x1873   :  { %v676_v24 = vmul.f32 2.0, %v3120_v22  ;;  %v678_v28 = vmul.f32 %v3120_v22, %v634_v51 }
0x1875   :  { %v2950_v25 = vadd.f32 -1.0, %v676_v24 }
0x1877   :  { %680 = vrot.lane.b32.xlu0 %v2950_v25, %s3331_s10 }
0x18e9   :  { %v681_v26 = vpop.permute.xlu0 %680 }
0x18ea   :  { %v683_v27 = vmul.f32 %v3120_v22, %v681_v26 }
0x18ec   :  { %685 = vrot.lane.b32.xlu1 %v683_v27, %s3332_s11 }
0x195e   :  { %v686_v2 = vpop.permute.xlu1 %685 }
0x195f   :  { %v688_v30 = vadd.f32 %v686_v2, %v678_v28 }
0x1961   :  { %3121 = vtanh.f32 %v688_v30 }
0x196b   :  { %v3122_v31 = vpop.eup %3121 }
0x196c   :  { %691 = vrot.lane.b32.xlu0 %v3122_v31, %s3334_s17 }
0x19de   :  { %v692_v33 = vpop.permute.xlu0 %691 }
0x19df   :  { %v694_v34 = vmul.f32 %v3120_v22, %v692_v33 }
0x19e1   :  { %v695_v37 = vmul.f32 %v694_v34, %v3429_v36 }
0x19e3   :  { %701 = vrot.lane.b32.xlu0 %v695_v37, %s3335_s18  ;;  %697 = vrot.lane.b32.xlu1 %v695_v37, %s3336_s19 }
0x19e7   :  { %93 = vbcast.lane.b32.xlu0 %v91_v38, 256 }
0x1a55   :  { %v698_v41 = vpop.permute.xlu1 %697  ;;  %v702_v43 = vpop.permute.xlu0 %701 }
0x1a56   :  { %v700_v42 = vadd.f32 %v698_v41, %v695_v37 }
0x1a58   :  { %v704_v44 = vadd.f32 %v702_v43, %v700_v42 }
0x1a59   :  { %v94_v45 = vpop.permute.xlu0 %93 }
0x1a5a   :  { %706 = vrot.lane.b32.xlu1 %v704_v44, %s3335_s18  ;;  %v169_v47 = vmul.f32 %v3400_v9, %v94_v45 }
0x1a5c   :  { %v185_v48 = vadd.f32 %v169_v47, %v3403_v10 }
0x1a5e   :  { %202 = vst.msk [vmem:[#allocation2 + $0x24] sm:$0xf] %vm192_vm1, %v185_v48 }
0x1a65   :  { %v717_v40 = vld [vmem:[#allocation2 + $0x24] sm:$0xf] }
0x1acc   :  { %v707_v51 = vpop.permute.xlu1 %706 }
0x1acd   :  { %v3590_v52 = vadd.f32 %v707_v51, %v700_v42 }
0x1acf   :  { %719 = vperm.xlu1 %3050, %v3590_v52  }
0x1b4e   :  { %v720_v53 = vpop.permute.xlu1 %719 }
0x1b4f   :  { %v722_v54 = vmul.f32 %v720_v53, %v3415_v16 }
0x1b51   :  { %v723_v55 = vadd.f32 %v722_v54, %v717_v40 }
0x1b53   :  { %v2951_v59 = vmul.f32 -1.442695, %v723_v55 }
0x1b55   :  { %3123 = vpow2.f32 %v2951_v59 }
0x1b5f   :  { %v3124_v60 = vpop.eup %3123 }
0x1b60   :  { %v727_v61 = vadd.f32 1.0, %v3124_v60 }
0x1b62   :  { %3125 = vrcp.f32 %v727_v61  ;;  %v105_v61 = vrot.slane %v3564_v56, %v48_v46 }
0x1b6c   :  { %v3126_v62 = vpop.eup %3125 }
0x1b6d   :  { %v730_v63 = vmul.f32 2.0, %v3126_v62  ;;  %v732_v7 = vmul.f32 %v3126_v62, %v688_v30 }
0x1b6f   :  { %v2952_v4 = vadd.f32 -1.0, %v730_v63 }
0x1b71   :  { %734 = vrot.lane.b32.xlu0 %v2952_v4, %s3331_s10 }
0x1be3   :  { %v735_v5 = vpop.permute.xlu0 %734 }
0x1be4   :  { %v737_v6 = vmul.f32 %v3126_v62, %v735_v5 }
0x1be6   :  { %739 = vrot.lane.b32.xlu1 %v737_v6, %s3332_s11 }
0x1c58   :  { %v740_v3 = vpop.permute.xlu1 %739 }
0x1c59   :  { %v742_v13 = vadd.f32 %v740_v3, %v732_v7 }
0x1c5b   :  { %3127 = vtanh.f32 %v742_v13 }
0x1c65   :  { %v3128_v14 = vpop.eup %3127 }
0x1c66   :  { %745 = vrot.lane.b32.xlu0 %v3128_v14, %s3334_s17 }
0x1cd8   :  { %v746_v15 = vpop.permute.xlu0 %745 }
0x1cd9   :  { %v748_v18 = vmul.f32 %v3126_v62, %v746_v15 }
0x1cdb   :  { %v749_v19 = vmul.f32 %v748_v18, %v3429_v36 }
0x1cdd   :  { %755 = vrot.lane.b32.xlu0 %v749_v19, %s3335_s18  ;;  %751 = vrot.lane.b32.xlu1 %v749_v19, %s3336_s19 }
0x1ce1   :  { %100 = vbcast.lane.b32.xlu0 %v98_v20, 256 }
0x1d4f   :  { %v752_v22 = vpop.permute.xlu1 %751  ;;  %v756_v25 = vpop.permute.xlu0 %755 }
0x1d50   :  { %v754_v24 = vadd.f32 %v752_v22, %v749_v19 }
0x1d52   :  { %v758_v26 = vadd.f32 %v756_v25, %v754_v24 }
0x1d53   :  { %v101_v27 = vpop.permute.xlu0 %100 }
0x1d54   :  { %760 = vrot.lane.b32.xlu1 %v758_v26, %s3335_s18  ;;  %v170_v28 = vmul.f32 %v3400_v9, %v101_v27 }
0x1d56   :  { %v186_v2 = vadd.f32 %v170_v28, %v3403_v10 }
0x1d58   :  { %203 = vst.msk [vmem:[#allocation2 + $0x28] sm:$0xf] %vm192_vm1, %v186_v2 }
0x1d5f   :  { %v771_v12 = vld [vmem:[#allocation2 + $0x28] sm:$0xf] }
0x1dc6   :  { %v761_v30 = vpop.permute.xlu1 %760 }
0x1dc7   :  { %v3607_v31 = vadd.f32 %v761_v30, %v754_v24 }
0x1dc9   :  { %773 = vperm.xlu1 %3050, %v3607_v31  }
0x1e48   :  { %v774_v33 = vpop.permute.xlu1 %773 }
0x1e49   :  { %v776_v34 = vmul.f32 %v774_v33, %v3415_v16 }
0x1e4b   :  { %v777_v37 = vadd.f32 %v776_v34, %v771_v12 }
0x1e4d   :  { %v2953_v38 = vmul.f32 -1.442695, %v777_v37 }
0x1e4f   :  { %3129 = vpow2.f32 %v2953_v38 }
0x1e59   :  { %v3130_v41 = vpop.eup %3129 }
0x1e5a   :  { %v781_v42 = vadd.f32 1.0, %v3130_v41 }
0x1e5c   :  { %3131 = vrcp.f32 %v781_v42  ;;  %v112_v42 = vrot.slane %v3564_v56, %v55_v21 }
0x1e66   :  { %v3132_v43 = vpop.eup %3131 }
0x1e67   :  { %v784_v44 = vmul.f32 2.0, %v3132_v43  ;;  %v786_v51 = vmul.f32 %v3132_v43, %v742_v13 }
0x1e69   :  { %v2954_v45 = vadd.f32 -1.0, %v784_v44 }
0x1e6b   :  { %788 = vrot.lane.b32.xlu0 %v2954_v45, %s3331_s10 }
0x1edd   :  { %v789_v47 = vpop.permute.xlu0 %788 }
0x1ede   :  { %v791_v48 = vmul.f32 %v3132_v43, %v789_v47 }
0x1ee0   :  { %793 = vrot.lane.b32.xlu1 %v791_v48, %s3332_s11 }
0x1f52   :  { %v794_v40 = vpop.permute.xlu1 %793 }
0x1f53   :  { %v796_v53 = vadd.f32 %v794_v40, %v786_v51 }
0x1f55   :  { %3133 = vtanh.f32 %v796_v53 }
0x1f5f   :  { %v3134_v54 = vpop.eup %3133 }
0x1f60   :  { %799 = vrot.lane.b32.xlu0 %v3134_v54, %s3334_s17 }
0x1fd2   :  { %v800_v55 = vpop.permute.xlu0 %799 }
0x1fd3   :  { %v802_v59 = vmul.f32 %v3132_v43, %v800_v55 }
0x1fd5   :  { %v803_v60 = vmul.f32 %v802_v59, %v3429_v36 }
0x1fd7   :  { %809 = vrot.lane.b32.xlu0 %v803_v60, %s3335_s18  ;;  %805 = vrot.lane.b32.xlu1 %v803_v60, %s3336_s19 }
0x1fdb   :  { %107 = vbcast.lane.b32.xlu0 %v105_v61, 256 }
0x2049   :  { %v806_v62 = vpop.permute.xlu1 %805  ;;  %v810_v4 = vpop.permute.xlu0 %809 }
0x204a   :  { %v808_v63 = vadd.f32 %v806_v62, %v803_v60 }
0x204c   :  { %v812_v5 = vadd.f32 %v810_v4, %v808_v63 }
0x204d   :  { %v108_v6 = vpop.permute.xlu0 %107 }
0x204e   :  { %814 = vrot.lane.b32.xlu1 %v812_v5, %s3335_s18  ;;  %v171_v7 = vmul.f32 %v3400_v9, %v108_v6 }
0x2050   :  { %v187_v3 = vadd.f32 %v171_v7, %v3403_v10 }
0x2052   :  { %204 = vst.msk [vmem:[#allocation2 + $0x2c] sm:$0xf] %vm192_vm1, %v187_v3 }
0x2059   :  { %v825_v46 = vld [vmem:[#allocation2 + $0x2c] sm:$0xf] }
0x20c0   :  { %v815_v13 = vpop.permute.xlu1 %814 }
0x20c1   :  { %v3624_v14 = vadd.f32 %v815_v13, %v808_v63 }
0x20c3   :  { %827 = vperm.xlu1 %3050, %v3624_v14  }
0x2142   :  { %v828_v15 = vpop.permute.xlu1 %827 }
0x2143   :  { %v830_v18 = vmul.f32 %v828_v15, %v3415_v16 }
0x2145   :  { %v831_v19 = vadd.f32 %v830_v18, %v825_v46 }
0x2147   :  { %v2955_v20 = vmul.f32 -1.442695, %v831_v19 }
0x2149   :  { %3135 = vpow2.f32 %v2955_v20 }
0x2153   :  { %v3136_v22 = vpop.eup %3135 }
0x2154   :  { %v835_v24 = vadd.f32 1.0, %v3136_v22 }
0x2156   :  { %3137 = vrcp.f32 %v835_v24  ;;  %v119_v24 = vrot.slane %v3564_v56, %v62_v58 }
0x2160   :  { %v3138_v25 = vpop.eup %3137 }
0x2161   :  { %v838_v26 = vmul.f32 2.0, %v3138_v25  ;;  %v840_v30 = vmul.f32 %v3138_v25, %v796_v53 }
0x2163   :  { %v2956_v27 = vadd.f32 -1.0, %v838_v26 }
0x2165   :  { %842 = vrot.lane.b32.xlu0 %v2956_v27, %s3331_s10 }
0x21d7   :  { %v843_v28 = vpop.permute.xlu0 %842 }
0x21d8   :  { %v845_v2 = vmul.f32 %v3138_v25, %v843_v28 }
0x21da   :  { %847 = vrot.lane.b32.xlu1 %v845_v2, %s3332_s11 }
0x224c   :  { %v848_v12 = vpop.permute.xlu1 %847 }
0x224d   :  { %v850_v33 = vadd.f32 %v848_v12, %v840_v30 }
0x224f   :  { %3139 = vtanh.f32 %v850_v33 }
0x2259   :  { %v3140_v34 = vpop.eup %3139 }
0x225a   :  { %853 = vrot.lane.b32.xlu0 %v3140_v34, %s3334_s17 }
0x22cc   :  { %v854_v37 = vpop.permute.xlu0 %853 }
0x22cd   :  { %v856_v38 = vmul.f32 %v3138_v25, %v854_v37 }
0x22cf   :  { %v857_v41 = vmul.f32 %v856_v38, %v3429_v36 }
0x22d1   :  { %863 = vrot.lane.b32.xlu0 %v857_v41, %s3335_s18  ;;  %859 = vrot.lane.b32.xlu1 %v857_v41, %s3336_s19 }
0x22d5   :  { %114 = vbcast.lane.b32.xlu0 %v112_v42, 256 }
0x2343   :  { %v860_v43 = vpop.permute.xlu1 %859  ;;  %v864_v45 = vpop.permute.xlu0 %863 }
0x2344   :  { %v862_v44 = vadd.f32 %v860_v43, %v857_v41 }
0x2346   :  { %v866_v47 = vadd.f32 %v864_v45, %v862_v44 }
0x2347   :  { %v115_v48 = vpop.permute.xlu0 %114 }
0x2348   :  { %868 = vrot.lane.b32.xlu1 %v866_v47, %s3335_s18  ;;  %v172_v51 = vmul.f32 %v3400_v9, %v115_v48 }
0x234a   :  { %v188_v40 = vadd.f32 %v172_v51, %v3403_v10 }
0x234c   :  { %205 = vst.msk [vmem:[#allocation2 + $0x30] sm:$0xf] %vm192_vm1, %v188_v40 }
0x2353   :  { %v879_v21 = vld [vmem:[#allocation2 + $0x30] sm:$0xf] }
0x23ba   :  { %v869_v53 = vpop.permute.xlu1 %868 }
0x23bb   :  { %v3641_v54 = vadd.f32 %v869_v53, %v862_v44 }
0x23bd   :  { %881 = vperm.xlu1 %3050, %v3641_v54  }
0x243c   :  { %v882_v55 = vpop.permute.xlu1 %881 }
0x243d   :  { %v884_v59 = vmul.f32 %v882_v55, %v3415_v16 }
0x243f   :  { %v885_v60 = vadd.f32 %v884_v59, %v879_v21 }
0x2441   :  { %v2957_v61 = vmul.f32 -1.442695, %v885_v60 }
0x2443   :  { %3141 = vpow2.f32 %v2957_v61 }
0x244d   :  { %v3142_v62 = vpop.eup %3141 }
0x244e   :  { %v889_v63 = vadd.f32 1.0, %v3142_v62 }
0x2450   :  { %3143 = vrcp.f32 %v889_v63  ;;  %v126_v63 = vrot.slane %v3564_v56, %v69_v35 }
0x245a   :  { %v3144_v4 = vpop.eup %3143 }
0x245b   :  { %v892_v5 = vmul.f32 2.0, %v3144_v4  ;;  %v894_v13 = vmul.f32 %v3144_v4, %v850_v33 }
0x245d   :  { %v2958_v6 = vadd.f32 -1.0, %v892_v5 }
0x245f   :  { %896 = vrot.lane.b32.xlu0 %v2958_v6, %s3331_s10 }
0x24d1   :  { %v897_v7 = vpop.permute.xlu0 %896 }
0x24d2   :  { %v899_v3 = vmul.f32 %v3144_v4, %v897_v7 }
0x24d4   :  { %901 = vrot.lane.b32.xlu1 %v899_v3, %s3332_s11 }
0x2546   :  { %v902_v46 = vpop.permute.xlu1 %901 }
0x2547   :  { %v904_v15 = vadd.f32 %v902_v46, %v894_v13 }
0x2549   :  { %3145 = vtanh.f32 %v904_v15 }
0x2553   :  { %v3146_v18 = vpop.eup %3145 }
0x2554   :  { %907 = vrot.lane.b32.xlu0 %v3146_v18, %s3334_s17 }
0x25c6   :  { %v908_v19 = vpop.permute.xlu0 %907 }
0x25c7   :  { %v910_v20 = vmul.f32 %v3144_v4, %v908_v19 }
0x25c9   :  { %v911_v22 = vmul.f32 %v910_v20, %v3429_v36 }
0x25cb   :  { %917 = vrot.lane.b32.xlu0 %v911_v22, %s3335_s18  ;;  %913 = vrot.lane.b32.xlu1 %v911_v22, %s3336_s19 }
0x25cf   :  { %121 = vbcast.lane.b32.xlu0 %v119_v24, 256 }
0x263d   :  { %v914_v25 = vpop.permute.xlu1 %913  ;;  %v918_v27 = vpop.permute.xlu0 %917 }
0x263e   :  { %v916_v26 = vadd.f32 %v914_v25, %v911_v22 }
0x2640   :  { %v920_v28 = vadd.f32 %v918_v27, %v916_v26 }
0x2641   :  { %v122_v2 = vpop.permute.xlu0 %121 }
0x2642   :  { %922 = vrot.lane.b32.xlu1 %v920_v28, %s3335_s18  ;;  %v173_v30 = vmul.f32 %v3400_v9, %v122_v2 }
0x2644   :  { %v189_v12 = vadd.f32 %v173_v30, %v3403_v10 }
0x2646   :  { %206 = vst.msk [vmem:[#allocation2 + $0x34] sm:$0xf] %vm192_vm1, %v189_v12 }
0x264d   :  { %v933_v58 = vld [vmem:[#allocation2 + $0x34] sm:$0xf] }
0x26b4   :  { %v923_v33 = vpop.permute.xlu1 %922 }
0x26b5   :  { %v3658_v34 = vadd.f32 %v923_v33, %v916_v26 }
0x26b7   :  { %935 = vperm.xlu1 %3050, %v3658_v34  }
0x2736   :  { %v936_v37 = vpop.permute.xlu1 %935 }
0x2737   :  { %v938_v38 = vmul.f32 %v936_v37, %v3415_v16 }
0x2739   :  { %v939_v41 = vadd.f32 %v938_v38, %v933_v58 }
0x273b   :  { %v2959_v42 = vmul.f32 -1.442695, %v939_v41 }
0x273d   :  { %3147 = vpow2.f32 %v2959_v42 }
0x2747   :  { %v3148_v43 = vpop.eup %3147 }
0x2748   :  { %v943_v44 = vadd.f32 1.0, %v3148_v43 }
0x274a   :  { %3149 = vrcp.f32 %v943_v44  ;;  %v133_v44 = vrot.slane %v3564_v56, %v76_v17 }
0x2754   :  { %v3150_v45 = vpop.eup %3149 }
0x2755   :  { %v946_v47 = vmul.f32 2.0, %v3150_v45  ;;  %v948_v53 = vmul.f32 %v3150_v45, %v904_v15 }
0x2757   :  { %v2960_v48 = vadd.f32 -1.0, %v946_v47 }
0x2759   :  { %950 = vrot.lane.b32.xlu0 %v2960_v48, %s3331_s10 }
0x27cb   :  { %v951_v51 = vpop.permute.xlu0 %950 }
0x27cc   :  { %v953_v40 = vmul.f32 %v3150_v45, %v951_v51 }
0x27ce   :  { %955 = vrot.lane.b32.xlu1 %v953_v40, %s3332_s11 }
0x2840   :  { %v956_v21 = vpop.permute.xlu1 %955 }
0x2841   :  { %v958_v55 = vadd.f32 %v956_v21, %v948_v53 }
0x2843   :  { %3151 = vtanh.f32 %v958_v55 }
0x284d   :  { %v3152_v59 = vpop.eup %3151 }
0x284e   :  { %961 = vrot.lane.b32.xlu0 %v3152_v59, %s3334_s17 }
0x28c0   :  { %v962_v60 = vpop.permute.xlu0 %961 }
0x28c1   :  { %v964_v61 = vmul.f32 %v3150_v45, %v962_v60 }
0x28c3   :  { %v965_v62 = vmul.f32 %v964_v61, %v3429_v36 }
0x28c5   :  { %971 = vrot.lane.b32.xlu0 %v965_v62, %s3335_s18  ;;  %967 = vrot.lane.b32.xlu1 %v965_v62, %s3336_s19 }
0x28c9   :  { %128 = vbcast.lane.b32.xlu0 %v126_v63, 256 }
0x2937   :  { %v968_v4 = vpop.permute.xlu1 %967  ;;  %v972_v6 = vpop.permute.xlu0 %971 }
0x2938   :  { %v970_v5 = vadd.f32 %v968_v4, %v965_v62 }
0x293a   :  { %v974_v7 = vadd.f32 %v972_v6, %v970_v5 }
0x293b   :  { %v129_v3 = vpop.permute.xlu0 %128 }
0x293c   :  { %976 = vrot.lane.b32.xlu1 %v974_v7, %s3335_s18  ;;  %v174_v13 = vmul.f32 %v3400_v9, %v129_v3 }
0x293e   :  { %v190_v46 = vadd.f32 %v174_v13, %v3403_v10 }
0x2940   :  { %207 = vst.msk [vmem:[#allocation2 + $0x38] sm:$0xf] %vm192_vm1, %v190_v46 }
0x2947   :  { %v987_v35 = vld [vmem:[#allocation2 + $0x38] sm:$0xf] }
0x29ae   :  { %v977_v15 = vpop.permute.xlu1 %976 }
0x29af   :  { %v3675_v18 = vadd.f32 %v977_v15, %v970_v5  ;;  %v3338_v15 = vmov 0  }
0x29b0   :  { %3051 = vset.pattern.permute.xlu0 %v3338_v15 }
0x29b1   :  { %989 = vperm.xlu1 %3050, %v3675_v18  }
0x2a30   :  { %v990_v19 = vpop.permute.xlu1 %989 }
0x2a31   :  { %v992_v20 = vmul.f32 %v990_v19, %v3415_v16 }
0x2a33   :  { %v993_v22 = vadd.f32 %v992_v20, %v987_v35 }
0x2a35   :  { %v2961_v24 = vmul.f32 -1.442695, %v993_v22 }
0x2a37   :  { %3153 = vpow2.f32 %v2961_v24 }
0x2a41   :  { %v3154_v25 = vpop.eup %3153 }
0x2a42   :  { %v997_v26 = vadd.f32 1.0, %v3154_v25 }
0x2a44   :  { %3155 = vrcp.f32 %v997_v26 }
0x2a4e   :  { %v3156_v27 = vpop.eup %3155 }
0x2a4f   :  { %v1000_v28 = vmul.f32 2.0, %v3156_v27  ;;  %v1002_v33 = vmul.f32 %v3156_v27, %v958_v55 }
0x2a51   :  { %v2962_v2 = vadd.f32 -1.0, %v1000_v28 }
0x2a53   :  { %1004 = vrot.lane.b32.xlu0 %v2962_v2, %s3331_s10 }
0x2ac5   :  { %v1005_v30 = vpop.permute.xlu0 %1004 }
0x2ac6   :  { %v1007_v12 = vmul.f32 %v3156_v27, %v1005_v30 }
0x2ac8   :  { %1009 = vrot.lane.b32.xlu1 %v1007_v12, %s3332_s11  ;;  %v3713_v12 = vld [vmem:[%s4365_s2 + $0x2] ss:$0 sm:$0xff] }
0x2b3a   :  { %v1010_v58 = vpop.permute.xlu1 %1009 }
0x2b3b   :  { %v1012_v37 = vadd.f32 %v1010_v58, %v1002_v33  ;;  %v3718_v33 = vld [vmem:[%s4365_s2 + $0x3] ss:$0 sm:$0xff] }
0x2b3d   :  { %3157 = vtanh.f32 %v1012_v37 }
0x2b47   :  { %v3158_v38 = vpop.eup %3157 }
0x2b48   :  { %1015 = vrot.lane.b32.xlu0 %v3158_v38, %s3334_s17  ;;  %v3728_v38 = vld [vmem:[%s4365_s2 + $0x1] ss:$0 sm:$0xff] }
0x2bba   :  { %v1016_v41 = vpop.permute.xlu0 %1015 }
0x2bbb   :  { %v1018_v42 = vmul.f32 %v3156_v27, %v1016_v41 }
0x2bbd   :  { %v1019_v43 = vmul.f32 %v1018_v42, %v3429_v36 }
0x2bbf   :  { %1025 = vrot.lane.b32.xlu0 %v1019_v43, %s3335_s18  ;;  %1021 = vrot.lane.b32.xlu1 %v1019_v43, %s3336_s19 }
0x2bc3   :  { %135 = vbcast.lane.b32.xlu0 %v133_v44, 256 }
0x2c31   :  { %v1022_v45 = vpop.permute.xlu1 %1021  ;;  %v1026_v48 = vpop.permute.xlu0 %1025 }
0x2c32   :  { %v1024_v47 = vadd.f32 %v1022_v45, %v1019_v43  ;;  %v3735_v43 = vld [vmem:[%s4362_s3 + $0x3] ss:$0 sm:$0xff] }
0x2c34   :  { %v1028_v51 = vadd.f32 %v1026_v48, %v1024_v47 }
0x2c35   :  { %v136_v40 = vpop.permute.xlu0 %135 }
0x2c36   :  { %1030 = vrot.lane.b32.xlu1 %v1028_v51, %s3335_s18  ;;  %v175_v53 = vmul.f32 %v3400_v9, %v136_v40 }
0x2c38   :  { %v191_v21 = vadd.f32 %v175_v53, %v3403_v10 }
0x2c3a   :  { %208 = vst.msk [vmem:[#allocation2 + $0x3c] sm:$0xf] %vm192_vm1, %v191_v21  ;;  %v3746_v21 = vld [vmem:[%s4362_s3 + $0x2] ss:$0 sm:$0xff] }
0x2c41   :  { %v1041_v17 = vld [vmem:[#allocation2 + $0x3c] sm:$0xf] }
0x2ca8   :  { %v1031_v55 = vpop.permute.xlu1 %1030 }
0x2ca9   :  { %v3692_v59 = vadd.f32 %v1031_v55, %v1024_v47 }
0x2cab   :  { %1043 = vperm.xlu1 %3050, %v3692_v59  }
0x2caf   :  { %3052 = vset.pattern.permute.xlu1 %v3338_v15 }
0x2d2a   :  { %v1044_v56 = vpop.permute.xlu1 %1043 }
0x2d2b   :  { %v1046_v60 = vmul.f32 %v1044_v56, %v3415_v16 }
0x2d2d   :  { %v1047_v61 = vadd.f32 %v1046_v60, %v1041_v17 }
0x2d2f   :  { %v2963_v62 = vmul.f32 -1.442695, %v1047_v61 }
0x2d31   :  { %3159 = vpow2.f32 %v2963_v62 }
0x2d3b   :  { %v3160_v63 = vpop.eup %3159 }
0x2d3c   :  { %v1051_v4 = vadd.f32 1.0, %v3160_v63 }
0x2d3e   :  { %3161 = vrcp.f32 %v1051_v4 }
0x2d48   :  { %v3162_v9 = vpop.eup %3161 }
0x2d49   :  { %v1054_v5 = vmul.f32 2.0, %v3162_v9  ;;  %v1056_v3 = vmul.f32 %v3162_v9, %v1012_v37  ;;  %v3723_v37 = vld [vmem:[%s4365_s2] ss:$0 sm:$0xff] }
0x2d4b   :  { %v2964_v10 = vadd.f32 -1.0, %v1054_v5 }
0x2d4d   :  { %1058 = vrot.lane.b32.xlu0 %v2964_v10, %s3331_s10 }
0x2dbf   :  { %v1059_v6 = vpop.permute.xlu0 %1058 }
0x2dc0   :  { %v1061_v7 = vmul.f32 %v3162_v9, %v1059_v6 }
0x2dc2   :  { %1063 = vrot.lane.b32.xlu1 %v1061_v7, %s3332_s11 }
0x2e34   :  { %v1064_v13 = vpop.permute.xlu1 %1063 }
0x2e35   :  { %v1066_v46 = vadd.f32 %v1064_v13, %v1056_v3  ;;  %v2971_v13 = vld [vmem:[%s4363_s4 + $0x2] ss:$0 sm:$0xff] }
0x2e37   :  { %3163 = vtanh.f32 %v1066_v46  ;;  %v2972_v46 = vld [vmem:[%s4363_s4 + $0x3] ss:$0 sm:$0xff] }
0x2e41   :  { %v3164_v16 = vpop.eup %3163 }
0x2e42   :  { %1069 = vrot.lane.b32.xlu0 %v3164_v16, %s3334_s17 }
0x2eb4   :  { %v1070_v35 = vpop.permute.xlu0 %1069 }
0x2eb5   :  { %v1072_v19 = vmul.f32 %v3162_v9, %v1070_v35 }
0x2eb7   :  { %v1073_v20 = vmul.f32 %v1072_v19, %v3429_v36  ;;  %v3763_v19 = vsel %vm147_vm0, %v2971_v13, %v2972_v46 }
0x2eb9   :  { %1079 = vrot.lane.b32.xlu0 %v1073_v20, %s3335_s18  ;;  %1075 = vrot.lane.b32.xlu1 %v1073_v20, %s3336_s19 }
0x2ebd   :  { %279 = vrot.lane.b32.xlu0 %v3443_v50, %s3339_s0 }
0x2f2b   :  { %v1080_v22 = vpop.permute.xlu0 %1079  ;;  %v1076_v24 = vpop.permute.xlu1 %1075 }
0x2f2c   :  { %v1078_v25 = vadd.f32 %v1076_v24, %v1073_v20  ;;  %v1547_v20 = vmul.f32 0.0, %v3763_v19 }
0x2f2e   :  { %v1082_v26 = vadd.f32 %v1080_v22, %v1078_v25 }
0x2f2f   :  { %v280_v27 = vpop.permute.xlu0 %279 }
0x2f30   :  { %283 = vst.msk [vmem:[#allocation3] sm:$0xf] %vm282_vm2, %v280_v27  ;;  %1084 = vrot.lane.b32.xlu1 %v1082_v26, %s3335_s18 }
0x2f37   :  { %v1094_v28 = vld [vmem:[#allocation3] sm:$0xf] }
0x2f38   :  { %1114 = vperm.xlu0 %3051, %v1094_v28  }
0x2fa2   :  { %v1085_v36 = vpop.permute.xlu1 %1084 }
0x2fa3   :  { %v1087_v2 = vadd.f32 %v1085_v36, %v1078_v25 }
0x2fa5   :  { %1089 = vrot.lane.b32.xlu1 %v1087_v2, %s3339_s0 }
0x2fb7   :  { %v1115_v58 = vpop.permute.xlu0 %1114 }
0x2fb8   :  { %v1338_v41 = vmul.f32 %v3713_v12, %v1115_v58  ;;  %v1364_v42 = vmul.f32 %v3718_v33, %v1115_v58  ;;  %v1196_v44 = vmul.f32 %v3723_v37, %v1115_v58  ;;  %v1252_v45 = vmul.f32 %v3728_v38, %v1115_v58  ;;  %v2973_v58 = vld [vmem:[%s4364_s5 + $0x2] ss:$0 sm:$0xff] }
0x2fba   :  { %v1358_v55 = vadd.f32 %v3735_v43, %v1338_v41  ;;  %v1396_v17 = vrot.slane %v1364_v42, 2  ;;  %v1216_v63 = vadd.f32 %v3746_v21, %v1196_v44  ;;  %v1284_v4 = vrot.slane %v1252_v45, 2  ;;  %v2974_v41 = vld [vmem:[%s4364_s5 + $0x3] ss:$0 sm:$0xff] }
0x2fbb   :  { %v1545_v42 = vsel %vm147_vm0, %v2973_v58, %v2974_v41 }
0x3017   :  { %v1090_v30 = vpop.permute.xlu1 %1089 }
0x3018   :  { %1093 = vst.msk [vmem:[#allocation3 + $0x3c] sm:$0xf] %vm282_vm2, %v1090_v30 }
0x301f   :  { %v1109_v50 = vld [vmem:[#allocation3 + $0x3c] sm:$0xf] }
0x3020   :  { %1189 = vperm.xlu1 %3052, %v1109_v50  }
0x309f   :  { %v1190_v47 = vpop.permute.xlu1 %1189 }
0x30a0   :  { %v1211_v48 = vmul.f32 %v3723_v37, %v1190_v47  ;;  %v1237_v51 = vmul.f32 %v3728_v38, %v1190_v47  ;;  %v1323_v40 = vmul.f32 %v3713_v12, %v1190_v47  ;;  %v1379_v53 = vmul.f32 %v3718_v33, %v1190_v47 }
0x30a2   :  { %v1231_v56 = vadd.f32 %v3746_v21, %v1211_v48  ;;  %v1269_v60 = vrot.slane %v1237_v51, 2  ;;  %v1343_v61 = vadd.f32 %v3735_v43, %v1323_v40  ;;  %v1411_v62 = vrot.slane %v1379_v53, 2 }
0x30a4   :  { %v1428_v9 = vadd.f32 %v1396_v17, %v1343_v61  ;;  %v1443_v5 = vadd.f32 %v1411_v62, %v1358_v55  ;;  %v1301_v10 = vadd.f32 %v1269_v60, %v1216_v63  ;;  %v1316_v6 = vadd.f32 %v1284_v4, %v1231_v56 }
0x30a6   :  { %v1460_v7 = vrot.slane %v1428_v9, 6  ;;  %v1475_v3 = vrot.slane %v1443_v5, 6 }
0x30a8   :  { %v1492_v16 = vsel %vm147_vm0, %v1301_v10, %v1460_v7  ;;  %v1507_v35 = vsel %vm147_vm0, %v1316_v6, %v1475_v3 }
0x30a9   :  { %1508 = vst.msk [vmem:[#allocation2] sm:$0xf] %vm192_vm1, %v1492_v16  ;;  %1523 = vst.msk [vmem:[#allocation2 + $0x3c] sm:$0xf] %vm192_vm1, %v1507_v35 }
0x30b0   :  { %v1546_v22 = vld [vmem:[#allocation2] sm:$0xf] }
0x30b1   :  { %v1548_v24 = vadd.f32 %v1547_v20, %v1546_v22 }
0x30b3   :  { %v2975_v25 = vmul.f32 -1.442695, %v1548_v24 }
0x30b5   :  { %3165 = vpow2.f32 %v2975_v25 }
0x30bf   :  { %v3166_v26 = vpop.eup %3165 }
0x30c0   :  { %v1552_v27 = vadd.f32 1.0, %v3166_v26 }
0x30c2   :  { %3167 = vrcp.f32 %v1552_v27 }
0x30cc   :  { %v3168_v28 = vpop.eup %3167 }
0x30cd   :  { %v1555_v36 = vmul.f32 2.0, %v3168_v28  ;;  %v1557_v44 = vmul.f32 0.0, %v3168_v28 }
0x30cf   :  { %v2976_v2 = vadd.f32 -1.0, %v1555_v36 }
0x30d1   :  { %1559 = vrot.lane.b32.xlu1 %v2976_v2, %s3331_s10 }
0x3143   :  { %v1560_v30 = vpop.permute.xlu1 %1559 }
0x3144   :  { %v1562_v50 = vmul.f32 %v3168_v28, %v1560_v30 }
0x3146   :  { %1564 = vrot.lane.b32.xlu0 %v1562_v50, %s3332_s11 }
0x314a   :  { %1575 = vrot.lane.b32.xlu0 %v1545_v42, %s3333_s16 }
0x31b8   :  { %v1565_v45 = vpop.permute.xlu0 %1564 }
0x31b9   :  { %v3776_v47 = vadd.f32 %v1565_v45, %v1557_v44 }
0x31bb   :  { %3169 = vtanh.f32 %v3776_v47 }
0x31bc   :  { %v3780_v40 = vpop.permute.xlu0 %1575 }
0x31c5   :  { %v3170_v48 = vpop.eup %3169 }
0x31c6   :  { %1570 = vrot.lane.b32.xlu1 %v3170_v48, %s3334_s17 }
0x3238   :  { %v1571_v51 = vpop.permute.xlu1 %1570 }
0x3239   :  { %v1573_v53 = vmul.f32 %v3168_v28, %v1571_v51 }
0x323b   :  { %v1578_v55 = vmul.f32 %v3780_v40, %v1573_v53 }
0x323d   :  { %1584 = vrot.lane.b32.xlu0 %v1578_v55, %s3335_s18  ;;  %1580 = vrot.lane.b32.xlu1 %v1578_v55, %s3336_s19 }
0x3241   :  { %1035 = vrot.lane.b32.xlu0 %v3692_v59, %s3339_s0  ;;  %333 = vrot.lane.b32.xlu1 %v3461_v23, %s3339_s0 }
0x32af   :  { %v1585_v17 = vpop.permute.xlu0 %1584  ;;  %v1581_v56 = vpop.permute.xlu1 %1580 }
0x32b0   :  { %v1583_v60 = vadd.f32 %v1581_v56, %v1578_v55 }
0x32b2   :  { %v1587_v61 = vadd.f32 %v1585_v17, %v1583_v60 }
0x32b3   :  { %v1036_v62 = vpop.permute.xlu0 %1035  ;;  %v334_v63 = vpop.permute.xlu1 %333 }
0x32b4   :  { %1039 = vst.msk [vmem:[#allocation3 + $0x38] sm:$0xf] %vm282_vm2, %v1036_v62  ;;  %337 = vst.msk [vmem:[#allocation3 + $0x4] sm:$0xf] %vm282_vm2, %v334_v63  ;;  %1589 = vrot.lane.b32.xlu1 %v1587_v61, %s3335_s18 }
0x32bb   :  { %v1108_v4 = vld [vmem:[#allocation3 + $0x38] sm:$0xf]  ;;  %v1095_v9 = vld [vmem:[#allocation3 + $0x4] sm:$0xf] }
0x32bc   :  { %1184 = vperm.xlu1 %3052, %v1108_v4   ;;  %1119 = vperm.xlu0 %3051, %v1095_v9  }
0x32c0   :  { %3053 = vset.pattern.permute.xlu0 %v3337_v39 }
0x3326   :  { %v1590_v59 = vpop.permute.xlu1 %1589 }
0x3327   :  { %v3793_v23 = vadd.f32 %v1590_v59, %v1583_v60 }
0x3329   :  { %1600 = vperm.xlu0 %3053, %v3793_v23  }
0x332d   :  { %3054 = vset.pattern.permute.xlu0 %v3338_v15 }
0x333b   :  { %v1120_v5 = vpop.permute.xlu0 %1119  ;;  %v1185_v10 = vpop.permute.xlu1 %1184 }
0x333c   :  { %v1197_v6 = vmul.f32 %v3723_v37, %v1120_v5  ;;  %v1251_v7 = vmul.f32 %v3728_v38, %v1120_v5  ;;  %v1337_v3 = vmul.f32 %v3713_v12, %v1120_v5  ;;  %v1365_v13 = vmul.f32 %v3718_v33, %v1120_v5 }
0x333d   :  { %v1210_v46 = vmul.f32 %v3723_v37, %v1185_v10  ;;  %v1238_v16 = vmul.f32 %v3728_v38, %v1185_v10  ;;  %v1324_v35 = vmul.f32 %v3713_v12, %v1185_v10  ;;  %v1378_v20 = vmul.f32 %v3718_v33, %v1185_v10 }
0x333e   :  { %v1217_v22 = vadd.f32 %v3746_v21, %v1197_v6  ;;  %v1283_v24 = vrot.slane %v1251_v7, 2  ;;  %v1357_v25 = vadd.f32 %v3735_v43, %v1337_v3  ;;  %v1397_v26 = vrot.slane %v1365_v13, 2 }
0x333f   :  { %v1230_v27 = vadd.f32 %v3746_v21, %v1210_v46  ;;  %v1270_v28 = vrot.slane %v1238_v16, 2  ;;  %v1344_v36 = vadd.f32 %v3735_v43, %v1324_v35  ;;  %v1410_v2 = vrot.slane %v1378_v20, 2 }
0x3341   :  { %v1429_v30 = vadd.f32 %v1397_v26, %v1344_v36  ;;  %v1442_v50 = vadd.f32 %v1410_v2, %v1357_v25  ;;  %v1302_v58 = vadd.f32 %v1270_v28, %v1217_v22  ;;  %v1315_v41 = vadd.f32 %v1283_v24, %v1230_v27 }
0x3343   :  { %v1461_v42 = vrot.slane %v1429_v30, 6  ;;  %v1474_v44 = vrot.slane %v1442_v50, 6 }
0x3345   :  { %v1493_v45 = vsel %vm147_vm0, %v1302_v58, %v1461_v42  ;;  %v1506_v48 = vsel %vm147_vm0, %v1315_v41, %v1474_v44 }
0x3346   :  { %1509 = vst.msk [vmem:[#allocation2 + $0x4] sm:$0xf] %vm192_vm1, %v1493_v45  ;;  %1522 = vst.msk [vmem:[#allocation2 + $0x38] sm:$0xf] %vm192_vm1, %v1506_v48 }
0x334d   :  { %v1598_v55 = vld [vmem:[#allocation2 + $0x4] sm:$0xf] }
0x33a8   :  { %v1601_v51 = vpop.permute.xlu0 %1600 }
0x33a9   :  { %v1603_v53 = vmul.f32 %v1601_v51, %v3763_v19 }
0x33ab   :  { %v1604_v17 = vadd.f32 %v1603_v53, %v1598_v55 }
0x33ad   :  { %v2977_v56 = vmul.f32 -1.442695, %v1604_v17 }
0x33af   :  { %3171 = vpow2.f32 %v2977_v56 }
0x33b9   :  { %v3172_v60 = vpop.eup %3171 }
0x33ba   :  { %v1608_v61 = vadd.f32 1.0, %v3172_v60 }
0x33bc   :  { %3173 = vrcp.f32 %v1608_v61 }
0x33c6   :  { %v3174_v62 = vpop.eup %3173 }
0x33c7   :  { %v1611_v63 = vmul.f32 2.0, %v3174_v62  ;;  %v1613_v5 = vmul.f32 %v3174_v62, %v3776_v47 }
0x33c9   :  { %v2978_v4 = vadd.f32 -1.0, %v1611_v63 }
0x33cb   :  { %1615 = vrot.lane.b32.xlu1 %v2978_v4, %s3331_s10 }
0x343d   :  { %v1616_v9 = vpop.permute.xlu1 %1615 }
0x343e   :  { %v1618_v59 = vmul.f32 %v3174_v62, %v1616_v9 }
0x3440   :  { %1620 = vrot.lane.b32.xlu1 %v1618_v59, %s3332_s11 }
0x34b2   :  { %v1621_v10 = vpop.permute.xlu1 %1620 }
0x34b3   :  { %v3817_v6 = vadd.f32 %v1621_v10, %v1613_v5 }
0x34b5   :  { %3175 = vtanh.f32 %v3817_v6 }
0x34bf   :  { %v3176_v7 = vpop.eup %3175 }
0x34c0   :  { %1626 = vrot.lane.b32.xlu0 %v3176_v7, %s3334_s17 }
0x3532   :  { %v1627_v3 = vpop.permute.xlu0 %1626 }
0x3533   :  { %v1629_v13 = vmul.f32 %v3174_v62, %v1627_v3 }
0x3535   :  { %v1630_v46 = vmul.f32 %v1629_v13, %v3780_v40 }
0x3537   :  { %1636 = vrot.lane.b32.xlu0 %v1630_v46, %s3335_s18  ;;  %1632 = vrot.lane.b32.xlu1 %v1630_v46, %s3336_s19 }
0x353b   :  { %981 = vrot.lane.b32.xlu0 %v3675_v18, %s3339_s0  ;;  %387 = vrot.lane.b32.xlu1 %v3479_v57, %s3339_s0 }
0x35a9   :  { %v1637_v47 = vpop.permute.xlu0 %1636  ;;  %v1633_v16 = vpop.permute.xlu1 %1632 }
0x35aa   :  { %v1635_v35 = vadd.f32 %v1633_v16, %v1630_v46 }
0x35ac   :  { %v1639_v20 = vadd.f32 %v1637_v47, %v1635_v35 }
0x35ad   :  { %v982_v22 = vpop.permute.xlu0 %981  ;;  %v388_v24 = vpop.permute.xlu1 %387 }
0x35ae   :  { %985 = vst.msk [vmem:[#allocation3 + $0x34] sm:$0xf] %vm282_vm2, %v982_v22  ;;  %391 = vst.msk [vmem:[#allocation3 + $0x8] sm:$0xf] %vm282_vm2, %v388_v24  ;;  %1641 = vrot.lane.b32.xlu1 %v1639_v20, %s3335_s18 }
0x35b5   :  { %v1107_v25 = vld [vmem:[#allocation3 + $0x34] sm:$0xf]  ;;  %v1096_v26 = vld [vmem:[#allocation3 + $0x8] sm:$0xf] }
0x35b6   :  { %1179 = vperm.xlu1 %3052, %v1107_v25   ;;  %1124 = vperm.xlu0 %3054, %v1096_v26  }
0x35ba   :  { %3055 = vset.pattern.permute.xlu1 %v3337_v39 }
0x3620   :  { %v1642_v18 = vpop.permute.xlu1 %1641 }
0x3621   :  { %v3832_v57 = vadd.f32 %v1642_v18, %v1635_v35 }
0x3623   :  { %1652 = vperm.xlu1 %3055, %v3832_v57  }
0x3627   :  { %3056 = vset.pattern.permute.xlu1 %v3338_v15 }
0x3635   :  { %v1125_v27 = vpop.permute.xlu0 %1124  ;;  %v1180_v28 = vpop.permute.xlu1 %1179 }
0x3636   :  { %v1198_v36 = vmul.f32 %v3723_v37, %v1125_v27  ;;  %v1250_v2 = vmul.f32 %v3728_v38, %v1125_v27  ;;  %v1336_v30 = vmul.f32 %v3713_v12, %v1125_v27  ;;  %v1366_v50 = vmul.f32 %v3718_v33, %v1125_v27 }
0x3637   :  { %v1209_v58 = vmul.f32 %v3723_v37, %v1180_v28  ;;  %v1239_v41 = vmul.f32 %v3728_v38, %v1180_v28  ;;  %v1325_v42 = vmul.f32 %v3713_v12, %v1180_v28  ;;  %v1377_v44 = vmul.f32 %v3718_v33, %v1180_v28 }
0x3638   :  { %v1218_v45 = vadd.f32 %v3746_v21, %v1198_v36  ;;  %v1282_v48 = vrot.slane %v1250_v2, 2  ;;  %v1356_v51 = vadd.f32 %v3735_v43, %v1336_v30  ;;  %v1398_v53 = vrot.slane %v1366_v50, 2 }
0x3639   :  { %v1229_v55 = vadd.f32 %v3746_v21, %v1209_v58  ;;  %v1271_v17 = vrot.slane %v1239_v41, 2  ;;  %v1345_v56 = vadd.f32 %v3735_v43, %v1325_v42  ;;  %v1409_v60 = vrot.slane %v1377_v44, 2 }
0x363b   :  { %v1430_v61 = vadd.f32 %v1398_v53, %v1345_v56  ;;  %v1441_v62 = vadd.f32 %v1409_v60, %v1356_v51  ;;  %v1303_v63 = vadd.f32 %v1271_v17, %v1218_v45  ;;  %v1314_v4 = vadd.f32 %v1282_v48, %v1229_v55 }
0x363d   :  { %v1462_v9 = vrot.slane %v1430_v61, 6  ;;  %v1473_v59 = vrot.slane %v1441_v62, 6 }
0x363f   :  { %v1494_v5 = vsel %vm147_vm0, %v1303_v63, %v1462_v9  ;;  %v1505_v10 = vsel %vm147_vm0, %v1314_v4, %v1473_v59 }
0x3640   :  { %1510 = vst.msk [vmem:[#allocation2 + $0x8] sm:$0xf] %vm192_vm1, %v1494_v5  ;;  %1521 = vst.msk [vmem:[#allocation2 + $0x34] sm:$0xf] %vm192_vm1, %v1505_v10 }
0x3647   :  { %v1650_v13 = vld [vmem:[#allocation2 + $0x8] sm:$0xf] }
0x36a2   :  { %v1653_v7 = vpop.permute.xlu1 %1652 }
0x36a3   :  { %v1655_v3 = vmul.f32 %v1653_v7, %v3763_v19 }
0x36a5   :  { %v1656_v46 = vadd.f32 %v1655_v3, %v1650_v13 }
0x36a7   :  { %v2979_v47 = vmul.f32 -1.442695, %v1656_v46 }
0x36a9   :  { %3177 = vpow2.f32 %v2979_v47 }
0x36b3   :  { %v3178_v16 = vpop.eup %3177 }
0x36b4   :  { %v1660_v35 = vadd.f32 1.0, %v3178_v16 }
0x36b6   :  { %3179 = vrcp.f32 %v1660_v35 }
0x36c0   :  { %v3180_v20 = vpop.eup %3179 }
0x36c1   :  { %v1663_v22 = vmul.f32 2.0, %v3180_v20  ;;  %v1665_v18 = vmul.f32 %v3180_v20, %v3817_v6 }
0x36c3   :  { %v2980_v24 = vadd.f32 -1.0, %v1663_v22 }
0x36c5   :  { %1667 = vrot.lane.b32.xlu0 %v2980_v24, %s3331_s10 }
0x3737   :  { %v1668_v25 = vpop.permute.xlu0 %1667 }
0x3738   :  { %v1670_v26 = vmul.f32 %v3180_v20, %v1668_v25 }
0x373a   :  { %1672 = vrot.lane.b32.xlu1 %v1670_v26, %s3332_s11 }
0x37ac   :  { %v1673_v27 = vpop.permute.xlu1 %1672 }
0x37ad   :  { %v3856_v28 = vadd.f32 %v1673_v27, %v1665_v18 }
0x37af   :  { %3181 = vtanh.f32 %v3856_v28 }
0x37b9   :  { %v3182_v36 = vpop.eup %3181 }
0x37ba   :  { %1678 = vrot.lane.b32.xlu0 %v3182_v36, %s3334_s17 }
0x382c   :  { %v1679_v2 = vpop.permute.xlu0 %1678 }
0x382d   :  { %v1681_v30 = vmul.f32 %v3180_v20, %v1679_v2 }
0x382f   :  { %v1682_v50 = vmul.f32 %v1681_v30, %v3780_v40 }
0x3831   :  { %1688 = vrot.lane.b32.xlu0 %v1682_v50, %s3335_s18  ;;  %1684 = vrot.lane.b32.xlu1 %v1682_v50, %s3336_s19 }
0x3835   :  { %927 = vrot.lane.b32.xlu0 %v3658_v34, %s3339_s0  ;;  %441 = vrot.lane.b32.xlu1 %v3497_v32, %s3339_s0 }
0x38a3   :  { %v1689_v6 = vpop.permute.xlu0 %1688  ;;  %v1685_v58 = vpop.permute.xlu1 %1684 }
0x38a4   :  { %v1687_v41 = vadd.f32 %v1685_v58, %v1682_v50 }
0x38a6   :  { %v1691_v42 = vadd.f32 %v1689_v6, %v1687_v41 }
0x38a7   :  { %v928_v44 = vpop.permute.xlu0 %927  ;;  %v442_v45 = vpop.permute.xlu1 %441 }
0x38a8   :  { %931 = vst.msk [vmem:[#allocation3 + $0x30] sm:$0xf] %vm282_vm2, %v928_v44  ;;  %445 = vst.msk [vmem:[#allocation3 + $0xc] sm:$0xf] %vm282_vm2, %v442_v45  ;;  %1693 = vrot.lane.b32.xlu1 %v1691_v42, %s3335_s18 }
0x38af   :  { %v1106_v48 = vld [vmem:[#allocation3 + $0x30] sm:$0xf]  ;;  %v1097_v51 = vld [vmem:[#allocation3 + $0xc] sm:$0xf] }
0x38b0   :  { %1174 = vperm.xlu1 %3056, %v1106_v48   ;;  %1129 = vperm.xlu0 %3054, %v1097_v51  }
0x38b4   :  { %3057 = vset.pattern.permute.xlu0 %v3337_v39 }
0x391a   :  { %v1694_v34 = vpop.permute.xlu1 %1693 }
0x391b   :  { %v3871_v32 = vadd.f32 %v1694_v34, %v1687_v41 }
0x391d   :  { %1704 = vperm.xlu0 %3057, %v3871_v32  }
0x3921   :  { %3058 = vset.pattern.permute.xlu0 %v3338_v15 }
0x392f   :  { %v1130_v53 = vpop.permute.xlu0 %1129  ;;  %v1175_v55 = vpop.permute.xlu1 %1174 }
0x3930   :  { %v1199_v17 = vmul.f32 %v3723_v37, %v1130_v53  ;;  %v1249_v56 = vmul.f32 %v3728_v38, %v1130_v53  ;;  %v1335_v60 = vmul.f32 %v3713_v12, %v1130_v53  ;;  %v1367_v61 = vmul.f32 %v3718_v33, %v1130_v53 }
0x3931   :  { %v1208_v62 = vmul.f32 %v3723_v37, %v1175_v55  ;;  %v1240_v63 = vmul.f32 %v3728_v38, %v1175_v55  ;;  %v1326_v4 = vmul.f32 %v3713_v12, %v1175_v55  ;;  %v1376_v9 = vmul.f32 %v3718_v33, %v1175_v55 }
0x3932   :  { %v1219_v59 = vadd.f32 %v3746_v21, %v1199_v17  ;;  %v1281_v5 = vrot.slane %v1249_v56, 2  ;;  %v1355_v10 = vadd.f32 %v3735_v43, %v1335_v60  ;;  %v1399_v7 = vrot.slane %v1367_v61, 2 }
0x3933   :  { %v1228_v3 = vadd.f32 %v3746_v21, %v1208_v62  ;;  %v1272_v13 = vrot.slane %v1240_v63, 2  ;;  %v1346_v46 = vadd.f32 %v3735_v43, %v1326_v4  ;;  %v1408_v47 = vrot.slane %v1376_v9, 2 }
0x3935   :  { %v1431_v16 = vadd.f32 %v1399_v7, %v1346_v46  ;;  %v1440_v35 = vadd.f32 %v1408_v47, %v1355_v10  ;;  %v1304_v20 = vadd.f32 %v1272_v13, %v1219_v59  ;;  %v1313_v22 = vadd.f32 %v1281_v5, %v1228_v3 }
0x3937   :  { %v1463_v24 = vrot.slane %v1431_v16, 6  ;;  %v1472_v25 = vrot.slane %v1440_v35, 6 }
0x3939   :  { %v1495_v26 = vsel %vm147_vm0, %v1304_v20, %v1463_v24  ;;  %v1504_v18 = vsel %vm147_vm0, %v1313_v22, %v1472_v25 }
0x393a   :  { %1511 = vst.msk [vmem:[#allocation2 + $0xc] sm:$0xf] %vm192_vm1, %v1495_v26  ;;  %1520 = vst.msk [vmem:[#allocation2 + $0x30] sm:$0xf] %vm192_vm1, %v1504_v18 }
0x3941   :  { %v1702_v2 = vld [vmem:[#allocation2 + $0xc] sm:$0xf] }
0x399c   :  { %v1705_v27 = vpop.permute.xlu0 %1704 }
0x399d   :  { %v1707_v36 = vmul.f32 %v1705_v27, %v3763_v19 }
0x399f   :  { %v1708_v30 = vadd.f32 %v1707_v36, %v1702_v2 }
0x39a1   :  { %v2981_v50 = vmul.f32 -1.442695, %v1708_v30 }
0x39a3   :  { %3183 = vpow2.f32 %v2981_v50 }
0x39ad   :  { %v3184_v6 = vpop.eup %3183 }
0x39ae   :  { %v1712_v58 = vadd.f32 1.0, %v3184_v6 }
0x39b0   :  { %3185 = vrcp.f32 %v1712_v58 }
0x39ba   :  { %v3186_v41 = vpop.eup %3185 }
0x39bb   :  { %v1715_v42 = vmul.f32 2.0, %v3186_v41  ;;  %v1717_v51 = vmul.f32 %v3186_v41, %v3856_v28 }
0x39bd   :  { %v2982_v44 = vadd.f32 -1.0, %v1715_v42 }
0x39bf   :  { %1719 = vrot.lane.b32.xlu1 %v2982_v44, %s3331_s10 }
0x3a31   :  { %v1720_v45 = vpop.permute.xlu1 %1719 }
0x3a32   :  { %v1722_v48 = vmul.f32 %v3186_v41, %v1720_v45 }
0x3a34   :  { %1724 = vrot.lane.b32.xlu1 %v1722_v48, %s3332_s11 }
0x3aa6   :  { %v1725_v34 = vpop.permute.xlu1 %1724 }
0x3aa7   :  { %v3895_v53 = vadd.f32 %v1725_v34, %v1717_v51 }
0x3aa9   :  { %3187 = vtanh.f32 %v3895_v53 }
0x3ab3   :  { %v3188_v55 = vpop.eup %3187 }
0x3ab4   :  { %1730 = vrot.lane.b32.xlu0 %v3188_v55, %s3334_s17 }
0x3b26   :  { %v1731_v17 = vpop.permute.xlu0 %1730 }
0x3b27   :  { %v1733_v56 = vmul.f32 %v3186_v41, %v1731_v17 }
0x3b29   :  { %v1734_v60 = vmul.f32 %v1733_v56, %v3780_v40 }
0x3b2b   :  { %1740 = vrot.lane.b32.xlu0 %v1734_v60, %s3335_s18  ;;  %1736 = vrot.lane.b32.xlu1 %v1734_v60, %s3336_s19 }
0x3b2f   :  { %873 = vrot.lane.b32.xlu0 %v3641_v54, %s3339_s0  ;;  %495 = vrot.lane.b32.xlu1 %v3515_v8, %s3339_s0 }
0x3b9d   :  { %v1741_v28 = vpop.permute.xlu0 %1740  ;;  %v1737_v61 = vpop.permute.xlu1 %1736 }
0x3b9e   :  { %v1739_v62 = vadd.f32 %v1737_v61, %v1734_v60 }
0x3ba0   :  { %v1743_v63 = vadd.f32 %v1741_v28, %v1739_v62 }
0x3ba1   :  { %v874_v4 = vpop.permute.xlu0 %873  ;;  %v496_v9 = vpop.permute.xlu1 %495 }
0x3ba2   :  { %877 = vst.msk [vmem:[#allocation3 + $0x2c] sm:$0xf] %vm282_vm2, %v874_v4  ;;  %499 = vst.msk [vmem:[#allocation3 + $0x10] sm:$0xf] %vm282_vm2, %v496_v9  ;;  %1745 = vrot.lane.b32.xlu1 %v1743_v63, %s3335_s18 }
0x3ba9   :  { %v1105_v59 = vld [vmem:[#allocation3 + $0x2c] sm:$0xf]  ;;  %v1098_v5 = vld [vmem:[#allocation3 + $0x10] sm:$0xf] }
0x3baa   :  { %1169 = vperm.xlu1 %3056, %v1105_v59   ;;  %1134 = vperm.xlu0 %3058, %v1098_v5  }
0x3bae   :  { %3059 = vset.pattern.permute.xlu1 %v3337_v39 }
0x3c14   :  { %v1746_v54 = vpop.permute.xlu1 %1745 }
0x3c15   :  { %v3910_v8 = vadd.f32 %v1746_v54, %v1739_v62 }
0x3c17   :  { %1756 = vperm.xlu1 %3059, %v3910_v8  }
0x3c1b   :  { %3060 = vset.pattern.permute.xlu1 %v3338_v15 }
0x3c29   :  { %v1135_v10 = vpop.permute.xlu0 %1134  ;;  %v1170_v7 = vpop.permute.xlu1 %1169 }
0x3c2a   :  { %v1200_v3 = vmul.f32 %v3723_v37, %v1135_v10  ;;  %v1248_v13 = vmul.f32 %v3728_v38, %v1135_v10  ;;  %v1334_v46 = vmul.f32 %v3713_v12, %v1135_v10  ;;  %v1368_v47 = vmul.f32 %v3718_v33, %v1135_v10 }
0x3c2b   :  { %v1207_v16 = vmul.f32 %v3723_v37, %v1170_v7  ;;  %v1241_v35 = vmul.f32 %v3728_v38, %v1170_v7  ;;  %v1327_v20 = vmul.f32 %v3713_v12, %v1170_v7  ;;  %v1375_v22 = vmul.f32 %v3718_v33, %v1170_v7 }
0x3c2c   :  { %v1220_v24 = vadd.f32 %v3746_v21, %v1200_v3  ;;  %v1280_v25 = vrot.slane %v1248_v13, 2  ;;  %v1354_v26 = vadd.f32 %v3735_v43, %v1334_v46  ;;  %v1400_v18 = vrot.slane %v1368_v47, 2 }
0x3c2d   :  { %v1227_v27 = vadd.f32 %v3746_v21, %v1207_v16  ;;  %v1273_v36 = vrot.slane %v1241_v35, 2  ;;  %v1347_v2 = vadd.f32 %v3735_v43, %v1327_v20  ;;  %v1407_v30 = vrot.slane %v1375_v22, 2 }
0x3c2f   :  { %v1432_v50 = vadd.f32 %v1400_v18, %v1347_v2  ;;  %v1439_v6 = vadd.f32 %v1407_v30, %v1354_v26  ;;  %v1305_v58 = vadd.f32 %v1273_v36, %v1220_v24  ;;  %v1312_v41 = vadd.f32 %v1280_v25, %v1227_v27 }
0x3c31   :  { %v1464_v42 = vrot.slane %v1432_v50, 6  ;;  %v1471_v44 = vrot.slane %v1439_v6, 6 }
0x3c33   :  { %v1496_v45 = vsel %vm147_vm0, %v1305_v58, %v1464_v42  ;;  %v1503_v48 = vsel %vm147_vm0, %v1312_v41, %v1471_v44 }
0x3c34   :  { %1512 = vst.msk [vmem:[#allocation2 + $0x10] sm:$0xf] %vm192_vm1, %v1496_v45  ;;  %1519 = vst.msk [vmem:[#allocation2 + $0x2c] sm:$0xf] %vm192_vm1, %v1503_v48 }
0x3c3b   :  { %v1754_v55 = vld [vmem:[#allocation2 + $0x10] sm:$0xf] }
0x3c96   :  { %v1757_v51 = vpop.permute.xlu1 %1756 }
0x3c97   :  { %v1759_v34 = vmul.f32 %v1757_v51, %v3763_v19 }
0x3c99   :  { %v1760_v17 = vadd.f32 %v1759_v34, %v1754_v55 }
0x3c9b   :  { %v2983_v56 = vmul.f32 -1.442695, %v1760_v17 }
0x3c9d   :  { %3189 = vpow2.f32 %v2983_v56 }
0x3ca7   :  { %v3190_v60 = vpop.eup %3189 }
0x3ca8   :  { %v1764_v28 = vadd.f32 1.0, %v3190_v60 }
0x3caa   :  { %3191 = vrcp.f32 %v1764_v28 }
0x3cb4   :  { %v3192_v61 = vpop.eup %3191 }
0x3cb5   :  { %v1767_v62 = vmul.f32 2.0, %v3192_v61  ;;  %v1769_v59 = vmul.f32 %v3192_v61, %v3895_v53 }
0x3cb7   :  { %v2984_v63 = vadd.f32 -1.0, %v1767_v62 }
0x3cb9   :  { %1771 = vrot.lane.b32.xlu0 %v2984_v63, %s3331_s10 }
0x3d2b   :  { %v1772_v4 = vpop.permute.xlu0 %1771 }
0x3d2c   :  { %v1774_v9 = vmul.f32 %v3192_v61, %v1772_v4 }
0x3d2e   :  { %1776 = vrot.lane.b32.xlu1 %v1774_v9, %s3332_s11 }
0x3da0   :  { %v1777_v5 = vpop.permute.xlu1 %1776 }
0x3da1   :  { %v3934_v54 = vadd.f32 %v1777_v5, %v1769_v59 }
0x3da3   :  { %3193 = vtanh.f32 %v3934_v54 }
0x3dad   :  { %v3194_v10 = vpop.eup %3193 }
0x3dae   :  { %1782 = vrot.lane.b32.xlu0 %v3194_v10, %s3334_s17 }
0x3e20   :  { %v1783_v7 = vpop.permute.xlu0 %1782 }
0x3e21   :  { %v1785_v3 = vmul.f32 %v3192_v61, %v1783_v7 }
0x3e23   :  { %v1786_v13 = vmul.f32 %v1785_v3, %v3780_v40 }
0x3e25   :  { %1792 = vrot.lane.b32.xlu0 %v1786_v13, %s3335_s18  ;;  %1788 = vrot.lane.b32.xlu1 %v1786_v13, %s3336_s19 }
0x3e29   :  { %819 = vrot.lane.b32.xlu0 %v3624_v14, %s3339_s0  ;;  %549 = vrot.lane.b32.xlu1 %v3533_v49, %s3339_s0 }
0x3e97   :  { %v1793_v53 = vpop.permute.xlu0 %1792  ;;  %v1789_v46 = vpop.permute.xlu1 %1788 }
0x3e98   :  { %v1791_v47 = vadd.f32 %v1789_v46, %v1786_v13 }
0x3e9a   :  { %v1795_v16 = vadd.f32 %v1793_v53, %v1791_v47 }
0x3e9b   :  { %v820_v35 = vpop.permute.xlu0 %819  ;;  %v550_v20 = vpop.permute.xlu1 %549 }
0x3e9c   :  { %823 = vst.msk [vmem:[#allocation3 + $0x28] sm:$0xf] %vm282_vm2, %v820_v35  ;;  %553 = vst.msk [vmem:[#allocation3 + $0x14] sm:$0xf] %vm282_vm2, %v550_v20  ;;  %1797 = vrot.lane.b32.xlu1 %v1795_v16, %s3335_s18 }
0x3ea3   :  { %v1104_v22 = vld [vmem:[#allocation3 + $0x28] sm:$0xf]  ;;  %v1099_v24 = vld [vmem:[#allocation3 + $0x14] sm:$0xf] }
0x3ea4   :  { %1164 = vperm.xlu1 %3060, %v1104_v22   ;;  %1139 = vperm.xlu0 %3058, %v1099_v24  }
0x3ea8   :  { %3061 = vset.pattern.permute.xlu0 %v3337_v39 }
0x3f0e   :  { %v1798_v14 = vpop.permute.xlu1 %1797 }
0x3f0f   :  { %v3949_v49 = vadd.f32 %v1798_v14, %v1791_v47 }
0x3f11   :  { %1808 = vperm.xlu0 %3061, %v3949_v49  }
0x3f15   :  { %3062 = vset.pattern.permute.xlu0 %v3338_v15 }
0x3f23   :  { %v1140_v25 = vpop.permute.xlu0 %1139  ;;  %v1165_v26 = vpop.permute.xlu1 %1164 }
0x3f24   :  { %v1201_v18 = vmul.f32 %v3723_v37, %v1140_v25  ;;  %v1247_v27 = vmul.f32 %v3728_v38, %v1140_v25  ;;  %v1333_v36 = vmul.f32 %v3713_v12, %v1140_v25  ;;  %v1369_v2 = vmul.f32 %v3718_v33, %v1140_v25 }
0x3f25   :  { %v1206_v30 = vmul.f32 %v3723_v37, %v1165_v26  ;;  %v1242_v50 = vmul.f32 %v3728_v38, %v1165_v26  ;;  %v1328_v6 = vmul.f32 %v3713_v12, %v1165_v26  ;;  %v1374_v58 = vmul.f32 %v3718_v33, %v1165_v26 }
0x3f26   :  { %v1221_v41 = vadd.f32 %v3746_v21, %v1201_v18  ;;  %v1279_v42 = vrot.slane %v1247_v27, 2  ;;  %v1353_v44 = vadd.f32 %v3735_v43, %v1333_v36  ;;  %v1401_v45 = vrot.slane %v1369_v2, 2 }
0x3f27   :  { %v1226_v48 = vadd.f32 %v3746_v21, %v1206_v30  ;;  %v1274_v51 = vrot.slane %v1242_v50, 2  ;;  %v1348_v34 = vadd.f32 %v3735_v43, %v1328_v6  ;;  %v1406_v55 = vrot.slane %v1374_v58, 2 }
0x3f29   :  { %v1433_v17 = vadd.f32 %v1401_v45, %v1348_v34  ;;  %v1438_v56 = vadd.f32 %v1406_v55, %v1353_v44  ;;  %v1306_v60 = vadd.f32 %v1274_v51, %v1221_v41  ;;  %v1311_v28 = vadd.f32 %v1279_v42, %v1226_v48 }
0x3f2b   :  { %v1465_v61 = vrot.slane %v1433_v17, 6  ;;  %v1470_v62 = vrot.slane %v1438_v56, 6 }
0x3f2d   :  { %v1497_v63 = vsel %vm147_vm0, %v1306_v60, %v1465_v61  ;;  %v1502_v4 = vsel %vm147_vm0, %v1311_v28, %v1470_v62 }
0x3f2e   :  { %1513 = vst.msk [vmem:[#allocation2 + $0x14] sm:$0xf] %vm192_vm1, %v1497_v63  ;;  %1518 = vst.msk [vmem:[#allocation2 + $0x28] sm:$0xf] %vm192_vm1, %v1502_v4 }
0x3f35   :  { %v1806_v5 = vld [vmem:[#allocation2 + $0x14] sm:$0xf] }
0x3f90   :  { %v1809_v9 = vpop.permute.xlu0 %1808 }
0x3f91   :  { %v1811_v59 = vmul.f32 %v1809_v9, %v3763_v19 }
0x3f93   :  { %v1812_v10 = vadd.f32 %v1811_v59, %v1806_v5 }
0x3f95   :  { %v2985_v7 = vmul.f32 -1.442695, %v1812_v10 }
0x3f97   :  { %3195 = vpow2.f32 %v2985_v7 }
0x3fa1   :  { %v3196_v3 = vpop.eup %3195 }
0x3fa2   :  { %v1816_v13 = vadd.f32 1.0, %v3196_v3 }
0x3fa4   :  { %3197 = vrcp.f32 %v1816_v13 }
0x3fae   :  { %v3198_v53 = vpop.eup %3197 }
0x3faf   :  { %v1819_v46 = vmul.f32 2.0, %v3198_v53  ;;  %v1821_v20 = vmul.f32 %v3198_v53, %v3934_v54 }
0x3fb1   :  { %v2986_v47 = vadd.f32 -1.0, %v1819_v46 }
0x3fb3   :  { %1823 = vrot.lane.b32.xlu1 %v2986_v47, %s3331_s10 }
0x4025   :  { %v1824_v16 = vpop.permute.xlu1 %1823 }
0x4026   :  { %v1826_v35 = vmul.f32 %v3198_v53, %v1824_v16 }
0x4028   :  { %1828 = vrot.lane.b32.xlu1 %v1826_v35, %s3332_s11 }
0x409a   :  { %v1829_v22 = vpop.permute.xlu1 %1828 }
0x409b   :  { %v3973_v24 = vadd.f32 %v1829_v22, %v1821_v20 }
0x409d   :  { %3199 = vtanh.f32 %v3973_v24 }
0x40a7   :  { %v3200_v14 = vpop.eup %3199 }
0x40a8   :  { %1834 = vrot.lane.b32.xlu0 %v3200_v14, %s3334_s17 }
0x411a   :  { %v1835_v25 = vpop.permute.xlu0 %1834 }
0x411b   :  { %v1837_v26 = vmul.f32 %v3198_v53, %v1835_v25 }
0x411d   :  { %v1838_v18 = vmul.f32 %v1837_v26, %v3780_v40 }
0x411f   :  { %1844 = vrot.lane.b32.xlu0 %v1838_v18, %s3335_s18  ;;  %1840 = vrot.lane.b32.xlu1 %v1838_v18, %s3336_s19 }
0x4123   :  { %765 = vrot.lane.b32.xlu0 %v3607_v31, %s3339_s0  ;;  %603 = vrot.lane.b32.xlu1 %v3551_v29, %s3339_s0 }
0x4191   :  { %v1845_v54 = vpop.permute.xlu0 %1844  ;;  %v1841_v27 = vpop.permute.xlu1 %1840 }
0x4192   :  { %v1843_v36 = vadd.f32 %v1841_v27, %v1838_v18 }
0x4194   :  { %v1847_v2 = vadd.f32 %v1845_v54, %v1843_v36 }
0x4195   :  { %v766_v30 = vpop.permute.xlu0 %765  ;;  %v604_v50 = vpop.permute.xlu1 %603 }
0x4196   :  { %769 = vst.msk [vmem:[#allocation3 + $0x24] sm:$0xf] %vm282_vm2, %v766_v30  ;;  %607 = vst.msk [vmem:[#allocation3 + $0x18] sm:$0xf] %vm282_vm2, %v604_v50  ;;  %1849 = vrot.lane.b32.xlu1 %v1847_v2, %s3335_s18 }
0x419d   :  { %v1103_v6 = vld [vmem:[#allocation3 + $0x24] sm:$0xf]  ;;  %v1100_v58 = vld [vmem:[#allocation3 + $0x18] sm:$0xf] }
0x419e   :  { %1159 = vperm.xlu1 %3060, %v1103_v6   ;;  %1144 = vperm.xlu0 %3062, %v1100_v58  }
0x41a2   :  { %3063 = vset.pattern.permute.xlu1 %v3337_v39 }
0x4208   :  { %v1850_v31 = vpop.permute.xlu1 %1849 }
0x4209   :  { %v3988_v29 = vadd.f32 %v1850_v31, %v1843_v36 }
0x420b   :  { %1860 = vperm.xlu1 %3063, %v3988_v29  }
0x420f   :  { %3064 = vset.pattern.permute.xlu1 %v3338_v15 }
0x421d   :  { %v1145_v41 = vpop.permute.xlu0 %1144  ;;  %v1160_v42 = vpop.permute.xlu1 %1159 }
0x421e   :  { %v1202_v44 = vmul.f32 %v3723_v37, %v1145_v41  ;;  %v1246_v45 = vmul.f32 %v3728_v38, %v1145_v41  ;;  %v1332_v48 = vmul.f32 %v3713_v12, %v1145_v41  ;;  %v1370_v51 = vmul.f32 %v3718_v33, %v1145_v41 }
0x421f   :  { %v1205_v34 = vmul.f32 %v3723_v37, %v1160_v42  ;;  %v1243_v55 = vmul.f32 %v3728_v38, %v1160_v42  ;;  %v1329_v17 = vmul.f32 %v3713_v12, %v1160_v42  ;;  %v1373_v56 = vmul.f32 %v3718_v33, %v1160_v42 }
0x4220   :  { %v1222_v60 = vadd.f32 %v3746_v21, %v1202_v44  ;;  %v1278_v28 = vrot.slane %v1246_v45, 2  ;;  %v1352_v61 = vadd.f32 %v3735_v43, %v1332_v48  ;;  %v1402_v62 = vrot.slane %v1370_v51, 2  ;;  %v3325_v51 = vld [vmem:[%s4365_s2] ss:$0 sm:$0xff] }
0x4221   :  { %v1225_v63 = vadd.f32 %v3746_v21, %v1205_v34  ;;  %v1275_v4 = vrot.slane %v1243_v55, 2  ;;  %v1349_v9 = vadd.f32 %v3735_v43, %v1329_v17  ;;  %v1405_v59 = vrot.slane %v1373_v56, 2  ;;  %v3326_v55 = vld [vmem:[%s4365_s2 + $0x1] ss:$0 sm:$0xff] }
0x4223   :  { %v1434_v5 = vadd.f32 %v1402_v62, %v1349_v9  ;;  %v1437_v37 = vadd.f32 %v1405_v59, %v1352_v61  ;;  %v1307_v10 = vadd.f32 %v1275_v4, %v1222_v60  ;;  %v1310_v38 = vadd.f32 %v1278_v28, %v1225_v63  ;;  %v3328_v60 = vld [vmem:[%s4365_s2 + $0x3] ss:$0 sm:$0xff]  ;;  %v3329_v9 = vld [vmem:[%s4362_s3 + $0x2] ss:$0 sm:$0xff] }
0x4225   :  { %v1466_v7 = vrot.slane %v1434_v5, 6  ;;  %v1469_v12 = vrot.slane %v1437_v37, 6  ;;  %v3330_v37 = vld [vmem:[%s4362_s3 + $0x3] ss:$0 sm:$0xff] }
0x4227   :  { %v1498_v33 = vsel %vm147_vm0, %v1307_v10, %v1466_v7  ;;  %v1501_v3 = vsel %vm147_vm0, %v1310_v38, %v1469_v12 }
0x4228   :  { %1514 = vst.msk [vmem:[#allocation2 + $0x18] sm:$0xf] %vm192_vm1, %v1498_v33  ;;  %1517 = vst.msk [vmem:[#allocation2 + $0x24] sm:$0xf] %vm192_vm1, %v1501_v3 }
0x422f   :  { %v1858_v53 = vld [vmem:[#allocation2 + $0x18] sm:$0xf] }
0x428a   :  { %v1861_v13 = vpop.permute.xlu1 %1860 }
0x428b   :  { %v1863_v21 = vmul.f32 %v1861_v13, %v3763_v19 }
0x428d   :  { %v1864_v43 = vadd.f32 %v1863_v21, %v1858_v53 }
0x428f   :  { %v2987_v46 = vmul.f32 -1.442695, %v1864_v43 }
0x4291   :  { %3201 = vpow2.f32 %v2987_v46 }
0x429b   :  { %v3202_v47 = vpop.eup %3201 }
0x429c   :  { %v1868_v16 = vadd.f32 1.0, %v3202_v47 }
0x429e   :  { %3203 = vrcp.f32 %v1868_v16 }
0x42a8   :  { %v3204_v35 = vpop.eup %3203 }
0x42a9   :  { %v1871_v20 = vmul.f32 2.0, %v3204_v35  ;;  %v1873_v26 = vmul.f32 %v3204_v35, %v3973_v24 }
0x42ab   :  { %v2988_v22 = vadd.f32 -1.0, %v1871_v20 }
0x42ad   :  { %1875 = vrot.lane.b32.xlu0 %v2988_v22, %s3331_s10 }
0x431f   :  { %v1876_v14 = vpop.permute.xlu0 %1875 }
0x4320   :  { %v1878_v25 = vmul.f32 %v3204_v35, %v1876_v14 }
0x4322   :  { %1880 = vrot.lane.b32.xlu1 %v1878_v25, %s3332_s11 }
0x4394   :  { %v1881_v18 = vpop.permute.xlu1 %1880 }
0x4395   :  { %v4012_v54 = vadd.f32 %v1881_v18, %v1873_v26 }
0x4397   :  { %3205 = vtanh.f32 %v4012_v54 }
0x43a1   :  { %v3206_v27 = vpop.eup %3205 }
0x43a2   :  { %1886 = vrot.lane.b32.xlu0 %v3206_v27, %s3334_s17 }
0x4414   :  { %v1887_v36 = vpop.permute.xlu0 %1886 }
0x4415   :  { %v1889_v2 = vmul.f32 %v3204_v35, %v1887_v36 }
0x4417   :  { %v1890_v30 = vmul.f32 %v1889_v2, %v3780_v40 }
0x4419   :  { %1896 = vrot.lane.b32.xlu0 %v1890_v30, %s3335_s18  ;;  %1892 = vrot.lane.b32.xlu1 %v1890_v30, %s3336_s19 }
0x441d   :  { %711 = vrot.lane.b32.xlu0 %v3590_v52, %s3339_s0  ;;  %657 = vrot.lane.b32.xlu1 %v3573_v11, %s3339_s0 }
0x448b   :  { %v1897_v24 = vpop.permute.xlu0 %1896  ;;  %v1893_v50 = vpop.permute.xlu1 %1892 }
0x448c   :  { %v1895_v6 = vadd.f32 %v1893_v50, %v1890_v30 }
0x448e   :  { %v1899_v58 = vadd.f32 %v1897_v24, %v1895_v6 }
0x448f   :  { %v712_v31 = vpop.permute.xlu0 %711  ;;  %v658_v41 = vpop.permute.xlu1 %657 }
0x4490   :  { %715 = vst.msk [vmem:[#allocation3 + $0x20] sm:$0xf] %vm282_vm2, %v712_v31  ;;  %661 = vst.msk [vmem:[#allocation3 + $0x1c] sm:$0xf] %vm282_vm2, %v658_v41  ;;  %1901 = vrot.lane.b32.xlu1 %v1899_v58, %s3335_s18 }
0x4497   :  { %v1102_v42 = vld [vmem:[#allocation3 + $0x20] sm:$0xf]  ;;  %v1101_v44 = vld [vmem:[#allocation3 + $0x1c] sm:$0xf] }
0x4498   :  { %1154 = vperm.xlu1 %3064, %v1102_v42   ;;  %1149 = vperm.xlu0 %3062, %v1101_v44  }
0x449c   :  { %3065 = vset.pattern.permute.xlu0 %v3337_v39  ;;  %3066 = vset.pattern.permute.xlu1 %v3337_v39  ;;  %v3327_v39 = vld [vmem:[%s4365_s2 + $0x2] ss:$0 sm:$0xff] }
0x4502   :  { %v1902_v11 = vpop.permute.xlu1 %1901 }
0x4503   :  { %v4028_v52 = vadd.f32 %v1902_v11, %v1895_v6 }
0x4505   :  { %1912 = vperm.xlu0 %3065, %v4028_v52  }
0x4517   :  { %v1150_v45 = vpop.permute.xlu0 %1149  ;;  %v1155_v48 = vpop.permute.xlu1 %1154 }
0x4518   :  { %v1203_v34 = vmul.f32 %v3325_v51, %v1150_v45  ;;  %v1245_v17 = vmul.f32 %v3326_v55, %v1150_v45  ;;  %v1331_v56 = vmul.f32 %v3327_v39, %v1150_v45  ;;  %v1371_v28 = vmul.f32 %v3328_v60, %v1150_v45 }
0x4519   :  { %v1204_v61 = vmul.f32 %v3325_v51, %v1155_v48  ;;  %v1244_v62 = vmul.f32 %v3326_v55, %v1155_v48  ;;  %v1330_v63 = vmul.f32 %v3327_v39, %v1155_v48  ;;  %v1372_v4 = vmul.f32 %v3328_v60, %v1155_v48 }
0x451a   :  { %v1223_v59 = vadd.f32 %v3329_v9, %v1203_v34  ;;  %v1277_v5 = vrot.slane %v1245_v17, 2  ;;  %v1351_v10 = vadd.f32 %v3330_v37, %v1331_v56  ;;  %v1403_v38 = vrot.slane %v1371_v28, 2 }
0x451b   :  { %v1224_v7 = vadd.f32 %v3329_v9, %v1204_v61  ;;  %v1276_v12 = vrot.slane %v1244_v62, 2  ;;  %v1350_v33 = vadd.f32 %v3330_v37, %v1330_v63  ;;  %v1404_v3 = vrot.slane %v1372_v4, 2 }
0x451d   :  { %v1435_v13 = vadd.f32 %v1403_v38, %v1350_v33  ;;  %v1436_v21 = vadd.f32 %v1404_v3, %v1351_v10  ;;  %v1308_v53 = vadd.f32 %v1276_v12, %v1223_v59  ;;  %v1309_v43 = vadd.f32 %v1277_v5, %v1224_v7 }
0x451f   :  { %v1467_v46 = vrot.slane %v1435_v13, 6  ;;  %v1468_v47 = vrot.slane %v1436_v21, 6 }
0x4521   :  { %v1499_v16 = vsel %vm147_vm0, %v1308_v53, %v1467_v46  ;;  %v1500_v35 = vsel %vm147_vm0, %v1309_v43, %v1468_v47 }
0x4522   :  { %1515 = vst.msk [vmem:[#allocation2 + $0x1c] sm:$0xf] %vm192_vm1, %v1499_v16  ;;  %1516 = vst.msk [vmem:[#allocation2 + $0x20] sm:$0xf] %vm192_vm1, %v1500_v35 }
0x4529   :  { %v1910_v14 = vld [vmem:[#allocation2 + $0x1c] sm:$0xf]  ;;  %v1962_v56 = vld [vmem:[#allocation2 + $0x20] sm:$0xf] }
0x4584   :  { %v1913_v20 = vpop.permute.xlu0 %1912 }
0x4585   :  { %v1915_v22 = vmul.f32 %v1913_v20, %v3763_v19  ;;  %v2014_v20 = vld [vmem:[#allocation2 + $0x24] sm:$0xf] }
0x4587   :  { %v1916_v25 = vadd.f32 %v1915_v22, %v1910_v14 }
0x4589   :  { %v2989_v26 = vmul.f32 -1.442695, %v1916_v25 }
0x458b   :  { %3207 = vpow2.f32 %v2989_v26 }
0x4595   :  { %v3208_v18 = vpop.eup %3207 }
0x4596   :  { %v1920_v27 = vadd.f32 1.0, %v3208_v18 }
0x4598   :  { %3209 = vrcp.f32 %v1920_v27 }
0x45a2   :  { %v3210_v36 = vpop.eup %3209 }
0x45a3   :  { %v1923_v2 = vmul.f32 2.0, %v3210_v36  ;;  %v1925_v6 = vmul.f32 %v3210_v36, %v4012_v54 }
0x45a5   :  { %v2990_v30 = vadd.f32 -1.0, %v1923_v2 }
0x45a7   :  { %1927 = vrot.lane.b32.xlu1 %v2990_v30, %s3331_s10 }
0x4619   :  { %v1928_v24 = vpop.permute.xlu1 %1927 }
0x461a   :  { %v1930_v50 = vmul.f32 %v3210_v36, %v1928_v24 }
0x461c   :  { %1932 = vrot.lane.b32.xlu1 %v1930_v50, %s3332_s11 }
0x468e   :  { %v1933_v58 = vpop.permute.xlu1 %1932 }
0x468f   :  { %v1935_v31 = vadd.f32 %v1933_v58, %v1925_v6 }
0x4691   :  { %3211 = vtanh.f32 %v1935_v31 }
0x469b   :  { %v3212_v41 = vpop.eup %3211 }
0x469c   :  { %1938 = vrot.lane.b32.xlu0 %v3212_v41, %s3334_s17 }
0x470e   :  { %v1939_v42 = vpop.permute.xlu0 %1938 }
0x470f   :  { %v1941_v44 = vmul.f32 %v3210_v36, %v1939_v42 }
0x4711   :  { %v1942_v11 = vmul.f32 %v1941_v44, %v3780_v40 }
0x4713   :  { %1948 = vrot.lane.b32.xlu0 %v1942_v11, %s3335_s18  ;;  %1944 = vrot.lane.b32.xlu1 %v1942_v11, %s3336_s19 }
0x4785   :  { %v1945_v45 = vpop.permute.xlu1 %1944  ;;  %v1949_v51 = vpop.permute.xlu0 %1948 }
0x4786   :  { %v1947_v48 = vadd.f32 %v1945_v45, %v1942_v11 }
0x4788   :  { %v1951_v34 = vadd.f32 %v1949_v51, %v1947_v48 }
0x478a   :  { %1953 = vrot.lane.b32.xlu1 %v1951_v34, %s3335_s18 }
0x47fc   :  { %v1954_v54 = vpop.permute.xlu1 %1953 }
0x47fd   :  { %v4062_v55 = vadd.f32 %v1954_v54, %v1947_v48 }
0x47ff   :  { %1964 = vperm.xlu0 %3065, %v4062_v55  }
0x487e   :  { %v1965_v17 = vpop.permute.xlu0 %1964 }
0x487f   :  { %v1967_v39 = vmul.f32 %v1965_v17, %v3763_v19 }
0x4881   :  { %v1968_v60 = vadd.f32 %v1967_v39, %v1962_v56  ;;  %v2066_v39 = vld [vmem:[#allocation2 + $0x28] sm:$0xf] }
0x4883   :  { %v2991_v28 = vmul.f32 -1.442695, %v1968_v60 }
0x4885   :  { %3213 = vpow2.f32 %v2991_v28 }
0x488f   :  { %v3214_v61 = vpop.eup %3213 }
0x4890   :  { %v1972_v62 = vadd.f32 1.0, %v3214_v61 }
0x4892   :  { %3215 = vrcp.f32 %v1972_v62 }
0x489c   :  { %v3216_v63 = vpop.eup %3215 }
0x489d   :  { %v1975_v4 = vmul.f32 2.0, %v3216_v63  ;;  %v1977_v37 = vmul.f32 %v3216_v63, %v1935_v31 }
0x489f   :  { %v2992_v9 = vadd.f32 -1.0, %v1975_v4 }
0x48a1   :  { %1979 = vrot.lane.b32.xlu1 %v2992_v9, %s3331_s10 }
0x4913   :  { %v1980_v59 = vpop.permute.xlu1 %1979 }
0x4914   :  { %v1982_v5 = vmul.f32 %v3216_v63, %v1980_v59 }
0x4916   :  { %1984 = vrot.lane.b32.xlu0 %v1982_v5, %s3332_s11 }
0x4988   :  { %v1985_v10 = vpop.permute.xlu0 %1984 }
0x4989   :  { %v1987_v38 = vadd.f32 %v1985_v10, %v1977_v37 }
0x498b   :  { %3217 = vtanh.f32 %v1987_v38 }
0x4995   :  { %v3218_v7 = vpop.eup %3217 }
0x4996   :  { %1990 = vrot.lane.b32.xlu1 %v3218_v7, %s3334_s17 }
0x4a08   :  { %v1991_v12 = vpop.permute.xlu1 %1990 }
0x4a09   :  { %v1993_v33 = vmul.f32 %v3216_v63, %v1991_v12 }
0x4a0b   :  { %v1994_v3 = vmul.f32 %v1993_v33, %v3780_v40 }
0x4a0d   :  { %2000 = vrot.lane.b32.xlu1 %v1994_v3, %s3335_s18  ;;  %1996 = vrot.lane.b32.xlu0 %v1994_v3, %s3336_s19 }
0x4a7f   :  { %v1997_v13 = vpop.permute.xlu0 %1996  ;;  %v2001_v53 = vpop.permute.xlu1 %2000 }
0x4a80   :  { %v1999_v21 = vadd.f32 %v1997_v13, %v1994_v3 }
0x4a82   :  { %v2003_v43 = vadd.f32 %v2001_v53, %v1999_v21 }
0x4a84   :  { %2005 = vrot.lane.b32.xlu0 %v2003_v43, %s3335_s18 }
0x4af6   :  { %v2006_v46 = vpop.permute.xlu0 %2005 }
0x4af7   :  { %v4073_v47 = vadd.f32 %v2006_v46, %v1999_v21 }
0x4af9   :  { %2016 = vperm.xlu1 %3066, %v4073_v47  }
0x4b78   :  { %v2017_v16 = vpop.permute.xlu1 %2016 }
0x4b79   :  { %v2019_v35 = vmul.f32 %v2017_v16, %v3763_v19 }
0x4b7b   :  { %v2020_v22 = vadd.f32 %v2019_v35, %v2014_v20  ;;  %v2118_v20 = vld [vmem:[#allocation2 + $0x2c] sm:$0xf] }
0x4b7d   :  { %v2993_v14 = vmul.f32 -1.442695, %v2020_v22 }
0x4b7f   :  { %3219 = vpow2.f32 %v2993_v14 }
0x4b89   :  { %v3220_v25 = vpop.eup %3219 }
0x4b8a   :  { %v2024_v26 = vadd.f32 1.0, %v3220_v25 }
0x4b8c   :  { %3221 = vrcp.f32 %v2024_v26 }
0x4b96   :  { %v3222_v18 = vpop.eup %3221 }
0x4b97   :  { %v2027_v27 = vmul.f32 2.0, %v3222_v18  ;;  %v2029_v24 = vmul.f32 %v3222_v18, %v1987_v38 }
0x4b99   :  { %v2994_v36 = vadd.f32 -1.0, %v2027_v27 }
0x4b9b   :  { %2031 = vrot.lane.b32.xlu0 %v2994_v36, %s3331_s10 }
0x4c0d   :  { %v2032_v2 = vpop.permute.xlu0 %2031 }
0x4c0e   :  { %v2034_v30 = vmul.f32 %v3222_v18, %v2032_v2 }
0x4c10   :  { %2036 = vrot.lane.b32.xlu1 %v2034_v30, %s3332_s11 }
0x4c82   :  { %v2037_v50 = vpop.permute.xlu1 %2036 }
0x4c83   :  { %v2039_v6 = vadd.f32 %v2037_v50, %v2029_v24 }
0x4c85   :  { %3223 = vtanh.f32 %v2039_v6 }
0x4c8f   :  { %v3224_v58 = vpop.eup %3223 }
0x4c90   :  { %2042 = vrot.lane.b32.xlu0 %v3224_v58, %s3334_s17 }
0x4d02   :  { %v2043_v31 = vpop.permute.xlu0 %2042 }
0x4d03   :  { %v2045_v41 = vmul.f32 %v3222_v18, %v2043_v31 }
0x4d05   :  { %v2046_v42 = vmul.f32 %v2045_v41, %v3780_v40 }
0x4d07   :  { %2052 = vrot.lane.b32.xlu0 %v2046_v42, %s3335_s18  ;;  %2048 = vrot.lane.b32.xlu1 %v2046_v42, %s3336_s19 }
0x4d79   :  { %v2049_v44 = vpop.permute.xlu1 %2048  ;;  %v2053_v45 = vpop.permute.xlu0 %2052 }
0x4d7a   :  { %v2051_v11 = vadd.f32 %v2049_v44, %v2046_v42 }
0x4d7c   :  { %v2055_v48 = vadd.f32 %v2053_v45, %v2051_v11 }
0x4d7e   :  { %2057 = vrot.lane.b32.xlu1 %v2055_v48, %s3335_s18 }
0x4df0   :  { %v2058_v51 = vpop.permute.xlu1 %2057 }
0x4df1   :  { %v4084_v34 = vadd.f32 %v2058_v51, %v2051_v11 }
0x4df3   :  { %2068 = vperm.xlu0 %3065, %v4084_v34  }
0x4e72   :  { %v2069_v54 = vpop.permute.xlu0 %2068 }
0x4e73   :  { %v2071_v17 = vmul.f32 %v2069_v54, %v3763_v19 }
0x4e75   :  { %v2072_v56 = vadd.f32 %v2071_v17, %v2066_v39 }
0x4e77   :  { %v2995_v60 = vmul.f32 -1.442695, %v2072_v56  ;;  %v2170_v56 = vld [vmem:[#allocation2 + $0x30] sm:$0xf] }
0x4e79   :  { %3225 = vpow2.f32 %v2995_v60 }
0x4e83   :  { %v3226_v28 = vpop.eup %3225 }
0x4e84   :  { %v2076_v61 = vadd.f32 1.0, %v3226_v28 }
0x4e86   :  { %3227 = vrcp.f32 %v2076_v61 }
0x4e90   :  { %v3228_v62 = vpop.eup %3227 }
0x4e91   :  { %v2079_v63 = vmul.f32 2.0, %v3228_v62  ;;  %v2081_v5 = vmul.f32 %v3228_v62, %v2039_v6 }
0x4e93   :  { %v2996_v4 = vadd.f32 -1.0, %v2079_v63 }
0x4e95   :  { %2083 = vrot.lane.b32.xlu1 %v2996_v4, %s3331_s10 }
0x4f07   :  { %v2084_v9 = vpop.permute.xlu1 %2083 }
0x4f08   :  { %v2086_v59 = vmul.f32 %v3228_v62, %v2084_v9 }
0x4f0a   :  { %2088 = vrot.lane.b32.xlu0 %v2086_v59, %s3332_s11 }
0x4f7c   :  { %v2089_v37 = vpop.permute.xlu0 %2088 }
0x4f7d   :  { %v2091_v10 = vadd.f32 %v2089_v37, %v2081_v5 }
0x4f7f   :  { %3229 = vtanh.f32 %v2091_v10 }
0x4f89   :  { %v3230_v38 = vpop.eup %3229 }
0x4f8a   :  { %2094 = vrot.lane.b32.xlu1 %v3230_v38, %s3334_s17 }
0x4ffc   :  { %v2095_v7 = vpop.permute.xlu1 %2094 }
0x4ffd   :  { %v2097_v12 = vmul.f32 %v3228_v62, %v2095_v7 }
0x4fff   :  { %v2098_v33 = vmul.f32 %v2097_v12, %v3780_v40 }
0x5001   :  { %2104 = vrot.lane.b32.xlu1 %v2098_v33, %s3335_s18  ;;  %2100 = vrot.lane.b32.xlu0 %v2098_v33, %s3336_s19 }
0x5073   :  { %v2101_v3 = vpop.permute.xlu0 %2100  ;;  %v2105_v21 = vpop.permute.xlu1 %2104 }
0x5074   :  { %v2103_v13 = vadd.f32 %v2101_v3, %v2098_v33 }
0x5076   :  { %v2107_v53 = vadd.f32 %v2105_v21, %v2103_v13 }
0x5078   :  { %2109 = vrot.lane.b32.xlu0 %v2107_v53, %s3335_s18 }
0x50ea   :  { %v2110_v43 = vpop.permute.xlu0 %2109 }
0x50eb   :  { %v4095_v46 = vadd.f32 %v2110_v43, %v2103_v13 }
0x50ed   :  { %2120 = vperm.xlu1 %3066, %v4095_v46  }
0x516c   :  { %v2121_v16 = vpop.permute.xlu1 %2120 }
0x516d   :  { %v2123_v35 = vmul.f32 %v2121_v16, %v3763_v19 }
0x516f   :  { %v2124_v22 = vadd.f32 %v2123_v35, %v2118_v20 }
0x5171   :  { %v2997_v14 = vmul.f32 -1.442695, %v2124_v22 }
0x5173   :  { %3231 = vpow2.f32 %v2997_v14  ;;  %v2222_v14 = vld [vmem:[#allocation2 + $0x34] sm:$0xf] }
0x517d   :  { %v3232_v25 = vpop.eup %3231 }
0x517e   :  { %v2128_v26 = vadd.f32 1.0, %v3232_v25 }
0x5180   :  { %3233 = vrcp.f32 %v2128_v26 }
0x518a   :  { %v3234_v18 = vpop.eup %3233 }
0x518b   :  { %v2131_v27 = vmul.f32 2.0, %v3234_v18  ;;  %v2133_v24 = vmul.f32 %v3234_v18, %v2091_v10 }
0x518d   :  { %v2998_v36 = vadd.f32 -1.0, %v2131_v27 }
0x518f   :  { %2135 = vrot.lane.b32.xlu0 %v2998_v36, %s3331_s10 }
0x5201   :  { %v2136_v2 = vpop.permute.xlu0 %2135 }
0x5202   :  { %v2138_v30 = vmul.f32 %v3234_v18, %v2136_v2 }
0x5204   :  { %2140 = vrot.lane.b32.xlu1 %v2138_v30, %s3332_s11 }
0x5276   :  { %v2141_v50 = vpop.permute.xlu1 %2140 }
0x5277   :  { %v2143_v6 = vadd.f32 %v2141_v50, %v2133_v24 }
0x5279   :  { %3235 = vtanh.f32 %v2143_v6 }
0x5283   :  { %v3236_v58 = vpop.eup %3235 }
0x5284   :  { %2146 = vrot.lane.b32.xlu0 %v3236_v58, %s3334_s17 }
0x52f6   :  { %v2147_v31 = vpop.permute.xlu0 %2146 }
0x52f7   :  { %v2149_v41 = vmul.f32 %v3234_v18, %v2147_v31 }
0x52f9   :  { %v2150_v42 = vmul.f32 %v2149_v41, %v3780_v40 }
0x52fb   :  { %2156 = vrot.lane.b32.xlu0 %v2150_v42, %s3335_s18  ;;  %2152 = vrot.lane.b32.xlu1 %v2150_v42, %s3336_s19 }
0x536d   :  { %v2153_v44 = vpop.permute.xlu1 %2152  ;;  %v2157_v45 = vpop.permute.xlu0 %2156 }
0x536e   :  { %v2155_v11 = vadd.f32 %v2153_v44, %v2150_v42 }
0x5370   :  { %v2159_v48 = vadd.f32 %v2157_v45, %v2155_v11 }
0x5372   :  { %2161 = vrot.lane.b32.xlu1 %v2159_v48, %s3335_s18 }
0x53e4   :  { %v2162_v51 = vpop.permute.xlu1 %2161 }
0x53e5   :  { %v4106_v54 = vadd.f32 %v2162_v51, %v2155_v11 }
0x53e7   :  { %2172 = vperm.xlu0 %3065, %v4106_v54  }
0x5466   :  { %v2173_v17 = vpop.permute.xlu0 %2172 }
0x5467   :  { %v2175_v39 = vmul.f32 %v2173_v17, %v3763_v19 }
0x5469   :  { %v2176_v60 = vadd.f32 %v2175_v39, %v2170_v56 }
0x546b   :  { %v2999_v28 = vmul.f32 -1.442695, %v2176_v60 }
0x546d   :  { %3237 = vpow2.f32 %v2999_v28 }
0x5477   :  { %v3238_v61 = vpop.eup %3237 }
0x5478   :  { %v2180_v62 = vadd.f32 1.0, %v3238_v61  ;;  %v2274_v61 = vld [vmem:[#allocation2 + $0x38] sm:$0xf] }
0x547a   :  { %3239 = vrcp.f32 %v2180_v62 }
0x5484   :  { %v3240_v63 = vpop.eup %3239 }
0x5485   :  { %v2183_v4 = vmul.f32 2.0, %v3240_v63  ;;  %v2185_v37 = vmul.f32 %v3240_v63, %v2143_v6 }
0x5487   :  { %v3000_v9 = vadd.f32 -1.0, %v2183_v4 }
0x5489   :  { %2187 = vrot.lane.b32.xlu1 %v3000_v9, %s3331_s10 }
0x54fb   :  { %v2188_v59 = vpop.permute.xlu1 %2187 }
0x54fc   :  { %v2190_v5 = vmul.f32 %v3240_v63, %v2188_v59 }
0x54fe   :  { %2192 = vrot.lane.b32.xlu0 %v2190_v5, %s3332_s11 }
0x5570   :  { %v2193_v10 = vpop.permute.xlu0 %2192 }
0x5571   :  { %v2195_v38 = vadd.f32 %v2193_v10, %v2185_v37 }
0x5573   :  { %3241 = vtanh.f32 %v2195_v38 }
0x557d   :  { %v3242_v7 = vpop.eup %3241 }
0x557e   :  { %2198 = vrot.lane.b32.xlu1 %v3242_v7, %s3334_s17 }
0x55f0   :  { %v2199_v12 = vpop.permute.xlu1 %2198 }
0x55f1   :  { %v2201_v33 = vmul.f32 %v3240_v63, %v2199_v12 }
0x55f3   :  { %v2202_v3 = vmul.f32 %v2201_v33, %v3780_v40 }
0x55f5   :  { %2208 = vrot.lane.b32.xlu1 %v2202_v3, %s3335_s18  ;;  %2204 = vrot.lane.b32.xlu0 %v2202_v3, %s3336_s19 }
0x5667   :  { %v2205_v13 = vpop.permute.xlu0 %2204  ;;  %v2209_v53 = vpop.permute.xlu1 %2208 }
0x5668   :  { %v2207_v21 = vadd.f32 %v2205_v13, %v2202_v3 }
0x566a   :  { %v2211_v43 = vadd.f32 %v2209_v53, %v2207_v21 }
0x566c   :  { %2213 = vrot.lane.b32.xlu0 %v2211_v43, %s3335_s18 }
0x56de   :  { %v2214_v16 = vpop.permute.xlu0 %2213 }
0x56df   :  { %v4117_v35 = vadd.f32 %v2214_v16, %v2207_v21 }
0x56e1   :  { %2224 = vperm.xlu1 %3066, %v4117_v35  }
0x5760   :  { %v2225_v20 = vpop.permute.xlu1 %2224 }
0x5761   :  { %v2227_v22 = vmul.f32 %v2225_v20, %v3763_v19 }
0x5763   :  { %v2228_v25 = vadd.f32 %v2227_v22, %v2222_v14 }
0x5765   :  { %v3001_v26 = vmul.f32 -1.442695, %v2228_v25 }
0x5767   :  { %3243 = vpow2.f32 %v3001_v26 }
0x5771   :  { %v3244_v18 = vpop.eup %3243 }
0x5772   :  { %v2232_v27 = vadd.f32 1.0, %v3244_v18 }
0x5774   :  { %3245 = vrcp.f32 %v2232_v27  ;;  %v2326_v27 = vld [vmem:[#allocation2 + $0x3c] sm:$0xf] }
0x577e   :  { %v3246_v36 = vpop.eup %3245 }
0x577f   :  { %v2235_v2 = vmul.f32 2.0, %v3246_v36  ;;  %v2237_v6 = vmul.f32 %v3246_v36, %v2195_v38 }
0x5781   :  { %v3002_v30 = vadd.f32 -1.0, %v2235_v2 }
0x5783   :  { %2239 = vrot.lane.b32.xlu0 %v3002_v30, %s3331_s10 }
0x57f5   :  { %v2240_v24 = vpop.permute.xlu0 %2239 }
0x57f6   :  { %v2242_v50 = vmul.f32 %v3246_v36, %v2240_v24 }
0x57f8   :  { %2244 = vrot.lane.b32.xlu1 %v2242_v50, %s3332_s11 }
0x586a   :  { %v2245_v58 = vpop.permute.xlu1 %2244 }
0x586b   :  { %v2247_v31 = vadd.f32 %v2245_v58, %v2237_v6 }
0x586d   :  { %3247 = vtanh.f32 %v2247_v31 }
0x5877   :  { %v3248_v41 = vpop.eup %3247 }
0x5878   :  { %2250 = vrot.lane.b32.xlu0 %v3248_v41, %s3334_s17 }
0x58ea   :  { %v2251_v42 = vpop.permute.xlu0 %2250 }
0x58eb   :  { %v2253_v44 = vmul.f32 %v3246_v36, %v2251_v42 }
0x58ed   :  { %v2254_v11 = vmul.f32 %v2253_v44, %v3780_v40 }
0x58ef   :  { %2260 = vrot.lane.b32.xlu0 %v2254_v11, %s3335_s18  ;;  %2256 = vrot.lane.b32.xlu1 %v2254_v11, %s3336_s19 }
0x5961   :  { %v2257_v45 = vpop.permute.xlu1 %2256  ;;  %v2261_v51 = vpop.permute.xlu0 %2260 }
0x5962   :  { %v2259_v48 = vadd.f32 %v2257_v45, %v2254_v11 }
0x5964   :  { %v2263_v17 = vadd.f32 %v2261_v51, %v2259_v48 }
0x5966   :  { %2265 = vrot.lane.b32.xlu1 %v2263_v17, %s3335_s18 }
0x59d8   :  { %v2266_v39 = vpop.permute.xlu1 %2265 }
0x59d9   :  { %v4128_v56 = vadd.f32 %v2266_v39, %v2259_v48 }
0x59db   :  { %2276 = vperm.xlu0 %3065, %v4128_v56  }
0x59df   :  { %3068 = vset.pattern.permute.xlu0 %v3338_v15 }
0x5a5a   :  { %v2277_v60 = vpop.permute.xlu0 %2276 }
0x5a5b   :  { %v2279_v28 = vmul.f32 %v2277_v60, %v3763_v19 }
0x5a5d   :  { %v2280_v62 = vadd.f32 %v2279_v28, %v2274_v61 }
0x5a5f   :  { %v3003_v63 = vmul.f32 -1.442695, %v2280_v62 }
0x5a61   :  { %3249 = vpow2.f32 %v3003_v63 }
0x5a6b   :  { %v3250_v4 = vpop.eup %3249 }
0x5a6c   :  { %v2284_v9 = vadd.f32 1.0, %v3250_v4 }
0x5a6e   :  { %3251 = vrcp.f32 %v2284_v9 }
0x5a78   :  { %v3252_v59 = vpop.eup %3251 }
0x5a79   :  { %v2287_v5 = vmul.f32 2.0, %v3252_v59  ;;  %v2289_v7 = vmul.f32 %v3252_v59, %v2247_v31 }
0x5a7b   :  { %v3004_v37 = vadd.f32 -1.0, %v2287_v5 }
0x5a7d   :  { %2291 = vrot.lane.b32.xlu1 %v3004_v37, %s3331_s10 }
0x5aef   :  { %v2292_v10 = vpop.permute.xlu1 %2291 }
0x5af0   :  { %v2294_v38 = vmul.f32 %v3252_v59, %v2292_v10 }
0x5af2   :  { %2296 = vrot.lane.b32.xlu0 %v2294_v38, %s3332_s11 }
0x5b64   :  { %v2297_v12 = vpop.permute.xlu0 %2296 }
0x5b65   :  { %v2299_v33 = vadd.f32 %v2297_v12, %v2289_v7 }
0x5b67   :  { %3253 = vtanh.f32 %v2299_v33 }
0x5b71   :  { %v3254_v3 = vpop.eup %3253 }
0x5b72   :  { %2302 = vrot.lane.b32.xlu1 %v3254_v3, %s3334_s17 }
0x5be4   :  { %v2303_v13 = vpop.permute.xlu1 %2302 }
0x5be5   :  { %v2305_v21 = vmul.f32 %v3252_v59, %v2303_v13 }
0x5be7   :  { %v2306_v53 = vmul.f32 %v2305_v21, %v3780_v40 }
0x5be9   :  { %2312 = vrot.lane.b32.xlu1 %v2306_v53, %s3335_s18  ;;  %2308 = vrot.lane.b32.xlu0 %v2306_v53, %s3336_s19 }
0x5c5b   :  { %v2309_v43 = vpop.permute.xlu0 %2308  ;;  %v2313_v20 = vpop.permute.xlu1 %2312 }
0x5c5c   :  { %v2311_v16 = vadd.f32 %v2309_v43, %v2306_v53 }
0x5c5e   :  { %v2315_v22 = vadd.f32 %v2313_v20, %v2311_v16 }
0x5c60   :  { %2317 = vrot.lane.b32.xlu0 %v2315_v22, %s3335_s18 }
0x5cd2   :  { %v2318_v14 = vpop.permute.xlu0 %2317 }
0x5cd3   :  { %v2320_v25 = vadd.f32 %v2318_v14, %v2311_v16 }
0x5cd5   :  { %2328 = vperm.xlu1 %3066, %v2320_v25  }
0x5cd9   :  { %3067 = vset.pattern.permute.xlu1 %v3338_v15 }
0x5d54   :  { %v2329_v26 = vpop.permute.xlu1 %2328 }
0x5d55   :  { %v2331_v18 = vmul.f32 %v2329_v26, %v3763_v19 }
0x5d57   :  { %v2332_v36 = vadd.f32 %v2331_v18, %v2326_v27 }
0x5d59   :  { %v3005_v2 = vmul.f32 -1.442695, %v2332_v36 }
0x5d5b   :  { %3255 = vpow2.f32 %v3005_v2 }
0x5d65   :  { %v3256_v30 = vpop.eup %3255 }
0x5d66   :  { %v2336_v24 = vadd.f32 1.0, %v3256_v30 }
0x5d68   :  { %3257 = vrcp.f32 %v2336_v24 }
0x5d72   :  { %v3258_v50 = vpop.eup %3257 }
0x5d73   :  { %v2339_v6 = vmul.f32 2.0, %v3258_v50  ;;  %v2341_v15 = vmul.f32 %v3258_v50, %v2299_v33 }
0x5d75   :  { %v3006_v58 = vadd.f32 -1.0, %v2339_v6 }
0x5d77   :  { %2343 = vrot.lane.b32.xlu0 %v3006_v58, %s3331_s10 }
0x5de9   :  { %v2344_v31 = vpop.permute.xlu0 %2343 }
0x5dea   :  { %v2346_v41 = vmul.f32 %v3258_v50, %v2344_v31 }
0x5dec   :  { %2348 = vrot.lane.b32.xlu1 %v2346_v41, %s3332_s11 }
0x5e5e   :  { %v2349_v42 = vpop.permute.xlu1 %2348 }
0x5e5f   :  { %v2351_v44 = vadd.f32 %v2349_v42, %v2341_v15 }
0x5e61   :  { %3259 = vtanh.f32 %v2351_v44 }
0x5e6b   :  { %v3260_v19 = vpop.eup %3259 }
0x5e6c   :  { %2354 = vrot.lane.b32.xlu0 %v3260_v19, %s3334_s17 }
0x5ede   :  { %v2355_v11 = vpop.permute.xlu0 %2354 }
0x5edf   :  { %v2357_v45 = vmul.f32 %v3258_v50, %v2355_v11 }
0x5ee1   :  { %v2358_v48 = vmul.f32 %v2357_v45, %v3780_v40 }
0x5ee3   :  { %2364 = vrot.lane.b32.xlu0 %v2358_v48, %s3335_s18  ;;  %2360 = vrot.lane.b32.xlu1 %v2358_v48, %s3336_s19 }
0x5ee7   :  { %1906 = vrot.lane.b32.xlu0 %v4028_v52, %s3339_s0 }
0x5eeb   :  { %2322 = vrot.lane.b32.xlu0 %v2320_v25, %s3339_s0 }
0x5eef   :  { %1854 = vrot.lane.b32.xlu0 %v3988_v29, %s3339_s0 }
0x5ef3   :  { %1594 = vrot.lane.b32.xlu0 %v3793_v23, %s3339_s0 }
0x5ef7   :  { %1802 = vrot.lane.b32.xlu0 %v3949_v49, %s3339_s0 }
0x5efb   :  { %2062 = vrot.lane.b32.xlu0 %v4084_v34, %s3339_s0 }
0x5eff   :  { %1698 = vrot.lane.b32.xlu0 %v3871_v32, %s3339_s0 }
0x5f03   :  { %2114 = vrot.lane.b32.xlu0 %v4095_v46, %s3339_s0 }
0x5f55   :  { %v2365_v40 = vpop.permute.xlu0 %2364  ;;  %v2361_v52 = vpop.permute.xlu1 %2360 }
0x5f56   :  { %v2363_v51 = vadd.f32 %v2361_v52, %v2358_v48 }
0x5f58   :  { %v2367_v17 = vadd.f32 %v2365_v40, %v2363_v51 }
0x5f59   :  { %v1907_v29 = vpop.permute.xlu0 %1906 }
0x5f5a   :  { %1909 = vst.msk [vmem:[#allocation3 + $0x18] sm:$0xf] %vm282_vm2, %v1907_v29  ;;  %2369 = vrot.lane.b32.xlu1 %v2367_v17, %s3335_s18 }
0x5f5d   :  { %v2323_v23 = vpop.permute.xlu0 %2322 }
0x5f5e   :  { %2325 = vst.msk [vmem:[#allocation3 + $0x38] sm:$0xf] %vm282_vm2, %v2323_v23  ;;  %1958 = vrot.lane.b32.xlu1 %v4062_v55, %s3339_s0 }
0x5f61   :  { %v1855_v49 = vpop.permute.xlu0 %1854  ;;  %v2384_v60 = vld [vmem:[#allocation3 + $0x18] sm:$0xf] }
0x5f62   :  { %1857 = vst.msk [vmem:[#allocation3 + $0x14] sm:$0xf] %vm282_vm2, %v1855_v49  ;;  %2270 = vrot.lane.b32.xlu1 %v4128_v56, %s3339_s0  ;;  %v2419_v58 = vrot.slane %v2384_v60, 2 }
0x5f65   :  { %v1595_v32 = vpop.permute.xlu0 %1594  ;;  %v4194_v5 = vld [vmem:[#allocation3 + $0x38] sm:$0xf] }
0x5f66   :  { %1597 = vst.msk [vmem:[#allocation3] sm:$0xf] %vm282_vm2, %v1595_v32  ;;  %1646 = vrot.lane.b32.xlu1 %v3832_v57, %s3339_s0  ;;  %v2411_v12 = vrot.slane %v4194_v5, 2 }
0x5f69   :  { %v1803_v34 = vpop.permute.xlu0 %1802 }
0x5f6a   :  { %1805 = vst.msk [vmem:[#allocation3 + $0x10] sm:$0xf] %vm282_vm2, %v1803_v34  ;;  %2010 = vrot.lane.b32.xlu1 %v4073_v47, %s3339_s0  ;;  %v2383_v47 = vld [vmem:[#allocation3 + $0x14] sm:$0xf] }
0x5f6b   :  { %v2420_v61 = vrot.slane %v2383_v47, 2 }
0x5f6d   :  { %v2063_v46 = vpop.permute.xlu0 %2062 }
0x5f6e   :  { %2065 = vst.msk [vmem:[#allocation3 + $0x24] sm:$0xf] %vm282_vm2, %v2063_v46  ;;  %2218 = vrot.lane.b32.xlu1 %v4117_v35, %s3339_s0 }
0x5f71   :  { %v1699_v55 = vpop.permute.xlu0 %1698 }
0x5f72   :  { %1701 = vst.msk [vmem:[#allocation3 + $0x8] sm:$0xf] %vm282_vm2, %v1699_v55  ;;  %1750 = vrot.lane.b32.xlu1 %v3910_v8, %s3339_s0 }
0x5f75   :  { %v2387_v39 = vld [vmem:[#allocation3 + $0x24] sm:$0xf]  ;;  %v2115_v57 = vpop.permute.xlu0 %2114 }
0x5f76   :  { %v2416_v56 = vrot.slane %v2387_v39, 2  ;;  %2117 = vst.msk [vmem:[#allocation3 + $0x28] sm:$0xf] %vm282_vm2, %v2115_v57  ;;  %v2451_v42 = vadd.f32 %v2419_v58, %v2387_v39 }
0x5f78   :  { %v4184_v28 = vadd.f32 %v2416_v56, %v2384_v60  ;;  %v2483_v52 = vmul.f32 2.0, %v2451_v42 }
0x5f79   :  { %v4200_v7 = vld [vmem:[#allocation3 + $0x8] sm:$0xf] }
0x5f7a   :  { %v3016_v34 = vadd.f32 -1.0, %v2483_v52 }
0x5f7c   :  { %v3032_v39 = vmul.f32 -1.442695, %v3016_v34 }
0x5f7d   :  { %v2388_v62 = vld [vmem:[#allocation3 + $0x28] sm:$0xf] }
0x5f7e   :  { %v4186_v63 = vadd.f32 %v2420_v61, %v2388_v62  ;;  %v2415_v33 = vrot.slane %v2388_v62, 2 }
0x5f80   :  { %v2447_v22 = vadd.f32 %v2415_v33, %v2383_v47  ;;  %v2423_v33 = vrot.slane %v4200_v7, 2 }
0x5f82   :  { %v2479_v24 = vmul.f32 2.0, %v2447_v22 }
0x5f84   :  { %v3012_v41 = vadd.f32 -1.0, %v2479_v24 }
0x5f86   :  { %v3028_v40 = vmul.f32 -1.442695, %v3012_v41 }
0x5fcc   :  { %v2370_v35 = vpop.permute.xlu1 %2369 }
0x5fcd   :  { %v2372_v4 = vadd.f32 %v2370_v35, %v2363_v51 }
0x5fcf   :  { %2374 = vrot.lane.b32.xlu1 %v2372_v4, %s3339_s0 }
0x5fd0   :  { %v1959_v9 = vpop.permute.xlu1 %1958 }
0x5fd1   :  { %1961 = vst.msk [vmem:[#allocation3 + $0x1c] sm:$0xf] %vm282_vm2, %v1959_v9 }
0x5fd3   :  { %2166 = vrot.lane.b32.xlu1 %v4106_v54, %s3339_s0 }
0x5fd4   :  { %v2271_v8 = vpop.permute.xlu1 %2270 }
0x5fd5   :  { %2273 = vst.msk [vmem:[#allocation3 + $0x34] sm:$0xf] %vm282_vm2, %v2271_v8 }
0x5fd8   :  { %v1647_v59 = vpop.permute.xlu1 %1646  ;;  %v2385_v21 = vld [vmem:[#allocation3 + $0x1c] sm:$0xf] }
0x5fd9   :  { %1649 = vst.msk [vmem:[#allocation3 + $0x4] sm:$0xf] %vm282_vm2, %v1647_v59  ;;  %v2418_v14 = vrot.slane %v2385_v21, 2 }
0x5fdc   :  { %v4196_v37 = vld [vmem:[#allocation3 + $0x34] sm:$0xf]  ;;  %v2011_v10 = vpop.permute.xlu1 %2010 }
0x5fdd   :  { %v2412_v38 = vrot.slane %v4196_v37, 2  ;;  %2013 = vst.msk [vmem:[#allocation3 + $0x20] sm:$0xf] %vm282_vm2, %v2011_v10 }
0x5fdf   :  { %v2444_v54 = vadd.f32 %v2412_v38, %v4200_v7 }
0x5fe0   :  { %v4204_v3 = vld [vmem:[#allocation3 + $0x4] sm:$0xf]  ;;  %v2219_v13 = vpop.permute.xlu1 %2218 }
0x5fe1   :  { %v2476_v53 = vmul.f32 2.0, %v2444_v54  ;;  %v2443_v43 = vadd.f32 %v2411_v12, %v4204_v3  ;;  %2221 = vst.msk [vmem:[#allocation3 + $0x30] sm:$0xf] %vm282_vm2, %v2219_v13  ;;  %v2455_v13 = vadd.f32 %v2423_v33, %v4196_v37  ;;  %v2484_v37 = vmul.f32 2.0, %v4186_v63 }
0x5fe3   :  { %v3009_v16 = vadd.f32 -1.0, %v2476_v53  ;;  %v2475_v20 = vmul.f32 2.0, %v2443_v43  ;;  %v2382_v53 = vld [vmem:[#allocation3 + $0x10] sm:$0xf]  ;;  %v2487_v43 = vmul.f32 2.0, %v2455_v13 }
0x5fe4   :  { %v2386_v25 = vld [vmem:[#allocation3 + $0x20] sm:$0xf]  ;;  %v1751_v26 = vpop.permute.xlu1 %1750 }
0x5fe5   :  { %v3025_v18 = vmul.f32 -1.442695, %v3009_v16  ;;  %v3008_v27 = vadd.f32 -1.0, %v2475_v20  ;;  %1753 = vst.msk [vmem:[#allocation3 + $0xc] sm:$0xf] %vm282_vm2, %v1751_v26  ;;  %v2417_v36 = vrot.slane %v2386_v25, 2  ;;  %v4209_v2 = vadd.f32 %v2418_v14, %v2386_v25 }
0x5fe6   :  { %v2480_v16 = vmul.f32 2.0, %v4184_v28  ;;  %v2421_v20 = vrot.slane %v2382_v53, 2  ;;  %v3020_v22 = vadd.f32 -1.0, %v2487_v43  ;;  %v3017_v28 = vadd.f32 -1.0, %v2484_v37 }
0x5fe7   :  { %v3024_v30 = vmul.f32 -1.442695, %v3008_v27  ;;  %3261 = vpow2.f32 %v3025_v18  ;;  %v2449_v6 = vadd.f32 %v2417_v36, %v2385_v21  ;;  %v2482_v27 = vmul.f32 2.0, %v4209_v2 }
0x5fe8   :  { %v2390_v50 = vld [vmem:[#allocation3 + $0x30] sm:$0xf]  ;;  %v3013_v18 = vadd.f32 -1.0, %v2480_v16  ;;  %v3036_v7 = vmul.f32 -1.442695, %v3020_v22 }
0x5fe9   :  { %3263 = vpow2.f32 %v3024_v30  ;;  %v2413_v31 = vrot.slane %v2390_v50, 2  ;;  %v2481_v44 = vmul.f32 2.0, %v2449_v6  ;;  %v3015_v58 = vadd.f32 -1.0, %v2482_v27 }
0x5fea   :  { %3265 = vpow2.f32 %v3028_v40  ;;  %v3029_v6 = vmul.f32 -1.442695, %v3013_v18  ;;  %v3033_v2 = vmul.f32 -1.442695, %v3017_v28 }
0x5feb   :  { %v3014_v51 = vadd.f32 -1.0, %v2481_v44  ;;  %v3031_v42 = vmul.f32 -1.442695, %v3015_v58 }
0x5fec   :  { %v2381_v15 = vld [vmem:[#allocation3 + $0xc] sm:$0xf] }
0x5fed   :  { %v2422_v19 = vrot.slane %v2381_v15, 2  ;;  %v2445_v11 = vadd.f32 %v2413_v31, %v2381_v15  ;;  %v3030_v46 = vmul.f32 -1.442695, %v3014_v51 }
0x5fef   :  { %v4211_v45 = vadd.f32 %v2422_v19, %v2390_v50  ;;  %v2477_v48 = vmul.f32 2.0, %v2445_v11 }
0x5ff1   :  { %v3010_v17 = vadd.f32 -1.0, %v2477_v48  ;;  %v3262_v29 = vpop.eup %3261  ;;  %v2486_v44 = vmul.f32 2.0, %v4211_v45 }
0x5ff2   :  { %v2556_v55 = vadd.f32 1.0, %v3262_v29 }
0x5ff3   :  { %v3264_v23 = vpop.eup %3263  ;;  %v3026_v49 = vmul.f32 -1.442695, %v3010_v17  ;;  %v3019_v19 = vadd.f32 -1.0, %v2486_v44 }
0x5ff4   :  { %v2555_v32 = vadd.f32 1.0, %v3264_v23  ;;  %v3266_v57 = vpop.eup %3265 }
0x5ff5   :  { %3267 = vpow2.f32 %v3026_v49  ;;  %v2559_v61 = vadd.f32 1.0, %v3266_v57  ;;  %v3035_v40 = vmul.f32 -1.442695, %v3019_v19  ;;  %v2424_v57 = vrot.slane %v4204_v3, 2 }
0x5ff6   :  { %3269 = vrcp.f32 %v2555_v32  ;;  %v2378_v32 = vld [vmem:[#allocation3] sm:$0xf] }
0x5ff7   :  { %3271 = vpow2.f32 %v3030_v46 }
0x5ff8   :  { %3273 = vrcp.f32 %v2556_v55 }
0x5ff9   :  { %3275 = vpow2.f32 %v3032_v39  ;;  %v2425_v39 = vrot.slane %v2378_v32, 2 }
0x5fff   :  { %v3268_v56 = vpop.eup %3267 }
0x6000   :  { %v4213_v60 = vpop.eup %3269  ;;  %v2557_v47 = vadd.f32 1.0, %v3268_v56 }
0x6001   :  { %2622 = vperm.xlu1 %3067, %v4213_v60   ;;  %v3272_v62 = vpop.eup %3271 }
0x6002   :  { %3277 = vrcp.f32 %v2557_v47  ;;  %v4216_v35 = vpop.eup %3273  ;;  %v2561_v4 = vadd.f32 1.0, %v3272_v62 }
0x6003   :  { %3279 = vrcp.f32 %v2559_v61  ;;  %v3276_v9 = vpop.eup %3275 }
0x6004   :  { %v2563_v8 = vadd.f32 1.0, %v3276_v9  ;;  %3281 = vrcp.f32 %v2561_v4  ;;  %v2456_v4 = vadd.f32 %v2424_v57, %v4194_v5  ;;  %v2759_v5 = vsub.f32 1.0, %v4213_v60 }
0x6005   :  { %2625 = vperm.xlu1 %3067, %v4216_v35  }
0x6006   :  { %3283 = vrcp.f32 %v2563_v8 }
0x6007   :  { %3285 = vpow2.f32 %v3036_v7 }
0x600c   :  { %v4219_v59 = vpop.eup %3277 }
0x600d   :  { %2628 = vperm.xlu0 %3068, %v4219_v59   ;;  %v4222_v10 = vpop.eup %3279 }
0x600e   :  { %v4225_v38 = vpop.eup %3281  ;;  %v2763_v19 = vsub.f32 1.0, %v4222_v10 }
0x6010   :  { %v4228_v12 = vpop.eup %3283 }
0x6011   :  { %2634 = vperm.xlu0 %3068, %v4222_v10   ;;  %v3286_v63 = vpop.eup %3285  ;;  %v2767_v18 = vsub.f32 1.0, %v4228_v12 }
0x6012   :  { %v2567_v23 = vadd.f32 1.0, %v3286_v63 }
0x6015   :  { %2640 = vperm.xlu0 %3068, %v4225_v38  }
0x6019   :  { %2646 = vperm.xlu0 %3068, %v4228_v12   ;;  %v2760_v12 = vsub.f32 1.0, %v4216_v35 }
0x6041   :  { %v2375_v54 = vpop.permute.xlu1 %2374 }
0x6042   :  { %2377 = vst.msk [vmem:[#allocation3 + $0x3c] sm:$0xf] %vm282_vm2, %v2375_v54 }
0x6045   :  { %v2167_v21 = vpop.permute.xlu1 %2166 }
0x6046   :  { %2169 = vst.msk [vmem:[#allocation3 + $0x2c] sm:$0xf] %vm282_vm2, %v2167_v21  ;;  %v2488_v21 = vmul.f32 2.0, %v2456_v4  ;;  %v2667_v4 = vand.u32 127, %v25_v0 }
0x6048   :  { %v3021_v22 = vadd.f32 -1.0, %v2488_v21 }
0x6049   :  { %v2393_v11 = vld [vmem:[#allocation3 + $0x3c] sm:$0xf] }
0x604a   :  { %v2410_v29 = vrot.slane %v2393_v11, 2  ;;  %v2457_v47 = vadd.f32 %v2425_v39, %v2393_v11 }
0x604c   :  { %v2442_v46 = vadd.f32 %v2410_v29, %v2378_v32  ;;  %v2489_v54 = vmul.f32 2.0, %v2457_v47 }
0x604d   :  { %v2389_v14 = vld [vmem:[#allocation3 + $0x2c] sm:$0xf] }
0x604e   :  { %v2414_v25 = vrot.slane %v2389_v14, 2  ;;  %v2453_v26 = vadd.f32 %v2421_v20, %v2389_v14  ;;  %v2474_v61 = vmul.f32 2.0, %v2442_v46  ;;  %v3022_v3 = vadd.f32 -1.0, %v2489_v54 }
0x604f   :  { %v4265_v54 = vsub.s32 %v2667_v4, %v3376_v1 }
0x6050   :  { %v2446_v36 = vadd.f32 %v2414_v25, %v2382_v53  ;;  %v2485_v30 = vmul.f32 2.0, %v2453_v26  ;;  %v3007_v33 = vadd.f32 -1.0, %v2474_v61  ;;  %v3038_v14 = vmul.f32 -1.442695, %v3022_v3 }
0x6051   :  { %v3037_v26 = vmul.f32 -1.442695, %v3021_v22 }
0x6052   :  { %v2478_v24 = vmul.f32 2.0, %v2446_v36  ;;  %v3018_v50 = vadd.f32 -1.0, %v2485_v30  ;;  %v3023_v16 = vmul.f32 -1.442695, %v3007_v33 }
0x6054   :  { %v3011_v31 = vadd.f32 -1.0, %v2478_v24  ;;  %v3034_v41 = vmul.f32 -1.442695, %v3018_v50 }
0x6056   :  { %v3027_v15 = vmul.f32 -1.442695, %v3011_v31  ;;  %3287 = vpow2.f32 %v3034_v41 }
0x6057   :  { %3289 = vpow2.f32 %v3029_v6 }
0x6058   :  { %3291 = vpow2.f32 %v3027_v15  ;;  %v2761_v15 = vsub.f32 1.0, %v4219_v59 }
0x6059   :  { %3293 = vpow2.f32 %v3031_v42 }
0x605a   :  { %3295 = vpow2.f32 %v3033_v2 }
0x6060   :  { %v3288_v48 = vpop.eup %3287 }
0x6061   :  { %v3290_v52 = vpop.eup %3289  ;;  %v2565_v51 = vadd.f32 1.0, %v3288_v48 }
0x6062   :  { %v3292_v17 = vpop.eup %3291  ;;  %v2560_v34 = vadd.f32 1.0, %v3290_v52 }
0x6063   :  { %v2558_v49 = vadd.f32 1.0, %v3292_v17  ;;  %3297 = vrcp.f32 %v2565_v51  ;;  %v3294_v45 = vpop.eup %3293 }
0x6064   :  { %3299 = vpow2.f32 %v3035_v40  ;;  %v3296_v55 = vpop.eup %3295  ;;  %v2562_v56 = vadd.f32 1.0, %v3294_v45  ;;  %v2765_v40 = vsub.f32 1.0, %v4225_v38 }
0x6065   :  { %3301 = vrcp.f32 %v2558_v49  ;;  %v2564_v62 = vadd.f32 1.0, %v3296_v55 }
0x6066   :  { %3303 = vrcp.f32 %v2567_v23 }
0x6067   :  { %3305 = vrcp.f32 %v2560_v34 }
0x6068   :  { %3307 = vrcp.f32 %v2562_v56 }
0x6069   :  { %3309 = vrcp.f32 %v2564_v62 }
0x606d   :  { %v3298_v9 = vpop.eup %3297 }
0x606e   :  { %v3300_v8 = vpop.eup %3299  ;;  %2652 = vperm.xlu0 %3068, %v3298_v9   ;;  %v2769_v60 = vsub.f32 1.0, %v3298_v9 }
0x606f   :  { %v3302_v13 = vpop.eup %3301  ;;  %v2566_v43 = vadd.f32 1.0, %v3300_v8 }
0x6070   :  { %2631 = vperm.xlu1 %3067, %v3302_v13   ;;  %v3304_v53 = vpop.eup %3303  ;;  %v2762_v44 = vsub.f32 1.0, %v3302_v13 }
0x6071   :  { %v3306_v20 = vpop.eup %3305  ;;  %3311 = vrcp.f32 %v2566_v43  ;;  %v2771_v41 = vsub.f32 1.0, %v3304_v53 }
0x6072   :  { %2658 = vperm.xlu0 %3068, %v3304_v53   ;;  %3313 = vpow2.f32 %v3023_v16  ;;  %v3308_v25 = vpop.eup %3307  ;;  %v2764_v42 = vsub.f32 1.0, %v3306_v20 }
0x6073   :  { %v3310_v27 = vpop.eup %3309  ;;  %3315 = vpow2.f32 %v3038_v14  ;;  %v2766_v37 = vsub.f32 1.0, %v3308_v25 }
0x6074   :  { %2637 = vperm.xlu1 %3067, %v3306_v20   ;;  %3317 = vpow2.f32 %v3037_v26  ;;  %v2768_v36 = vsub.f32 1.0, %v3310_v27 }
0x6076   :  { %2794 = vperm.xlu0 %3068, %v2759_v5  }
0x6078   :  { %2643 = vperm.xlu1 %3067, %v3308_v25  }
0x607a   :  { %2818 = vperm.xlu0 %3068, %v2767_v18  }
0x607b   :  { %v3312_v30 = vpop.eup %3311 }
0x607c   :  { %2649 = vperm.xlu1 %3067, %v3310_v27   ;;  %v3314_v7 = vpop.eup %3313  ;;  %v2770_v6 = vsub.f32 1.0, %v3312_v30 }
0x607d   :  { %v2554_v24 = vadd.f32 1.0, %v3314_v7  ;;  %v3316_v50 = vpop.eup %3315 }
0x607e   :  { %2821 = vperm.xlu0 %3068, %v2768_v36   ;;  %v3318_v58 = vpop.eup %3317  ;;  %v2569_v31 = vadd.f32 1.0, %v3316_v50 }
0x607f   :  { %3319 = vrcp.f32 %v2554_v24  ;;  %v2568_v28 = vadd.f32 1.0, %v3318_v58 }
0x6080   :  { %2655 = vperm.xlu1 %3067, %v3312_v30   ;;  %3321 = vrcp.f32 %v2569_v31  ;;  %v2623_v10 = vpop.permute.xlu1 %2622 }
0x6081   :  { %3323 = vrcp.f32 %v2568_v28  ;;  %v2675_v16 = vrot.slane %v2623_v10, %v4265_v54 }
0x6082   :  { %2824 = vperm.xlu0 %3068, %v2769_v60  }
0x6084   :  { %2815 = vperm.xlu1 %3067, %v2766_v37   ;;  %v2626_v23 = vpop.permute.xlu1 %2625 }
0x6085   :  { %v2679_v14 = vrot.slane %v2626_v23, %v4265_v54 }
0x6086   :  { %2827 = vperm.xlu0 %3068, %v2770_v6  }
0x6088   :  { %2797 = vperm.xlu1 %3067, %v2760_v12  }
0x6089   :  { %v3320_v2 = vpop.eup %3319 }
0x608a   :  { %2830 = vperm.xlu0 %3068, %v2771_v41   ;;  %v3322_v35 = vpop.eup %3321  ;;  %v2758_v48 = vsub.f32 1.0, %v3320_v2 }
0x608b   :  { %v3324_v63 = vpop.eup %3323  ;;  %v2773_v11 = vsub.f32 1.0, %v3322_v35 }
0x608c   :  { %2800 = vperm.xlu1 %3067, %v2761_v15   ;;  %v2772_v59 = vsub.f32 1.0, %v3324_v63  ;;  %v2629_v52 = vpop.permute.xlu0 %2628 }
0x608d   :  { %v2683_v27 = vrot.slane %v2629_v52, %v4265_v54 }
0x608e   :  { %2809 = vperm.xlu0 %3068, %v2764_v42  }
0x6090   :  { %2803 = vperm.xlu1 %3067, %v2762_v44   ;;  %v4247_v51 = vpop.permute.xlu0 %2634 }
0x6091   :  { %v2691_v36 = vrot.slane %v4247_v51, %v4265_v54 }
0x6092   :  { %2619 = vperm.xlu0 %3068, %v3320_v2  }
0x6094   :  { %2806 = vperm.xlu1 %3067, %v2763_v19   ;;  %v4249_v17 = vpop.permute.xlu0 %2640 }
0x6095   :  { %v2699_v30 = vrot.slane %v4249_v17, %v4265_v54 }
0x6096   :  { %2664 = vperm.xlu0 %3068, %v3322_v35  }
0x6098   :  { %2661 = vperm.xlu1 %3067, %v3324_v63   ;;  %v2647_v29 = vpop.permute.xlu0 %2646 }
0x6099   :  { %v2707_v43 = vrot.slane %v2647_v29, %v4265_v54 }
0x609a   :  { %2836 = vperm.xlu0 %3068, %v2773_v11  }
0x609c   :  { %2791 = vperm.xlu1 %3067, %v2758_v48  }
0x60a0   :  { %2833 = vperm.xlu1 %3067, %v2772_v59  }
0x60a4   :  { %2812 = vperm.xlu1 %3067, %v2765_v40  }
0x60ed   :  { %v2653_v49 = vpop.permute.xlu0 %2652 }
0x60ee   :  { %v2715_v25 = vrot.slane %v2653_v49, %v4265_v54 }
0x60ef   :  { %v2632_v32 = vpop.permute.xlu1 %2631 }
0x60f0   :  { %v2687_v60 = vrot.slane %v2632_v32, %v4265_v54 }
0x60f1   :  { %v4251_v34 = vpop.permute.xlu0 %2658 }
0x60f2   :  { %v2723_v31 = vrot.slane %v4251_v34, %v4265_v54 }
0x60f3   :  { %v2638_v45 = vpop.permute.xlu1 %2637 }
0x60f4   :  { %v2695_v41 = vrot.slane %v2638_v45, %v4265_v54 }
0x60f5   :  { %v4253_v46 = vpop.permute.xlu0 %2794 }
0x60f6   :  { %v2845_v10 = vrot.slane %v4253_v46, %v4265_v54 }
0x60f7   :  { %v2644_v55 = vpop.permute.xlu1 %2643 }
0x60f8   :  { %v2703_v13 = vrot.slane %v2644_v55, %v4265_v54 }
0x60f9   :  { %v2819_v39 = vpop.permute.xlu0 %2818 }
0x60fa   :  { %v2746_v3 = vsel %vm2732_vm3, %v2707_v43, %v2703_v13  ;;  %v2877_v37 = vrot.slane %v2819_v39, %v4265_v54 }
0x60fb   :  { %v2650_v57 = vpop.permute.xlu1 %2649 }
0x60fc   :  { %v2711_v53 = vrot.slane %v2650_v57, %v4265_v54 }
0x60fd   :  { %v2822_v38 = vpop.permute.xlu0 %2821 }
0x60fe   :  { %v2747_v20 = vsel %vm2734_vm4, %v2711_v53, %v2746_v3  ;;  %v2881_v44 = vrot.slane %v2822_v38, %v4265_v54 }
0x60ff   :  { %v2656_v56 = vpop.permute.xlu1 %2655  ;;  %v2748_v24 = vsel %vm2736_vm5, %v2715_v25, %v2747_v20 }
0x6100   :  { %v2719_v22 = vrot.slane %v2656_v56, %v4265_v54 }
0x6101   :  { %v4255_v47 = vpop.permute.xlu0 %2824 }
0x6102   :  { %v2749_v6 = vsel %vm2738_vm6, %v2719_v22, %v2748_v24  ;;  %v2885_v52 = vrot.slane %v4255_v47, %v4265_v54 }
0x6103   :  { %v2816_v61 = vpop.permute.xlu1 %2815  ;;  %v2750_v11 = vsel %vm2740_vm7, %v2723_v31, %v2749_v6 }
0x6104   :  { %v2873_v26 = vrot.slane %v2816_v61, %v4265_v54 }
0x6105   :  { %v4257_v62 = vpop.permute.xlu0 %2827 }
0x6106   :  { %v2909_v28 = vsel %vm2732_vm3, %v2877_v37, %v2873_v26  ;;  %v2889_v29 = vrot.slane %v4257_v62, %v4265_v54 }
0x6107   :  { %v4260_v9 = vpop.permute.xlu1 %2797  ;;  %v2910_v48 = vsel %vm2734_vm4, %v2881_v44, %v2909_v28 }
0x6108   :  { %v2911_v49 = vsel %vm2736_vm5, %v2885_v52, %v2910_v48  ;;  %v2849_v32 = vrot.slane %v4260_v9, %v4265_v54 }
0x6109   :  { %v4262_v8 = vpop.permute.xlu0 %2830  ;;  %v2912_v56 = vsel %vm2738_vm6, %v2889_v29, %v2911_v49 }
0x610a   :  { %v2893_v34 = vrot.slane %v4262_v8, %v4265_v54 }
0x610b   :  { %v4267_v33 = vpop.permute.xlu1 %2800 }
0x610c   :  { %v2853_v45 = vrot.slane %v4267_v33, %v4265_v54  ;;  %v2913_v4 = vsel %vm2740_vm7, %v2893_v34, %v2912_v56 }
0x610d   :  { %v4270_v21 = vpop.permute.xlu0 %2809 }
0x610e   :  { %v2865_v53 = vrot.slane %v4270_v21, %v4265_v54 }
0x610f   :  { %v4274_v0 = vpop.permute.xlu1 %2803 }
0x6110   :  { %v2857_v39 = vrot.slane %v4274_v0, %v4265_v54 }
0x6111   :  { %v2620_v1 = vpop.permute.xlu0 %2619 }
0x6112   :  { %v2671_v5 = vrot.slane %v2620_v1, %v4265_v54 }
0x6113   :  { %v2807_v18 = vpop.permute.xlu1 %2806 }
0x6114   :  { %v2733_v7 = vsel %vm2732_vm3, %v2675_v16, %v2671_v5  ;;  %v2861_v47 = vrot.slane %v2807_v18, %v4265_v54 }
0x6115   :  { %v2735_v50 = vsel %vm2734_vm4, %v2679_v14, %v2733_v7  ;;  %v2665_v12 = vpop.permute.xlu0 %2664 }
0x6116   :  { %v2737_v58 = vsel %vm2736_vm5, %v2683_v27, %v2735_v50  ;;  %v2731_v35 = vrot.slane %v2665_v12, %v4265_v54 }
0x6117   :  { %v2739_v15 = vsel %vm2738_vm6, %v2687_v60, %v2737_v58  ;;  %v2662_v42 = vpop.permute.xlu1 %2661 }
0x6118   :  { %v2741_v2 = vsel %vm2740_vm7, %v2691_v36, %v2739_v15  ;;  %v2727_v19 = vrot.slane %v2662_v42, %v4265_v54 }
0x6119   :  { %v2743_v63 = vsel %vm2742_vm8, %v2695_v41, %v2741_v2  ;;  %v2837_v46 = vpop.permute.xlu0 %2836 }
0x611a   :  { %v2745_v59 = vsel %vm2744_vm9, %v2699_v30, %v2743_v63  ;;  %v2751_v40 = vsel %vm2742_vm8, %v2727_v19, %v2750_v11  ;;  %v2901_v9 = vrot.slane %v2837_v46, %v4265_v54 }
0x611b   :  { %2756 = vst.msk [vmem:[%s4366_s6] sm:$0xff] %vm2755_vm10, %v2745_v59  ;;  %v2752_v51 = vsel %vm2744_vm9, %v2731_v35, %v2751_v40  ;;  %v2792_v17 = vpop.permute.xlu1 %2791 }
0x611c   :  { %2757 = vst.msk [vmem:[%s4366_s6 + $0x8] sm:$0xff] %vm2755_vm10, %v2752_v51  ;;  %v2841_v23 = vrot.slane %v2792_v17, %v4265_v54 }
0x611e   :  { %v2902_v55 = vsel %vm2732_vm3, %v2845_v10, %v2841_v23 }
0x611f   :  { %v2903_v57 = vsel %vm2734_vm4, %v2849_v32, %v2902_v55  ;;  %v2834_v38 = vpop.permute.xlu1 %2833 }
0x6120   :  { %v2904_v61 = vsel %vm2736_vm5, %v2853_v45, %v2903_v57  ;;  %v2897_v62 = vrot.slane %v2834_v38, %v4265_v54 }
0x6121   :  { %v2905_v8 = vsel %vm2738_vm6, %v2857_v39, %v2904_v61 }
0x6122   :  { %v2914_v33 = vsel %vm2742_vm8, %v2897_v62, %v2913_v4  ;;  %v2906_v13 = vsel %vm2740_vm7, %v2861_v47, %v2905_v8 }
0x6123   :  { %v2915_v43 = vsel %vm2744_vm9, %v2901_v9, %v2914_v33  ;;  %v2813_v0 = vpop.permute.xlu1 %2812  ;;  %v2907_v1 = vsel %vm2742_vm8, %v2865_v53, %v2906_v13 }
0x6124   :  { %3040 = vst.msk [vmem:[%s4366_s6 + $0x18] sm:$0xff] %vm2755_vm10, %v2915_v43  ;;  %v2869_v3 = vrot.slane %v2813_v0, %v4265_v54 }
0x6126   :  { %v2908_v16 = vsel %vm2744_vm9, %v2869_v3, %v2907_v1 }
0x6127   :  { %3039 = vst.msk [vmem:[%s4366_s6 + $0x10] sm:$0xff] %vm2755_vm10, %v2908_v16 }

</bundles_post_ra>
